<compile_context>
chip_gen: v7x
topology: tpu7x:2x2x1
jax: 0.10.0
libtpu: 0.0.40
codegen_flags: <defaults>
</compile_context>

<pallas_src>
import functools

import jax
import jax.numpy as jnp
from jax.experimental import pallas as pl
from jax.experimental.pallas import tpu as pltpu

EPS_LN = 1e-5


def _layernorm(x, w, b):
    mu = jnp.mean(x, axis=-1, keepdims=True)
    var = jnp.mean((x - mu) ** 2, axis=-1, keepdims=True)
    return (x - mu) * jax.lax.rsqrt(var + EPS_LN) * w + b


# ---------------- fused encoder kernel ---------------------------------------
def _encoder_kernel(patches_ref, wpatch_ref, clspos_ref, lnprew_ref, lnpreb_ref,
                    ln1w_ref, ln1b_ref, wqkv_ref, bqkv_ref, wo_ref, bo_ref,
                    ln2w_ref, ln2b_ref, w1_ref, b1_ref, w2_ref, b2_ref,
                    lnpw_ref, lnpb_ref, proj_ref,
                    o_ref, x_scr, *, images_per_block, seq_len, num_heads,
                    normalize):
    layer = pl.program_id(1)
    num_layers = pl.num_programs(1)
    BB, S = images_per_block, seq_len

    # ---- layer 0: patch-embed matmul + CLS/pos embed + ln_pre (once / block)
    @pl.when(layer == 0)
    def _():
        tok = jnp.dot(patches_ref[...], wpatch_ref[...],
                      preferred_element_type=jnp.float32)      # (BB*S, D)
        x0 = tok + clspos_ref[...]      # CLS rows get cls+pos[0]; others +pos
        x_scr[...] = _layernorm(x0, lnprew_ref[...], lnpreb_ref[...])

    # ---- pre-norm transformer block for this layer (all BB images at once) --
    x = x_scr[...]                                             # (BB*S, D) f32
    R, D = x.shape
    hd = D // num_heads

    h = _layernorm(x, ln1w_ref[...], ln1b_ref[...]).astype(jnp.bfloat16)
    qkv = jnp.dot(h, wqkv_ref[...],
                  preferred_element_type=jnp.float32) + bqkv_ref[...]

    # 1/sqrt(hd) is already folded into the Q columns of wqkv/bqkv.
    # Attention is computed per image / per head (BB, H are small & static);
    # the per-image residual update is written through the resident scratch.
    for bb in range(BB):
        r0 = bb * S
        attn_bb = bo_ref[...]                                  # (1, D) -> bcast
        for hh in range(num_heads):
            lo = hh * hd
            qh = qkv[r0:r0 + S, lo:lo + hd].astype(jnp.bfloat16)
            kh = qkv[r0:r0 + S, D + lo:D + lo + hd].astype(jnp.bfloat16)
            vh = qkv[r0:r0 + S, 2 * D + lo:2 * D + lo + hd].astype(jnp.bfloat16)
            s = jnp.dot(qh, kh.T, preferred_element_type=jnp.float32)
            s = s - jnp.max(s, axis=-1, keepdims=True)
            p = jnp.exp(s)
            p = p * pl.reciprocal(jnp.sum(p, axis=-1, keepdims=True),
                                  approx=True)
            ctx = jnp.dot(p.astype(jnp.bfloat16), vh,
                          preferred_element_type=jnp.float32)  # (S, hd)
            # no lane concat: accumulate through this head's rows of wo
            attn_bb = attn_bb + jnp.dot(ctx.astype(jnp.bfloat16),
                                        wo_ref[lo:lo + hd, :],
                                        preferred_element_type=jnp.float32)
        x_scr[r0:r0 + S, :] = x[r0:r0 + S, :] + attn_bb

    x = x_scr[...]                                             # x + attn

    h2 = _layernorm(x, ln2w_ref[...], ln2b_ref[...]).astype(jnp.bfloat16)
    m = jnp.dot(h2, w1_ref[...],
                preferred_element_type=jnp.float32) + b1_ref[...]
    m = m * jax.nn.sigmoid(1.702 * m)                          # QuickGELU (f32)
    m = jnp.dot(m.astype(jnp.bfloat16), w2_ref[...],
                preferred_element_type=jnp.float32) + b2_ref[...]
    x_new = x + m
    x_scr[...] = x_new

    # ---- final layer: CLS pool + ln_post + projection + L2 normalize --------
    @pl.when(layer == num_layers - 1)
    def _():
        for bb in range(BB):
            cls_tok = x_new[bb * S:bb * S + 1, :]              # CLS pooling
            hp = _layernorm(cls_tok, lnpw_ref[...], lnpb_ref[...])
            y = jnp.dot(hp.astype(jnp.bfloat16), proj_ref[...],
                        preferred_element_type=jnp.float32)    # (1, O)
            if normalize:
                nrm = jnp.sqrt(jnp.sum(y * y, axis=-1, keepdims=True))
                y = y / jnp.maximum(nrm, 1e-12)                # F.normalize
            o_ref[bb:bb + 1, :] = y


# ---------------- full encode_image forward -----------------------------------
def encode_image(images, ep, *, patch_size, num_heads, normalize=True,
                 images_per_block=None):
    B, C, H, W = images.shape
    P = patch_size
    gh, gw = H // P, W // P
    N = gh * gw
    K = C * P * P
    S = N + 1
    D = ep["w_patch"].shape[1]
    M = ep["w1"].shape[2]
    O = ep["proj"].shape[1]
    L = ep["wqkv"].shape[0]

    BB = min(B, 8) if images_per_block is None else images_per_block
    while B % BB:                       # largest divisor of B not exceeding BB
        BB -= 1
    NB = B // BB
    R = BB * S

    # im2col, flattened in (C, ph, pw) order to match the conv1 weight layout.
    # TODO(synk): fuse the im2col into the kernel via a manual strided DMA so
    # the transposed image copy is never materialized in HBM at real scale.
    x = images.reshape(B, C, gh, P, gw, P)
    x = x.transpose(0, 2, 4, 1, 3, 5).reshape(B, N, K)
    # Row 0 of each image is the CLS slot: a zero patch row makes the
    # patch-embed matmul contribute nothing there; CLS + pos added in-kernel.
    patches = jnp.concatenate([jnp.zeros((B, 1, K), x.dtype), x], axis=1)
    patches = patches.astype(jnp.bfloat16).reshape(NB, R, K)
    clspos = jnp.tile(ep["cls_pos"], (BB, 1))                  # (BB*S, D)

    kernel = functools.partial(_encoder_kernel, images_per_block=BB,
                               seq_len=S, num_heads=num_heads,
                               normalize=normalize)

    const2 = lambda b, l: (0, 0)
    layer3 = lambda b, l: (l, 0, 0)

    in_specs = [
        pl.BlockSpec((None, R, K), lambda b, l: (b, 0, 0)),        # patches
        pl.BlockSpec((K, D), const2),                              # w_patch
        pl.BlockSpec((R, D), const2),                              # cls_pos (tiled)
        pl.BlockSpec((1, D), const2),                              # ln_pre_w
        pl.BlockSpec((1, D), const2),                              # ln_pre_b
        pl.BlockSpec((None, 1, D), layer3),                        # ln1_w
        pl.BlockSpec((None, 1, D), layer3),                        # ln1_b
        pl.BlockSpec((None, D, 3 * D), layer3),                    # wqkv
        pl.BlockSpec((None, 1, 3 * D), layer3),                    # bqkv
        pl.BlockSpec((None, D, D), layer3),                        # wo
        pl.BlockSpec((None, 1, D), layer3),                        # bo
        pl.BlockSpec((None, 1, D), layer3),                        # ln2_w
        pl.BlockSpec((None, 1, D), layer3),                        # ln2_b
        pl.BlockSpec((None, D, M), layer3),                        # w1
        pl.BlockSpec((None, 1, M), layer3),                        # b1
        pl.BlockSpec((None, M, D), layer3),                        # w2
        pl.BlockSpec((None, 1, D), layer3),                        # b2
        pl.BlockSpec((1, D), const2),                              # ln_post_w
        pl.BlockSpec((1, D), const2),                              # ln_post_b
        pl.BlockSpec((D, O), const2),                              # proj
    ]

    # Advisory cost estimate for the fused encoder.
    per_layer_flops = (2 * R * D * (3 * D) + 4 * BB * S * S * D
                       + 2 * R * D * D + 4 * R * D * M)
    flops = NB * (2 * R * K * D + L * per_layer_flops + BB * 2 * D * O)
    transcend = NB * L * (BB * num_heads * S * S + R * M)
    layer_bytes = 2 * (D * 3 * D + D * D + 2 * D * M) + 4 * (3 * D + 5 * D + M)
    bytes_accessed = (NB * (2 * R * K + L * layer_bytes + 4 * BB * O)
                      + 2 * K * D + 4 * R * D + 2 * D * O + 8 * D)

    out = pl.pallas_call(
        kernel,
        out_shape=jax.ShapeDtypeStruct((NB, BB, O), jnp.float32),
        grid=(NB, L),
        in_specs=in_specs,
        out_specs=pl.BlockSpec((None, BB, O), lambda b, l: (b, 0, 0)),
        scratch_shapes=[pltpu.VMEM((R, D), jnp.float32)],   # resident residual
        compiler_params=pltpu.CompilerParams(
            dimension_semantics=("parallel", "arbitrary"),
            vmem_limit_bytes=32 * 1024 * 1024),
        cost_estimate=pl.CostEstimate(flops=int(flops),
                                      transcendentals=int(transcend),
                                      bytes_accessed=int(bytes_accessed)),
    )(patches, ep["w_patch"], clspos, ep["ln_pre_w"], ep["ln_pre_b"],
      ep["ln1_w"], ep["ln1_b"], ep["wqkv"], ep["bqkv"], ep["wo"], ep["bo"],
      ep["ln2_w"], ep["ln2_b"], ep["w1"], ep["b1"], ep["w2"], ep["b2"],
      ep["ln_post_w"], ep["ln_post_b"], ep["proj"])
    return out.reshape(B, O)


# ---------------- deterministic synthetic parameters (PyTorch-like layout) ----
def init_params(key, *, C, P, D, mlp_dim, num_layers, out_dim, seq_len):
    keys = jax.random.split(key, 4 + num_layers)

    def nrm(k, shape, scale=0.02):
        return scale * jax.random.normal(k, shape, jnp.float32)

    params = {
        "w_patch": nrm(keys[0], (C * P * P, D)),   # conv1 weight, bias=False
        "cls": nrm(keys[1], (1, 1, D)),
        "pos": nrm(keys[2], (1, seq_len, D)),
        "ln_pre_w": jnp.ones((1, D), jnp.float32),
        "ln_pre_b": jnp.zeros((1, D), jnp.float32),
        "ln_post_w": jnp.ones((1, D), jnp.float32),
        "ln_post_b": jnp.zeros((1, D), jnp.float32),
        "proj": nrm(keys[3], (D, out_dim)),
        "blocks": [],
    }
    for l in range(num_layers):
        bk = jax.random.split(keys[4 + l], 4)
        params["blocks"].append({
            "ln1_w": jnp.ones((1, D), jnp.float32),
            "ln1_b": jnp.zeros((1, D), jnp.float32),
            "wqkv": nrm(bk[0], (D, 3 * D)),
            "bqkv": jnp.zeros((1, 3 * D), jnp.float32),
            "wo": nrm(bk[1], (D, D)),
            "bo": jnp.zeros((1, D), jnp.float32),
            "ln2_w": jnp.ones((1, D), jnp.float32),
            "ln2_b": jnp.zeros((1, D), jnp.float32),
            "w1": nrm(bk[2], (D, mlp_dim)),
            "b1": jnp.zeros((1, mlp_dim), jnp.float32),
            "w2": nrm(bk[3], (mlp_dim, D)),
            "b2": jnp.zeros((1, D), jnp.float32),
        })
    return params


def prepare_params(params, *, num_heads):
    """Stack per-layer weights, fold the QK scale into wqkv/bqkv, cast matmul
    weights to bf16, and pre-combine CLS + positional embeddings."""
    D = params["proj"].shape[0]
    hd = D // num_heads
    scale = 1.0 / float(hd) ** 0.5

    def stack(k):
        return jnp.stack([blk[k] for blk in params["blocks"]], axis=0)

    wqkv = stack("wqkv")                      # (L, D, 3D)
    bqkv = stack("bqkv")                      # (L, 1, 3D)
    qcols = jnp.concatenate([jnp.full((D,), scale, jnp.float32),
                             jnp.ones((2 * D,), jnp.float32)])
    wqkv = wqkv * qcols[None, None, :]
    bqkv = bqkv * qcols[None, None, :]

    pos = params["pos"][0]                    # (S, D)
    cls_pos = jnp.concatenate([pos[:1] + params["cls"][0], pos[1:]], axis=0)

    bf16 = jnp.bfloat16
    return {
        "w_patch": params["w_patch"].astype(bf16),
        "cls_pos": cls_pos,
        "ln_pre_w": params["ln_pre_w"],
        "ln_pre_b": params["ln_pre_b"],
        "ln1_w": stack("ln1_w"),
        "ln1_b": stack("ln1_b"),
        "wqkv": wqkv.astype(bf16),
        "bqkv": bqkv,
        "wo": stack("wo").astype(bf16),
        "bo": stack("bo"),
        "ln2_w": stack("ln2_w"),
        "ln2_b": stack("ln2_b"),
        "w1": stack("w1").astype(bf16),
        "b1": stack("b1"),
        "w2": stack("w2").astype(bf16),
        "b2": stack("b2"),
        "ln_post_w": params["ln_post_w"],
        "ln_post_b": params["ln_post_b"],
        "proj": params["proj"].astype(bf16),
    }


if __name__ == "__main__":
    # Small synthetic ViT config with lane-dense dims (real ViT-B-16: 224x224,
    # D=768, 12 layers, out=512).
    B, C, H, W = 2, 3, 32, 32
    PATCH = 16
    D = 128
    NUM_HEADS = 4
    MLP_DIM = 4 * D
    NUM_LAYERS = 2
    OUT_DIM = 128
    SEQ = (H // PATCH) * (W // PATCH) + 1   # patches + CLS

    root = jax.random.PRNGKey(0)
    k_params, k_img = jax.random.split(root)
    params = init_params(k_params, C=C, P=PATCH, D=D, mlp_dim=MLP_DIM,
                         num_layers=NUM_LAYERS, out_dim=OUT_DIM, seq_len=SEQ)
    eparams = prepare_params(params, num_heads=NUM_HEADS)
    images = jax.random.normal(k_img, (B, C, H, W), jnp.float32)

    feats = encode_image(images, eparams, patch_size=PATCH,
                         num_heads=NUM_HEADS, normalize=True)
    feats = jax.block_until_ready(feats)
    assert feats.shape == (B, OUT_DIM)
    assert bool(jnp.all(jnp.isfinite(feats)))
    print("KERNEL_OK")
</pallas_src>

<mosaic_0001>
module attributes {stable_mosaic.version = 11 : i64} {
  func.func @_encoder_kernel(%arg0: i32, %arg1: i32, %arg2: memref<1x10x768xbf16, #tpu.memory_space<vmem>>, %arg3: memref<768x128xbf16, #tpu.memory_space<vmem>>, %arg4: memref<10x128xf32, #tpu.memory_space<vmem>>, %arg5: memref<1x128xf32, #tpu.memory_space<vmem>>, %arg6: memref<1x128xf32, #tpu.memory_space<vmem>>, %arg7: memref<1x1x128xf32, #tpu.memory_space<vmem>>, %arg8: memref<1x1x128xf32, #tpu.memory_space<vmem>>, %arg9: memref<1x128x384xbf16, #tpu.memory_space<vmem>>, %arg10: memref<1x1x384xf32, #tpu.memory_space<vmem>>, %arg11: memref<1x128x128xbf16, #tpu.memory_space<vmem>>, %arg12: memref<1x1x128xf32, #tpu.memory_space<vmem>>, %arg13: memref<1x1x128xf32, #tpu.memory_space<vmem>>, %arg14: memref<1x1x128xf32, #tpu.memory_space<vmem>>, %arg15: memref<1x128x512xbf16, #tpu.memory_space<vmem>>, %arg16: memref<1x1x512xf32, #tpu.memory_space<vmem>>, %arg17: memref<1x512x128xbf16, #tpu.memory_space<vmem>>, %arg18: memref<1x1x128xf32, #tpu.memory_space<vmem>>, %arg19: memref<1x128xf32, #tpu.memory_space<vmem>>, %arg20: memref<1x128xf32, #tpu.memory_space<vmem>>, %arg21: memref<128x128xbf16, #tpu.memory_space<vmem>>, %arg22: memref<1x2x128xf32, #tpu.memory_space<vmem>>, %arg23: memref<10x128xf32, #tpu.memory_space<vmem>>) attributes {dimension_semantics = [#tpu.dimension_semantics<parallel>, #tpu.dimension_semantics<arbitrary>], iteration_bounds = array<i64: 1, 2>, scalar_prefetch = 0 : i64, scratch_operands = 1 : i64, tpu.core_type = #tpu.core_type<tc>, window_params = [{transform_indices = @transform_0, window_bounds = array<i64: 1, 10, 768>}, {pipeline_mode = #tpu.pipeline_mode<synchronous>, transform_indices = @transform_1, window_bounds = array<i64: 768, 128>}, {pipeline_mode = #tpu.pipeline_mode<synchronous>, transform_indices = @transform_2, window_bounds = array<i64: 10, 128>}, {pipeline_mode = #tpu.pipeline_mode<synchronous>, transform_indices = @transform_3, window_bounds = array<i64: 1, 128>}, {pipeline_mode = #tpu.pipeline_mode<synchronous>, transform_indices = @transform_4, window_bounds = array<i64: 1, 128>}, {transform_indices = @transform_5, window_bounds = array<i64: 1, 1, 128>}, {transform_indices = @transform_6, window_bounds = array<i64: 1, 1, 128>}, {transform_indices = @transform_7, window_bounds = array<i64: 1, 128, 384>}, {transform_indices = @transform_8, window_bounds = array<i64: 1, 1, 384>}, {transform_indices = @transform_9, window_bounds = array<i64: 1, 128, 128>}, {transform_indices = @transform_10, window_bounds = array<i64: 1, 1, 128>}, {transform_indices = @transform_11, window_bounds = array<i64: 1, 1, 128>}, {transform_indices = @transform_12, window_bounds = array<i64: 1, 1, 128>}, {transform_indices = @transform_13, window_bounds = array<i64: 1, 128, 512>}, {transform_indices = @transform_14, window_bounds = array<i64: 1, 1, 512>}, {transform_indices = @transform_15, window_bounds = array<i64: 1, 512, 128>}, {transform_indices = @transform_16, window_bounds = array<i64: 1, 1, 128>}, {pipeline_mode = #tpu.pipeline_mode<synchronous>, transform_indices = @transform_17, window_bounds = array<i64: 1, 128>}, {pipeline_mode = #tpu.pipeline_mode<synchronous>, transform_indices = @transform_18, window_bounds = array<i64: 1, 128>}, {pipeline_mode = #tpu.pipeline_mode<synchronous>, transform_indices = @transform_19, window_bounds = array<i64: 128, 128>}, {transform_indices = @transform_20, window_bounds = array<i64: 1, 2, 128>}]} {
    %c0_i32 = arith.constant 0 : i32
    %0 = arith.cmpi eq, %arg1, %c0_i32 : i32
    %1 = arith.extui %0 : i1 to i32
    %c0_i32_0 = arith.constant 0 : i32
    %2 = arith.cmpi ne, %1, %c0_i32_0 : i32
    scf.if %2 {
      %c0_121 = arith.constant 0 : index
      %c0_122 = arith.constant 0 : index
      %c0_123 = arith.constant 0 : index
      %306 = vector.load %arg2[%c0_121, %c0_122, %c0_123] : memref<1x10x768xbf16, #tpu.memory_space<vmem>>, vector<1x10x768xbf16>
      %307 = vector.shape_cast %306 : vector<1x10x768xbf16> to vector<10x768xbf16>
      %c0_124 = arith.constant 0 : index
      %c0_125 = arith.constant 0 : index
      %308 = vector.load %arg3[%c0_124, %c0_125] : memref<768x128xbf16, #tpu.memory_space<vmem>>, vector<768x128xbf16>
      %cst_126 = arith.constant dense<0.000000e+00> : vector<10x128xf32>
      %309 = tpu.matmul %307, %308, %cst_126 {dimension_numbers = #tpu.dot_dimension_numbers<[1], [0], [0], [1], [0, 0, 1, 1], [], []>} : vector<10x768xbf16>, vector<768x128xbf16>, vector<10x128xf32> -> vector<10x128xf32>
      %c0_127 = arith.constant 0 : index
      %c0_128 = arith.constant 0 : index
      %310 = vector.load %arg4[%c0_127, %c0_128] : memref<10x128xf32, #tpu.memory_space<vmem>>, vector<10x128xf32>
      %311 = arith.addf %309, %310 : vector<10x128xf32>
      %c0_129 = arith.constant 0 : index
      %c0_130 = arith.constant 0 : index
      %312 = vector.load %arg5[%c0_129, %c0_130] : memref<1x128xf32, #tpu.memory_space<vmem>>, vector<1x128xf32>
      %c0_131 = arith.constant 0 : index
      %c0_132 = arith.constant 0 : index
      %313 = vector.load %arg6[%c0_131, %c0_132] : memref<1x128xf32, #tpu.memory_space<vmem>>, vector<1x128xf32>
      %cst_133 = arith.constant dense<0.000000e+00> : vector<10xf32>
      %314 = vector.multi_reduction <add>, %311, %cst_133 [1] : vector<10x128xf32> to vector<10xf32>
      %315 = vector.shape_cast %314 : vector<10xf32> to vector<10x1xf32>
      %cst_134 = arith.constant 1.280000e+02 : f32
      %316 = vector.broadcast %cst_134 : f32 to vector<10x1xf32>
      %317 = arith.divf %315, %316 : vector<10x1xf32>
      %318 = vector.broadcast %317 : vector<10x1xf32> to vector<10x128xf32>
      %319 = arith.subf %311, %318 : vector<10x128xf32>
      %320 = arith.mulf %319, %319 : vector<10x128xf32>
      %cst_135 = arith.constant dense<0.000000e+00> : vector<10xf32>
      %321 = vector.multi_reduction <add>, %320, %cst_135 [1] : vector<10x128xf32> to vector<10xf32>
      %322 = vector.shape_cast %321 : vector<10xf32> to vector<10x1xf32>
      %cst_136 = arith.constant 1.280000e+02 : f32
      %323 = vector.broadcast %cst_136 : f32 to vector<10x1xf32>
      %324 = arith.divf %322, %323 : vector<10x1xf32>
      %325 = vector.broadcast %317 : vector<10x1xf32> to vector<10x128xf32>
      %326 = arith.subf %311, %325 : vector<10x128xf32>
      %cst_137 = arith.constant 9.99999974E-6 : f32
      %327 = vector.broadcast %cst_137 : f32 to vector<10x1xf32>
      %328 = arith.addf %324, %327 : vector<10x1xf32>
      %329 = math.rsqrt %328 : vector<10x1xf32>
      %330 = vector.broadcast %329 : vector<10x1xf32> to vector<10x128xf32>
      %331 = arith.mulf %326, %330 : vector<10x128xf32>
      %332 = vector.broadcast %312 : vector<1x128xf32> to vector<10x128xf32>
      %333 = arith.mulf %331, %332 : vector<10x128xf32>
      %334 = vector.broadcast %313 : vector<1x128xf32> to vector<10x128xf32>
      %335 = arith.addf %333, %334 : vector<10x128xf32>
      %c0_138 = arith.constant 0 : index
      %c0_139 = arith.constant 0 : index
      %336 = vector.load %arg23[%c0_138, %c0_139] : memref<10x128xf32, #tpu.memory_space<vmem>>, vector<10x128xf32>
      tpu.vector_store %arg23[%c0_138, %c0_139], %335 {strides = array<i32>} : memref<10x128xf32, #tpu.memory_space<vmem>>, vector<10x128xf32>,
    } else {
    }
    %c0 = arith.constant 0 : index
    %c0_1 = arith.constant 0 : index
    %3 = vector.load %arg23[%c0, %c0_1] : memref<10x128xf32, #tpu.memory_space<vmem>>, vector<10x128xf32>
    %c0_2 = arith.constant 0 : index
    %c0_3 = arith.constant 0 : index
    %c0_4 = arith.constant 0 : index
    %4 = vector.load %arg7[%c0_2, %c0_3, %c0_4] : memref<1x1x128xf32, #tpu.memory_space<vmem>>, vector<1x1x128xf32>
    %5 = vector.shape_cast %4 : vector<1x1x128xf32> to vector<1x128xf32>
    %c0_5 = arith.constant 0 : index
    %c0_6 = arith.constant 0 : index
    %c0_7 = arith.constant 0 : index
    %6 = vector.load %arg8[%c0_5, %c0_6, %c0_7] : memref<1x1x128xf32, #tpu.memory_space<vmem>>, vector<1x1x128xf32>
    %7 = vector.shape_cast %6 : vector<1x1x128xf32> to vector<1x128xf32>
    %cst = arith.constant dense<0.000000e+00> : vector<10xf32>
    %8 = vector.multi_reduction <add>, %3, %cst [1] : vector<10x128xf32> to vector<10xf32>
    %9 = vector.shape_cast %8 : vector<10xf32> to vector<10x1xf32>
    %cst_8 = arith.constant 1.280000e+02 : f32
    %10 = vector.broadcast %cst_8 : f32 to vector<10x1xf32>
    %11 = arith.divf %9, %10 : vector<10x1xf32>
    %12 = vector.broadcast %11 : vector<10x1xf32> to vector<10x128xf32>
    %13 = arith.subf %3, %12 : vector<10x128xf32>
    %14 = arith.mulf %13, %13 : vector<10x128xf32>
    %cst_9 = arith.constant dense<0.000000e+00> : vector<10xf32>
    %15 = vector.multi_reduction <add>, %14, %cst_9 [1] : vector<10x128xf32> to vector<10xf32>
    %16 = vector.shape_cast %15 : vector<10xf32> to vector<10x1xf32>
    %cst_10 = arith.constant 1.280000e+02 : f32
    %17 = vector.broadcast %cst_10 : f32 to vector<10x1xf32>
    %18 = arith.divf %16, %17 : vector<10x1xf32>
    %19 = vector.broadcast %11 : vector<10x1xf32> to vector<10x128xf32>
    %20 = arith.subf %3, %19 : vector<10x128xf32>
    %cst_11 = arith.constant 9.99999974E-6 : f32
    %21 = vector.broadcast %cst_11 : f32 to vector<10x1xf32>
    %22 = arith.addf %18, %21 : vector<10x1xf32>
    %23 = math.rsqrt %22 : vector<10x1xf32>
    %24 = vector.broadcast %23 : vector<10x1xf32> to vector<10x128xf32>
    %25 = arith.mulf %20, %24 : vector<10x128xf32>
    %26 = vector.broadcast %5 : vector<1x128xf32> to vector<10x128xf32>
    %27 = arith.mulf %25, %26 : vector<10x128xf32>
    %28 = vector.broadcast %7 : vector<1x128xf32> to vector<10x128xf32>
    %29 = arith.addf %27, %28 : vector<10x128xf32>
    %30 = arith.truncf %29 : vector<10x128xf32> to vector<10x128xbf16>
    %c0_12 = arith.constant 0 : index
    %c0_13 = arith.constant 0 : index
    %c0_14 = arith.constant 0 : index
    %31 = vector.load %arg9[%c0_12, %c0_13, %c0_14] : memref<1x128x384xbf16, #tpu.memory_space<vmem>>, vector<1x128x384xbf16>
    %32 = vector.shape_cast %31 : vector<1x128x384xbf16> to vector<128x384xbf16>
    %cst_15 = arith.constant dense<0.000000e+00> : vector<10x384xf32>
    %33 = tpu.matmul %30, %32, %cst_15 {dimension_numbers = #tpu.dot_dimension_numbers<[1], [0], [0], [1], [0, 0, 1, 1], [], []>} : vector<10x128xbf16>, vector<128x384xbf16>, vector<10x384xf32> -> vector<10x384xf32>
    %c0_16 = arith.constant 0 : index
    %c0_17 = arith.constant 0 : index
    %c0_18 = arith.constant 0 : index
    %34 = vector.load %arg10[%c0_16, %c0_17, %c0_18] : memref<1x1x384xf32, #tpu.memory_space<vmem>>, vector<1x1x384xf32>
    %35 = vector.shape_cast %34 : vector<1x1x384xf32> to vector<1x384xf32>
    %36 = vector.broadcast %35 : vector<1x384xf32> to vector<10x384xf32>
    %37 = arith.addf %33, %36 : vector<10x384xf32>
    %c0_19 = arith.constant 0 : index
    %c0_20 = arith.constant 0 : index
    %c0_21 = arith.constant 0 : index
    %38 = vector.load %arg12[%c0_19, %c0_20, %c0_21] : memref<1x1x128xf32, #tpu.memory_space<vmem>>, vector<1x1x128xf32>
    %39 = vector.shape_cast %38 : vector<1x1x128xf32> to vector<1x128xf32>
    %40 = vector.extract_strided_slice %37 {offsets = [0, 0], sizes = [5, 32], strides = [1, 1]} : vector<10x384xf32> to vector<5x32xf32>
    %41 = arith.truncf %40 : vector<5x32xf32> to vector<5x32xbf16>
    %42 = vector.extract_strided_slice %37 {offsets = [0, 128], sizes = [5, 32], strides = [1, 1]} : vector<10x384xf32> to vector<5x32xf32>
    %43 = arith.truncf %42 : vector<5x32xf32> to vector<5x32xbf16>
    %44 = vector.extract_strided_slice %37 {offsets = [0, 256], sizes = [5, 32], strides = [1, 1]} : vector<10x384xf32> to vector<5x32xf32>
    %45 = arith.truncf %44 : vector<5x32xf32> to vector<5x32xbf16>
    %46 = tpu.transpose %43, [1, 0] : vector<5x32xbf16> -> vector<32x5xbf16>
    %cst_22 = arith.constant dense<0.000000e+00> : vector<5x5xf32>
    %47 = tpu.matmul %41, %46, %cst_22 {dimension_numbers = #tpu.dot_dimension_numbers<[1], [0], [0], [1], [0, 0, 1, 1], [], []>} : vector<5x32xbf16>, vector<32x5xbf16>, vector<5x5xf32> -> vector<5x5xf32>
    %cst_23 = arith.constant dense<0xFF800000> : vector<5xf32>
    %48 = vector.multi_reduction <maximumf>, %47, %cst_23 [1] : vector<5x5xf32> to vector<5xf32>
    %49 = vector.shape_cast %48 : vector<5xf32> to vector<5x1xf32>
    %50 = vector.broadcast %49 : vector<5x1xf32> to vector<5x5xf32>
    %51 = arith.subf %47, %50 : vector<5x5xf32>
    %52 = math.exp %51 : vector<5x5xf32>
    %cst_24 = arith.constant dense<0.000000e+00> : vector<5xf32>
    %53 = vector.multi_reduction <add>, %52, %cst_24 [1] : vector<5x5xf32> to vector<5xf32>
    %54 = vector.shape_cast %53 : vector<5xf32> to vector<5x1xf32>
    %55 = tpu.reciprocal %54 {approx = true} : vector<5x1xf32> -> vector<5x1xf32>
    %56 = vector.broadcast %55 : vector<5x1xf32> to vector<5x5xf32>
    %57 = arith.mulf %52, %56 : vector<5x5xf32>
    %58 = arith.truncf %57 : vector<5x5xf32> to vector<5x5xbf16>
    %cst_25 = arith.constant dense<0.000000e+00> : vector<5x32xf32>
    %59 = tpu.matmul %58, %45, %cst_25 {dimension_numbers = #tpu.dot_dimension_numbers<[1], [0], [0], [1], [0, 0, 1, 1], [], []>} : vector<5x5xbf16>, vector<5x32xbf16>, vector<5x32xf32> -> vector<5x32xf32>
    %60 = arith.truncf %59 : vector<5x32xf32> to vector<5x32xbf16>
    %c0_26 = arith.constant 0 : index
    %c0_27 = arith.constant 0 : index
    %c0_28 = arith.constant 0 : index
    %61 = vector.load %arg11[%c0_26, %c0_27, %c0_28] : memref<1x128x128xbf16, #tpu.memory_space<vmem>>, vector<1x32x128xbf16>
    %62 = vector.shape_cast %61 : vector<1x32x128xbf16> to vector<32x128xbf16>
    %cst_29 = arith.constant dense<0.000000e+00> : vector<5x128xf32>
    %63 = tpu.matmul %60, %62, %cst_29 {dimension_numbers = #tpu.dot_dimension_numbers<[1], [0], [0], [1], [0, 0, 1, 1], [], []>} : vector<5x32xbf16>, vector<32x128xbf16>, vector<5x128xf32> -> vector<5x128xf32>
    %64 = vector.broadcast %39 : vector<1x128xf32> to vector<5x128xf32>
    %65 = arith.addf %64, %63 : vector<5x128xf32>
    %66 = vector.extract_strided_slice %37 {offsets = [0, 32], sizes = [5, 32], strides = [1, 1]} : vector<10x384xf32> to vector<5x32xf32>
    %67 = arith.truncf %66 : vector<5x32xf32> to vector<5x32xbf16>
    %68 = vector.extract_strided_slice %37 {offsets = [0, 160], sizes = [5, 32], strides = [1, 1]} : vector<10x384xf32> to vector<5x32xf32>
    %69 = arith.truncf %68 : vector<5x32xf32> to vector<5x32xbf16>
    %70 = vector.extract_strided_slice %37 {offsets = [0, 288], sizes = [5, 32], strides = [1, 1]} : vector<10x384xf32> to vector<5x32xf32>
    %71 = arith.truncf %70 : vector<5x32xf32> to vector<5x32xbf16>
    %72 = tpu.transpose %69, [1, 0] : vector<5x32xbf16> -> vector<32x5xbf16>
    %cst_30 = arith.constant dense<0.000000e+00> : vector<5x5xf32>
    %73 = tpu.matmul %67, %72, %cst_30 {dimension_numbers = #tpu.dot_dimension_numbers<[1], [0], [0], [1], [0, 0, 1, 1], [], []>} : vector<5x32xbf16>, vector<32x5xbf16>, vector<5x5xf32> -> vector<5x5xf32>
    %cst_31 = arith.constant dense<0xFF800000> : vector<5xf32>
    %74 = vector.multi_reduction <maximumf>, %73, %cst_31 [1] : vector<5x5xf32> to vector<5xf32>
    %75 = vector.shape_cast %74 : vector<5xf32> to vector<5x1xf32>
    %76 = vector.broadcast %75 : vector<5x1xf32> to vector<5x5xf32>
    %77 = arith.subf %73, %76 : vector<5x5xf32>
    %78 = math.exp %77 : vector<5x5xf32>
    %cst_32 = arith.constant dense<0.000000e+00> : vector<5xf32>
    %79 = vector.multi_reduction <add>, %78, %cst_32 [1] : vector<5x5xf32> to vector<5xf32>
    %80 = vector.shape_cast %79 : vector<5xf32> to vector<5x1xf32>
    %81 = tpu.reciprocal %80 {approx = true} : vector<5x1xf32> -> vector<5x1xf32>
    %82 = vector.broadcast %81 : vector<5x1xf32> to vector<5x5xf32>
    %83 = arith.mulf %78, %82 : vector<5x5xf32>
    %84 = arith.truncf %83 : vector<5x5xf32> to vector<5x5xbf16>
    %cst_33 = arith.constant dense<0.000000e+00> : vector<5x32xf32>
    %85 = tpu.matmul %84, %71, %cst_33 {dimension_numbers = #tpu.dot_dimension_numbers<[1], [0], [0], [1], [0, 0, 1, 1], [], []>} : vector<5x5xbf16>, vector<5x32xbf16>, vector<5x32xf32> -> vector<5x32xf32>
    %86 = arith.truncf %85 : vector<5x32xf32> to vector<5x32xbf16>
    %c0_34 = arith.constant 0 : index
    %c32 = arith.constant 32 : index
    %c0_35 = arith.constant 0 : index
    %87 = vector.load %arg11[%c0_34, %c32, %c0_35] : memref<1x128x128xbf16, #tpu.memory_space<vmem>>, vector<1x32x128xbf16>
    %88 = vector.shape_cast %87 : vector<1x32x128xbf16> to vector<32x128xbf16>
    %cst_36 = arith.constant dense<0.000000e+00> : vector<5x128xf32>
    %89 = tpu.matmul %86, %88, %cst_36 {dimension_numbers = #tpu.dot_dimension_numbers<[1], [0], [0], [1], [0, 0, 1, 1], [], []>} : vector<5x32xbf16>, vector<32x128xbf16>, vector<5x128xf32> -> vector<5x128xf32>
    %90 = arith.addf %65, %89 : vector<5x128xf32>
    %91 = vector.extract_strided_slice %37 {offsets = [0, 64], sizes = [5, 32], strides = [1, 1]} : vector<10x384xf32> to vector<5x32xf32>
    %92 = arith.truncf %91 : vector<5x32xf32> to vector<5x32xbf16>
    %93 = vector.extract_strided_slice %37 {offsets = [0, 192], sizes = [5, 32], strides = [1, 1]} : vector<10x384xf32> to vector<5x32xf32>
    %94 = arith.truncf %93 : vector<5x32xf32> to vector<5x32xbf16>
    %95 = vector.extract_strided_slice %37 {offsets = [0, 320], sizes = [5, 32], strides = [1, 1]} : vector<10x384xf32> to vector<5x32xf32>
    %96 = arith.truncf %95 : vector<5x32xf32> to vector<5x32xbf16>
    %97 = tpu.transpose %94, [1, 0] : vector<5x32xbf16> -> vector<32x5xbf16>
    %cst_37 = arith.constant dense<0.000000e+00> : vector<5x5xf32>
    %98 = tpu.matmul %92, %97, %cst_37 {dimension_numbers = #tpu.dot_dimension_numbers<[1], [0], [0], [1], [0, 0, 1, 1], [], []>} : vector<5x32xbf16>, vector<32x5xbf16>, vector<5x5xf32> -> vector<5x5xf32>
    %cst_38 = arith.constant dense<0xFF800000> : vector<5xf32>
    %99 = vector.multi_reduction <maximumf>, %98, %cst_38 [1] : vector<5x5xf32> to vector<5xf32>
    %100 = vector.shape_cast %99 : vector<5xf32> to vector<5x1xf32>
    %101 = vector.broadcast %100 : vector<5x1xf32> to vector<5x5xf32>
    %102 = arith.subf %98, %101 : vector<5x5xf32>
    %103 = math.exp %102 : vector<5x5xf32>
    %cst_39 = arith.constant dense<0.000000e+00> : vector<5xf32>
    %104 = vector.multi_reduction <add>, %103, %cst_39 [1] : vector<5x5xf32> to vector<5xf32>
    %105 = vector.shape_cast %104 : vector<5xf32> to vector<5x1xf32>
    %106 = tpu.reciprocal %105 {approx = true} : vector<5x1xf32> -> vector<5x1xf32>
    %107 = vector.broadcast %106 : vector<5x1xf32> to vector<5x5xf32>
    %108 = arith.mulf %103, %107 : vector<5x5xf32>
    %109 = arith.truncf %108 : vector<5x5xf32> to vector<5x5xbf16>
    %cst_40 = arith.constant dense<0.000000e+00> : vector<5x32xf32>
    %110 = tpu.matmul %109, %96, %cst_40 {dimension_numbers = #tpu.dot_dimension_numbers<[1], [0], [0], [1], [0, 0, 1, 1], [], []>} : vector<5x5xbf16>, vector<5x32xbf16>, vector<5x32xf32> -> vector<5x32xf32>
    %111 = arith.truncf %110 : vector<5x32xf32> to vector<5x32xbf16>
    %c0_41 = arith.constant 0 : index
    %c64 = arith.constant 64 : index
    %c0_42 = arith.constant 0 : index
    %112 = vector.load %arg11[%c0_41, %c64, %c0_42] : memref<1x128x128xbf16, #tpu.memory_space<vmem>>, vector<1x32x128xbf16>
    %113 = vector.shape_cast %112 : vector<1x32x128xbf16> to vector<32x128xbf16>
    %cst_43 = arith.constant dense<0.000000e+00> : vector<5x128xf32>
    %114 = tpu.matmul %111, %113, %cst_43 {dimension_numbers = #tpu.dot_dimension_numbers<[1], [0], [0], [1], [0, 0, 1, 1], [], []>} : vector<5x32xbf16>, vector<32x128xbf16>, vector<5x128xf32> -> vector<5x128xf32>
    %115 = arith.addf %90, %114 : vector<5x128xf32>
    %116 = vector.extract_strided_slice %37 {offsets = [0, 96], sizes = [5, 32], strides = [1, 1]} : vector<10x384xf32> to vector<5x32xf32>
    %117 = arith.truncf %116 : vector<5x32xf32> to vector<5x32xbf16>
    %118 = vector.extract_strided_slice %37 {offsets = [0, 224], sizes = [5, 32], strides = [1, 1]} : vector<10x384xf32> to vector<5x32xf32>
    %119 = arith.truncf %118 : vector<5x32xf32> to vector<5x32xbf16>
    %120 = vector.extract_strided_slice %37 {offsets = [0, 352], sizes = [5, 32], strides = [1, 1]} : vector<10x384xf32> to vector<5x32xf32>
    %121 = arith.truncf %120 : vector<5x32xf32> to vector<5x32xbf16>
    %122 = tpu.transpose %119, [1, 0] : vector<5x32xbf16> -> vector<32x5xbf16>
    %cst_44 = arith.constant dense<0.000000e+00> : vector<5x5xf32>
    %123 = tpu.matmul %117, %122, %cst_44 {dimension_numbers = #tpu.dot_dimension_numbers<[1], [0], [0], [1], [0, 0, 1, 1], [], []>} : vector<5x32xbf16>, vector<32x5xbf16>, vector<5x5xf32> -> vector<5x5xf32>
    %cst_45 = arith.constant dense<0xFF800000> : vector<5xf32>
    %124 = vector.multi_reduction <maximumf>, %123, %cst_45 [1] : vector<5x5xf32> to vector<5xf32>
    %125 = vector.shape_cast %124 : vector<5xf32> to vector<5x1xf32>
    %126 = vector.broadcast %125 : vector<5x1xf32> to vector<5x5xf32>
    %127 = arith.subf %123, %126 : vector<5x5xf32>
    %128 = math.exp %127 : vector<5x5xf32>
    %cst_46 = arith.constant dense<0.000000e+00> : vector<5xf32>
    %129 = vector.multi_reduction <add>, %128, %cst_46 [1] : vector<5x5xf32> to vector<5xf32>
    %130 = vector.shape_cast %129 : vector<5xf32> to vector<5x1xf32>
    %131 = tpu.reciprocal %130 {approx = true} : vector<5x1xf32> -> vector<5x1xf32>
    %132 = vector.broadcast %131 : vector<5x1xf32> to vector<5x5xf32>
    %133 = arith.mulf %128, %132 : vector<5x5xf32>
    %134 = arith.truncf %133 : vector<5x5xf32> to vector<5x5xbf16>
    %cst_47 = arith.constant dense<0.000000e+00> : vector<5x32xf32>
    %135 = tpu.matmul %134, %121, %cst_47 {dimension_numbers = #tpu.dot_dimension_numbers<[1], [0], [0], [1], [0, 0, 1, 1], [], []>} : vector<5x5xbf16>, vector<5x32xbf16>, vector<5x32xf32> -> vector<5x32xf32>
    %136 = arith.truncf %135 : vector<5x32xf32> to vector<5x32xbf16>
    %c0_48 = arith.constant 0 : index
    %c96 = arith.constant 96 : index
    %c0_49 = arith.constant 0 : index
    %137 = vector.load %arg11[%c0_48, %c96, %c0_49] : memref<1x128x128xbf16, #tpu.memory_space<vmem>>, vector<1x32x128xbf16>
    %138 = vector.shape_cast %137 : vector<1x32x128xbf16> to vector<32x128xbf16>
    %cst_50 = arith.constant dense<0.000000e+00> : vector<5x128xf32>
    %139 = tpu.matmul %136, %138, %cst_50 {dimension_numbers = #tpu.dot_dimension_numbers<[1], [0], [0], [1], [0, 0, 1, 1], [], []>} : vector<5x32xbf16>, vector<32x128xbf16>, vector<5x128xf32> -> vector<5x128xf32>
    %140 = arith.addf %115, %139 : vector<5x128xf32>
    %141 = vector.extract_strided_slice %3 {offsets = [0, 0], sizes = [5, 128], strides = [1, 1]} : vector<10x128xf32> to vector<5x128xf32>
    %142 = arith.addf %141, %140 : vector<5x128xf32>
    %c0_51 = arith.constant 0 : index
    %c0_52 = arith.constant 0 : index
    %143 = vector.load %arg23[%c0_51, %c0_52] : memref<10x128xf32, #tpu.memory_space<vmem>>, vector<5x128xf32>
    tpu.vector_store %arg23[%c0_51, %c0_52], %142 {strides = array<i32>} : memref<10x128xf32, #tpu.memory_space<vmem>>, vector<5x128xf32>,
    %c0_53 = arith.constant 0 : index
    %c0_54 = arith.constant 0 : index
    %c0_55 = arith.constant 0 : index
    %144 = vector.load %arg12[%c0_53, %c0_54, %c0_55] : memref<1x1x128xf32, #tpu.memory_space<vmem>>, vector<1x1x128xf32>
    %145 = vector.shape_cast %144 : vector<1x1x128xf32> to vector<1x128xf32>
    %146 = vector.extract_strided_slice %37 {offsets = [5, 0], sizes = [5, 32], strides = [1, 1]} : vector<10x384xf32> to vector<5x32xf32>
    %147 = arith.truncf %146 : vector<5x32xf32> to vector<5x32xbf16>
    %148 = vector.extract_strided_slice %37 {offsets = [5, 128], sizes = [5, 32], strides = [1, 1]} : vector<10x384xf32> to vector<5x32xf32>
    %149 = arith.truncf %148 : vector<5x32xf32> to vector<5x32xbf16>
    %150 = vector.extract_strided_slice %37 {offsets = [5, 256], sizes = [5, 32], strides = [1, 1]} : vector<10x384xf32> to vector<5x32xf32>
    %151 = arith.truncf %150 : vector<5x32xf32> to vector<5x32xbf16>
    %152 = tpu.transpose %149, [1, 0] : vector<5x32xbf16> -> vector<32x5xbf16>
    %cst_56 = arith.constant dense<0.000000e+00> : vector<5x5xf32>
    %153 = tpu.matmul %147, %152, %cst_56 {dimension_numbers = #tpu.dot_dimension_numbers<[1], [0], [0], [1], [0, 0, 1, 1], [], []>} : vector<5x32xbf16>, vector<32x5xbf16>, vector<5x5xf32> -> vector<5x5xf32>
    %cst_57 = arith.constant dense<0xFF800000> : vector<5xf32>
    %154 = vector.multi_reduction <maximumf>, %153, %cst_57 [1] : vector<5x5xf32> to vector<5xf32>
    %155 = vector.shape_cast %154 : vector<5xf32> to vector<5x1xf32>
    %156 = vector.broadcast %155 : vector<5x1xf32> to vector<5x5xf32>
    %157 = arith.subf %153, %156 : vector<5x5xf32>
    %158 = math.exp %157 : vector<5x5xf32>
    %cst_58 = arith.constant dense<0.000000e+00> : vector<5xf32>
    %159 = vector.multi_reduction <add>, %158, %cst_58 [1] : vector<5x5xf32> to vector<5xf32>
    %160 = vector.shape_cast %159 : vector<5xf32> to vector<5x1xf32>
    %161 = tpu.reciprocal %160 {approx = true} : vector<5x1xf32> -> vector<5x1xf32>
    %162 = vector.broadcast %161 : vector<5x1xf32> to vector<5x5xf32>
    %163 = arith.mulf %158, %162 : vector<5x5xf32>
    %164 = arith.truncf %163 : vector<5x5xf32> to vector<5x5xbf16>
    %cst_59 = arith.constant dense<0.000000e+00> : vector<5x32xf32>
    %165 = tpu.matmul %164, %151, %cst_59 {dimension_numbers = #tpu.dot_dimension_numbers<[1], [0], [0], [1], [0, 0, 1, 1], [], []>} : vector<5x5xbf16>, vector<5x32xbf16>, vector<5x32xf32> -> vector<5x32xf32>
    %166 = arith.truncf %165 : vector<5x32xf32> to vector<5x32xbf16>
    %c0_60 = arith.constant 0 : index
    %c0_61 = arith.constant 0 : index
    %c0_62 = arith.constant 0 : index
    %167 = vector.load %arg11[%c0_60, %c0_61, %c0_62] : memref<1x128x128xbf16, #tpu.memory_space<vmem>>, vector<1x32x128xbf16>
    %168 = vector.shape_cast %167 : vector<1x32x128xbf16> to vector<32x128xbf16>
    %cst_63 = arith.constant dense<0.000000e+00> : vector<5x128xf32>
    %169 = tpu.matmul %166, %168, %cst_63 {dimension_numbers = #tpu.dot_dimension_numbers<[1], [0], [0], [1], [0, 0, 1, 1], [], []>} : vector<5x32xbf16>, vector<32x128xbf16>, vector<5x128xf32> -> vector<5x128xf32>
    %170 = vector.broadcast %145 : vector<1x128xf32> to vector<5x128xf32>
    %171 = arith.addf %170, %169 : vector<5x128xf32>
    %172 = vector.extract_strided_slice %37 {offsets = [5, 32], sizes = [5, 32], strides = [1, 1]} : vector<10x384xf32> to vector<5x32xf32>
    %173 = arith.truncf %172 : vector<5x32xf32> to vector<5x32xbf16>
    %174 = vector.extract_strided_slice %37 {offsets = [5, 160], sizes = [5, 32], strides = [1, 1]} : vector<10x384xf32> to vector<5x32xf32>
    %175 = arith.truncf %174 : vector<5x32xf32> to vector<5x32xbf16>
    %176 = vector.extract_strided_slice %37 {offsets = [5, 288], sizes = [5, 32], strides = [1, 1]} : vector<10x384xf32> to vector<5x32xf32>
    %177 = arith.truncf %176 : vector<5x32xf32> to vector<5x32xbf16>
    %178 = tpu.transpose %175, [1, 0] : vector<5x32xbf16> -> vector<32x5xbf16>
    %cst_64 = arith.constant dense<0.000000e+00> : vector<5x5xf32>
    %179 = tpu.matmul %173, %178, %cst_64 {dimension_numbers = #tpu.dot_dimension_numbers<[1], [0], [0], [1], [0, 0, 1, 1], [], []>} : vector<5x32xbf16>, vector<32x5xbf16>, vector<5x5xf32> -> vector<5x5xf32>
    %cst_65 = arith.constant dense<0xFF800000> : vector<5xf32>
    %180 = vector.multi_reduction <maximumf>, %179, %cst_65 [1] : vector<5x5xf32> to vector<5xf32>
    %181 = vector.shape_cast %180 : vector<5xf32> to vector<5x1xf32>
    %182 = vector.broadcast %181 : vector<5x1xf32> to vector<5x5xf32>
    %183 = arith.subf %179, %182 : vector<5x5xf32>
    %184 = math.exp %183 : vector<5x5xf32>
    %cst_66 = arith.constant dense<0.000000e+00> : vector<5xf32>
    %185 = vector.multi_reduction <add>, %184, %cst_66 [1] : vector<5x5xf32> to vector<5xf32>
    %186 = vector.shape_cast %185 : vector<5xf32> to vector<5x1xf32>
    %187 = tpu.reciprocal %186 {approx = true} : vector<5x1xf32> -> vector<5x1xf32>
    %188 = vector.broadcast %187 : vector<5x1xf32> to vector<5x5xf32>
    %189 = arith.mulf %184, %188 : vector<5x5xf32>
    %190 = arith.truncf %189 : vector<5x5xf32> to vector<5x5xbf16>
    %cst_67 = arith.constant dense<0.000000e+00> : vector<5x32xf32>
    %191 = tpu.matmul %190, %177, %cst_67 {dimension_numbers = #tpu.dot_dimension_numbers<[1], [0], [0], [1], [0, 0, 1, 1], [], []>} : vector<5x5xbf16>, vector<5x32xbf16>, vector<5x32xf32> -> vector<5x32xf32>
    %192 = arith.truncf %191 : vector<5x32xf32> to vector<5x32xbf16>
    %c0_68 = arith.constant 0 : index
    %c32_69 = arith.constant 32 : index
    %c0_70 = arith.constant 0 : index
    %193 = vector.load %arg11[%c0_68, %c32_69, %c0_70] : memref<1x128x128xbf16, #tpu.memory_space<vmem>>, vector<1x32x128xbf16>
    %194 = vector.shape_cast %193 : vector<1x32x128xbf16> to vector<32x128xbf16>
    %cst_71 = arith.constant dense<0.000000e+00> : vector<5x128xf32>
    %195 = tpu.matmul %192, %194, %cst_71 {dimension_numbers = #tpu.dot_dimension_numbers<[1], [0], [0], [1], [0, 0, 1, 1], [], []>} : vector<5x32xbf16>, vector<32x128xbf16>, vector<5x128xf32> -> vector<5x128xf32>
    %196 = arith.addf %171, %195 : vector<5x128xf32>
    %197 = vector.extract_strided_slice %37 {offsets = [5, 64], sizes = [5, 32], strides = [1, 1]} : vector<10x384xf32> to vector<5x32xf32>
    %198 = arith.truncf %197 : vector<5x32xf32> to vector<5x32xbf16>
    %199 = vector.extract_strided_slice %37 {offsets = [5, 192], sizes = [5, 32], strides = [1, 1]} : vector<10x384xf32> to vector<5x32xf32>
    %200 = arith.truncf %199 : vector<5x32xf32> to vector<5x32xbf16>
    %201 = vector.extract_strided_slice %37 {offsets = [5, 320], sizes = [5, 32], strides = [1, 1]} : vector<10x384xf32> to vector<5x32xf32>
    %202 = arith.truncf %201 : vector<5x32xf32> to vector<5x32xbf16>
    %203 = tpu.transpose %200, [1, 0] : vector<5x32xbf16> -> vector<32x5xbf16>
    %cst_72 = arith.constant dense<0.000000e+00> : vector<5x5xf32>
    %204 = tpu.matmul %198, %203, %cst_72 {dimension_numbers = #tpu.dot_dimension_numbers<[1], [0], [0], [1], [0, 0, 1, 1], [], []>} : vector<5x32xbf16>, vector<32x5xbf16>, vector<5x5xf32> -> vector<5x5xf32>
    %cst_73 = arith.constant dense<0xFF800000> : vector<5xf32>
    %205 = vector.multi_reduction <maximumf>, %204, %cst_73 [1] : vector<5x5xf32> to vector<5xf32>
    %206 = vector.shape_cast %205 : vector<5xf32> to vector<5x1xf32>
    %207 = vector.broadcast %206 : vector<5x1xf32> to vector<5x5xf32>
    %208 = arith.subf %204, %207 : vector<5x5xf32>
    %209 = math.exp %208 : vector<5x5xf32>
    %cst_74 = arith.constant dense<0.000000e+00> : vector<5xf32>
    %210 = vector.multi_reduction <add>, %209, %cst_74 [1] : vector<5x5xf32> to vector<5xf32>
    %211 = vector.shape_cast %210 : vector<5xf32> to vector<5x1xf32>
    %212 = tpu.reciprocal %211 {approx = true} : vector<5x1xf32> -> vector<5x1xf32>
    %213 = vector.broadcast %212 : vector<5x1xf32> to vector<5x5xf32>
    %214 = arith.mulf %209, %213 : vector<5x5xf32>
    %215 = arith.truncf %214 : vector<5x5xf32> to vector<5x5xbf16>
    %cst_75 = arith.constant dense<0.000000e+00> : vector<5x32xf32>
    %216 = tpu.matmul %215, %202, %cst_75 {dimension_numbers = #tpu.dot_dimension_numbers<[1], [0], [0], [1], [0, 0, 1, 1], [], []>} : vector<5x5xbf16>, vector<5x32xbf16>, vector<5x32xf32> -> vector<5x32xf32>
    %217 = arith.truncf %216 : vector<5x32xf32> to vector<5x32xbf16>
    %c0_76 = arith.constant 0 : index
    %c64_77 = arith.constant 64 : index
    %c0_78 = arith.constant 0 : index
    %218 = vector.load %arg11[%c0_76, %c64_77, %c0_78] : memref<1x128x128xbf16, #tpu.memory_space<vmem>>, vector<1x32x128xbf16>
    %219 = vector.shape_cast %218 : vector<1x32x128xbf16> to vector<32x128xbf16>
    %cst_79 = arith.constant dense<0.000000e+00> : vector<5x128xf32>
    %220 = tpu.matmul %217, %219, %cst_79 {dimension_numbers = #tpu.dot_dimension_numbers<[1], [0], [0], [1], [0, 0, 1, 1], [], []>} : vector<5x32xbf16>, vector<32x128xbf16>, vector<5x128xf32> -> vector<5x128xf32>
    %221 = arith.addf %196, %220 : vector<5x128xf32>
    %222 = vector.extract_strided_slice %37 {offsets = [5, 96], sizes = [5, 32], strides = [1, 1]} : vector<10x384xf32> to vector<5x32xf32>
    %223 = arith.truncf %222 : vector<5x32xf32> to vector<5x32xbf16>
    %224 = vector.extract_strided_slice %37 {offsets = [5, 224], sizes = [5, 32], strides = [1, 1]} : vector<10x384xf32> to vector<5x32xf32>
    %225 = arith.truncf %224 : vector<5x32xf32> to vector<5x32xbf16>
    %226 = vector.extract_strided_slice %37 {offsets = [5, 352], sizes = [5, 32], strides = [1, 1]} : vector<10x384xf32> to vector<5x32xf32>
    %227 = arith.truncf %226 : vector<5x32xf32> to vector<5x32xbf16>
    %228 = tpu.transpose %225, [1, 0] : vector<5x32xbf16> -> vector<32x5xbf16>
    %cst_80 = arith.constant dense<0.000000e+00> : vector<5x5xf32>
    %229 = tpu.matmul %223, %228, %cst_80 {dimension_numbers = #tpu.dot_dimension_numbers<[1], [0], [0], [1], [0, 0, 1, 1], [], []>} : vector<5x32xbf16>, vector<32x5xbf16>, vector<5x5xf32> -> vector<5x5xf32>
    %cst_81 = arith.constant dense<0xFF800000> : vector<5xf32>
    %230 = vector.multi_reduction <maximumf>, %229, %cst_81 [1] : vector<5x5xf32> to vector<5xf32>
    %231 = vector.shape_cast %230 : vector<5xf32> to vector<5x1xf32>
    %232 = vector.broadcast %231 : vector<5x1xf32> to vector<5x5xf32>
    %233 = arith.subf %229, %232 : vector<5x5xf32>
    %234 = math.exp %233 : vector<5x5xf32>
    %cst_82 = arith.constant dense<0.000000e+00> : vector<5xf32>
    %235 = vector.multi_reduction <add>, %234, %cst_82 [1] : vector<5x5xf32> to vector<5xf32>
    %236 = vector.shape_cast %235 : vector<5xf32> to vector<5x1xf32>
    %237 = tpu.reciprocal %236 {approx = true} : vector<5x1xf32> -> vector<5x1xf32>
    %238 = vector.broadcast %237 : vector<5x1xf32> to vector<5x5xf32>
    %239 = arith.mulf %234, %238 : vector<5x5xf32>
    %240 = arith.truncf %239 : vector<5x5xf32> to vector<5x5xbf16>
    %cst_83 = arith.constant dense<0.000000e+00> : vector<5x32xf32>
    %241 = tpu.matmul %240, %227, %cst_83 {dimension_numbers = #tpu.dot_dimension_numbers<[1], [0], [0], [1], [0, 0, 1, 1], [], []>} : vector<5x5xbf16>, vector<5x32xbf16>, vector<5x32xf32> -> vector<5x32xf32>
    %242 = arith.truncf %241 : vector<5x32xf32> to vector<5x32xbf16>
    %c0_84 = arith.constant 0 : index
    %c96_85 = arith.constant 96 : index
    %c0_86 = arith.constant 0 : index
    %243 = vector.load %arg11[%c0_84, %c96_85, %c0_86] : memref<1x128x128xbf16, #tpu.memory_space<vmem>>, vector<1x32x128xbf16>
    %244 = vector.shape_cast %243 : vector<1x32x128xbf16> to vector<32x128xbf16>
    %cst_87 = arith.constant dense<0.000000e+00> : vector<5x128xf32>
    %245 = tpu.matmul %242, %244, %cst_87 {dimension_numbers = #tpu.dot_dimension_numbers<[1], [0], [0], [1], [0, 0, 1, 1], [], []>} : vector<5x32xbf16>, vector<32x128xbf16>, vector<5x128xf32> -> vector<5x128xf32>
    %246 = arith.addf %221, %245 : vector<5x128xf32>
    %247 = vector.extract_strided_slice %3 {offsets = [5, 0], sizes = [5, 128], strides = [1, 1]} : vector<10x128xf32> to vector<5x128xf32>
    %248 = arith.addf %247, %246 : vector<5x128xf32>
    %c5 = arith.constant 5 : index
    %c0_88 = arith.constant 0 : index
    %249 = vector.load %arg23[%c5, %c0_88] : memref<10x128xf32, #tpu.memory_space<vmem>>, vector<5x128xf32>
    tpu.vector_store %arg23[%c5, %c0_88], %248 {strides = array<i32>} : memref<10x128xf32, #tpu.memory_space<vmem>>, vector<5x128xf32>,
    %c0_89 = arith.constant 0 : index
    %c0_90 = arith.constant 0 : index
    %250 = vector.load %arg23[%c0_89, %c0_90] : memref<10x128xf32, #tpu.memory_space<vmem>>, vector<10x128xf32>
    %c0_91 = arith.constant 0 : index
    %c0_92 = arith.constant 0 : index
    %c0_93 = arith.constant 0 : index
    %251 = vector.load %arg13[%c0_91, %c0_92, %c0_93] : memref<1x1x128xf32, #tpu.memory_space<vmem>>, vector<1x1x128xf32>
    %252 = vector.shape_cast %251 : vector<1x1x128xf32> to vector<1x128xf32>
    %c0_94 = arith.constant 0 : index
    %c0_95 = arith.constant 0 : index
    %c0_96 = arith.constant 0 : index
    %253 = vector.load %arg14[%c0_94, %c0_95, %c0_96] : memref<1x1x128xf32, #tpu.memory_space<vmem>>, vector<1x1x128xf32>
    %254 = vector.shape_cast %253 : vector<1x1x128xf32> to vector<1x128xf32>
    %cst_97 = arith.constant dense<0.000000e+00> : vector<10xf32>
    %255 = vector.multi_reduction <add>, %250, %cst_97 [1] : vector<10x128xf32> to vector<10xf32>
    %256 = vector.shape_cast %255 : vector<10xf32> to vector<10x1xf32>
    %cst_98 = arith.constant 1.280000e+02 : f32
    %257 = vector.broadcast %cst_98 : f32 to vector<10x1xf32>
    %258 = arith.divf %256, %257 : vector<10x1xf32>
    %259 = vector.broadcast %258 : vector<10x1xf32> to vector<10x128xf32>
    %260 = arith.subf %250, %259 : vector<10x128xf32>
    %261 = arith.mulf %260, %260 : vector<10x128xf32>
    %cst_99 = arith.constant dense<0.000000e+00> : vector<10xf32>
    %262 = vector.multi_reduction <add>, %261, %cst_99 [1] : vector<10x128xf32> to vector<10xf32>
    %263 = vector.shape_cast %262 : vector<10xf32> to vector<10x1xf32>
    %cst_100 = arith.constant 1.280000e+02 : f32
    %264 = vector.broadcast %cst_100 : f32 to vector<10x1xf32>
    %265 = arith.divf %263, %264 : vector<10x1xf32>
    %266 = vector.broadcast %258 : vector<10x1xf32> to vector<10x128xf32>
    %267 = arith.subf %250, %266 : vector<10x128xf32>
    %cst_101 = arith.constant 9.99999974E-6 : f32
    %268 = vector.broadcast %cst_101 : f32 to vector<10x1xf32>
    %269 = arith.addf %265, %268 : vector<10x1xf32>
    %270 = math.rsqrt %269 : vector<10x1xf32>
    %271 = vector.broadcast %270 : vector<10x1xf32> to vector<10x128xf32>
    %272 = arith.mulf %267, %271 : vector<10x128xf32>
    %273 = vector.broadcast %252 : vector<1x128xf32> to vector<10x128xf32>
    %274 = arith.mulf %272, %273 : vector<10x128xf32>
    %275 = vector.broadcast %254 : vector<1x128xf32> to vector<10x128xf32>
    %276 = arith.addf %274, %275 : vector<10x128xf32>
    %277 = arith.truncf %276 : vector<10x128xf32> to vector<10x128xbf16>
    %c0_102 = arith.constant 0 : index
    %c0_103 = arith.constant 0 : index
    %c0_104 = arith.constant 0 : index
    %278 = vector.load %arg15[%c0_102, %c0_103, %c0_104] : memref<1x128x512xbf16, #tpu.memory_space<vmem>>, vector<1x128x512xbf16>
    %279 = vector.shape_cast %278 : vector<1x128x512xbf16> to vector<128x512xbf16>
    %cst_105 = arith.constant dense<0.000000e+00> : vector<10x512xf32>
    %280 = tpu.matmul %277, %279, %cst_105 {dimension_numbers = #tpu.dot_dimension_numbers<[1], [0], [0], [1], [0, 0, 1, 1], [], []>} : vector<10x128xbf16>, vector<128x512xbf16>, vector<10x512xf32> -> vector<10x512xf32>
    %c0_106 = arith.constant 0 : index
    %c0_107 = arith.constant 0 : index
    %c0_108 = arith.constant 0 : index
    %281 = vector.load %arg16[%c0_106, %c0_107, %c0_108] : memref<1x1x512xf32, #tpu.memory_space<vmem>>, vector<1x1x512xf32>
    %282 = vector.shape_cast %281 : vector<1x1x512xf32> to vector<1x512xf32>
    %283 = vector.broadcast %282 : vector<1x512xf32> to vector<10x512xf32>
    %284 = arith.addf %280, %283 : vector<10x512xf32>
    %cst_109 = arith.constant 1.702000e+00 : f32
    %285 = vector.broadcast %cst_109 : f32 to vector<10x512xf32>
    %286 = arith.mulf %285, %284 : vector<10x512xf32>
    %287 = arith.negf %286 : vector<10x512xf32>
    %288 = math.exp %287 : vector<10x512xf32>
    %cst_110 = arith.constant 1.000000e+00 : f32
    %289 = vector.broadcast %cst_110 : f32 to vector<10x512xf32>
    %290 = arith.addf %289, %288 : vector<10x512xf32>
    %291 = arith.divf %289, %290 : vector<10x512xf32>
    %292 = arith.mulf %284, %291 : vector<10x512xf32>
    %293 = arith.truncf %292 : vector<10x512xf32> to vector<10x512xbf16>
    %c0_111 = arith.constant 0 : index
    %c0_112 = arith.constant 0 : index
    %c0_113 = arith.constant 0 : index
    %294 = vector.load %arg17[%c0_111, %c0_112, %c0_113] : memref<1x512x128xbf16, #tpu.memory_space<vmem>>, vector<1x512x128xbf16>
    %295 = vector.shape_cast %294 : vector<1x512x128xbf16> to vector<512x128xbf16>
    %cst_114 = arith.constant dense<0.000000e+00> : vector<10x128xf32>
    %296 = tpu.matmul %293, %295, %cst_114 {dimension_numbers = #tpu.dot_dimension_numbers<[1], [0], [0], [1], [0, 0, 1, 1], [], []>} : vector<10x512xbf16>, vector<512x128xbf16>, vector<10x128xf32> -> vector<10x128xf32>
    %c0_115 = arith.constant 0 : index
    %c0_116 = arith.constant 0 : index
    %c0_117 = arith.constant 0 : index
    %297 = vector.load %arg18[%c0_115, %c0_116, %c0_117] : memref<1x1x128xf32, #tpu.memory_space<vmem>>, vector<1x1x128xf32>
    %298 = vector.shape_cast %297 : vector<1x1x128xf32> to vector<1x128xf32>
    %299 = vector.broadcast %298 : vector<1x128xf32> to vector<10x128xf32>
    %300 = arith.addf %296, %299 : vector<10x128xf32>
    %301 = arith.addf %250, %300 : vector<10x128xf32>
    %c0_118 = arith.constant 0 : index
    %c0_119 = arith.constant 0 : index
    %302 = vector.load %arg23[%c0_118, %c0_119] : memref<10x128xf32, #tpu.memory_space<vmem>>, vector<10x128xf32>
    tpu.vector_store %arg23[%c0_118, %c0_119], %301 {strides = array<i32>} : memref<10x128xf32, #tpu.memory_space<vmem>>, vector<10x128xf32>,
    %c1_i32 = arith.constant 1 : i32
    %303 = arith.cmpi eq, %arg1, %c1_i32 : i32
    %304 = arith.extui %303 : i1 to i32
    %c0_i32_120 = arith.constant 0 : i32
    %305 = arith.cmpi ne, %304, %c0_i32_120 : i32
    scf.if %305 {
      %306 = vector.extract_strided_slice %301 {offsets = [0, 0], sizes = [1, 128], strides = [1, 1]} : vector<10x128xf32> to vector<1x128xf32>
      %c0_121 = arith.constant 0 : index
      %c0_122 = arith.constant 0 : index
      %307 = vector.load %arg19[%c0_121, %c0_122] : memref<1x128xf32, #tpu.memory_space<vmem>>, vector<1x128xf32>
      %c0_123 = arith.constant 0 : index
      %c0_124 = arith.constant 0 : index
      %308 = vector.load %arg20[%c0_123, %c0_124] : memref<1x128xf32, #tpu.memory_space<vmem>>, vector<1x128xf32>
      %cst_125 = arith.constant dense<0.000000e+00> : vector<1xf32>
      %309 = vector.multi_reduction <add>, %306, %cst_125 [1] : vector<1x128xf32> to vector<1xf32>
      %310 = vector.shape_cast %309 : vector<1xf32> to vector<1x1xf32>
      %cst_126 = arith.constant 1.280000e+02 : f32
      %311 = vector.broadcast %cst_126 : f32 to vector<1x1xf32>
      %312 = arith.divf %310, %311 : vector<1x1xf32>
      %313 = vector.broadcast %312 : vector<1x1xf32> to vector<1x128xf32>
      %314 = arith.subf %306, %313 : vector<1x128xf32>
      %315 = arith.mulf %314, %314 : vector<1x128xf32>
      %cst_127 = arith.constant dense<0.000000e+00> : vector<1xf32>
      %316 = vector.multi_reduction <add>, %315, %cst_127 [1] : vector<1x128xf32> to vector<1xf32>
      %317 = vector.shape_cast %316 : vector<1xf32> to vector<1x1xf32>
      %cst_128 = arith.constant 1.280000e+02 : f32
      %318 = vector.broadcast %cst_128 : f32 to vector<1x1xf32>
      %319 = arith.divf %317, %318 : vector<1x1xf32>
      %320 = vector.broadcast %312 : vector<1x1xf32> to vector<1x128xf32>
      %321 = arith.subf %306, %320 : vector<1x128xf32>
      %cst_129 = arith.constant 9.99999974E-6 : f32
      %322 = vector.broadcast %cst_129 : f32 to vector<1x1xf32>
      %323 = arith.addf %319, %322 : vector<1x1xf32>
      %324 = math.rsqrt %323 : vector<1x1xf32>
      %325 = vector.broadcast %324 : vector<1x1xf32> to vector<1x128xf32>
      %326 = arith.mulf %321, %325 : vector<1x128xf32>
      %327 = arith.mulf %326, %307 : vector<1x128xf32>
      %328 = arith.addf %327, %308 : vector<1x128xf32>
      %329 = arith.truncf %328 : vector<1x128xf32> to vector<1x128xbf16>
      %c0_130 = arith.constant 0 : index
      %c0_131 = arith.constant 0 : index
      %330 = vector.load %arg21[%c0_130, %c0_131] : memref<128x128xbf16, #tpu.memory_space<vmem>>, vector<128x128xbf16>
      %cst_132 = arith.constant dense<0.000000e+00> : vector<1x128xf32>
      %331 = tpu.matmul %329, %330, %cst_132 {dimension_numbers = #tpu.dot_dimension_numbers<[1], [0], [0], [1], [0, 0, 1, 1], [], []>} : vector<1x128xbf16>, vector<128x128xbf16>, vector<1x128xf32> -> vector<1x128xf32>
      %332 = arith.mulf %331, %331 : vector<1x128xf32>
      %cst_133 = arith.constant dense<0.000000e+00> : vector<1xf32>
      %333 = vector.multi_reduction <add>, %332, %cst_133 [1] : vector<1x128xf32> to vector<1xf32>
      %334 = vector.shape_cast %333 : vector<1xf32> to vector<1x1xf32>
      %335 = math.sqrt %334 : vector<1x1xf32>
      %cst_134 = arith.constant 9.99999996E-13 : f32
      %336 = vector.broadcast %cst_134 : f32 to vector<1x1xf32>
      %337 = arith.maximumf %335, %336 : vector<1x1xf32>
      %338 = vector.broadcast %337 : vector<1x1xf32> to vector<1x128xf32>
      %339 = arith.divf %331, %338 : vector<1x128xf32>
      %c0_135 = arith.constant 0 : index
      %c0_136 = arith.constant 0 : index
      %c0_137 = arith.constant 0 : index
      %340 = vector.load %arg22[%c0_135, %c0_136, %c0_137] : memref<1x2x128xf32, #tpu.memory_space<vmem>>, vector<1x1x128xf32>
      %341 = vector.shape_cast %340 : vector<1x1x128xf32> to vector<1x128xf32>
      %342 = vector.shape_cast %339 : vector<1x128xf32> to vector<1x1x128xf32>
      tpu.vector_store %arg22[%c0_135, %c0_136, %c0_137], %342 {strides = array<i32>} : memref<1x2x128xf32, #tpu.memory_space<vmem>>, vector<1x1x128xf32>,
      %343 = vector.extract_strided_slice %301 {offsets = [5, 0], sizes = [1, 128], strides = [1, 1]} : vector<10x128xf32> to vector<1x128xf32>
      %c0_138 = arith.constant 0 : index
      %c0_139 = arith.constant 0 : index
      %344 = vector.load %arg19[%c0_138, %c0_139] : memref<1x128xf32, #tpu.memory_space<vmem>>, vector<1x128xf32>
      %c0_140 = arith.constant 0 : index
      %c0_141 = arith.constant 0 : index
      %345 = vector.load %arg20[%c0_140, %c0_141] : memref<1x128xf32, #tpu.memory_space<vmem>>, vector<1x128xf32>
      %cst_142 = arith.constant dense<0.000000e+00> : vector<1xf32>
      %346 = vector.multi_reduction <add>, %343, %cst_142 [1] : vector<1x128xf32> to vector<1xf32>
      %347 = vector.shape_cast %346 : vector<1xf32> to vector<1x1xf32>
      %cst_143 = arith.constant 1.280000e+02 : f32
      %348 = vector.broadcast %cst_143 : f32 to vector<1x1xf32>
      %349 = arith.divf %347, %348 : vector<1x1xf32>
      %350 = vector.broadcast %349 : vector<1x1xf32> to vector<1x128xf32>
      %351 = arith.subf %343, %350 : vector<1x128xf32>
      %352 = arith.mulf %351, %351 : vector<1x128xf32>
      %cst_144 = arith.constant dense<0.000000e+00> : vector<1xf32>
      %353 = vector.multi_reduction <add>, %352, %cst_144 [1] : vector<1x128xf32> to vector<1xf32>
      %354 = vector.shape_cast %353 : vector<1xf32> to vector<1x1xf32>
      %cst_145 = arith.constant 1.280000e+02 : f32
      %355 = vector.broadcast %cst_145 : f32 to vector<1x1xf32>
      %356 = arith.divf %354, %355 : vector<1x1xf32>
      %357 = vector.broadcast %349 : vector<1x1xf32> to vector<1x128xf32>
      %358 = arith.subf %343, %357 : vector<1x128xf32>
      %cst_146 = arith.constant 9.99999974E-6 : f32
      %359 = vector.broadcast %cst_146 : f32 to vector<1x1xf32>
      %360 = arith.addf %356, %359 : vector<1x1xf32>
      %361 = math.rsqrt %360 : vector<1x1xf32>
      %362 = vector.broadcast %361 : vector<1x1xf32> to vector<1x128xf32>
      %363 = arith.mulf %358, %362 : vector<1x128xf32>
      %364 = arith.mulf %363, %344 : vector<1x128xf32>
      %365 = arith.addf %364, %345 : vector<1x128xf32>
      %366 = arith.truncf %365 : vector<1x128xf32> to vector<1x128xbf16>
      %c0_147 = arith.constant 0 : index
      %c0_148 = arith.constant 0 : index
      %367 = vector.load %arg21[%c0_147, %c0_148] : memref<128x128xbf16, #tpu.memory_space<vmem>>, vector<128x128xbf16>
      %cst_149 = arith.constant dense<0.000000e+00> : vector<1x128xf32>
      %368 = tpu.matmul %366, %367, %cst_149 {dimension_numbers = #tpu.dot_dimension_numbers<[1], [0], [0], [1], [0, 0, 1, 1], [], []>} : vector<1x128xbf16>, vector<128x128xbf16>, vector<1x128xf32> -> vector<1x128xf32>
      %369 = arith.mulf %368, %368 : vector<1x128xf32>
      %cst_150 = arith.constant dense<0.000000e+00> : vector<1xf32>
      %370 = vector.multi_reduction <add>, %369, %cst_150 [1] : vector<1x128xf32> to vector<1xf32>
      %371 = vector.shape_cast %370 : vector<1xf32> to vector<1x1xf32>
      %372 = math.sqrt %371 : vector<1x1xf32>
      %cst_151 = arith.constant 9.99999996E-13 : f32
      %373 = vector.broadcast %cst_151 : f32 to vector<1x1xf32>
      %374 = arith.maximumf %372, %373 : vector<1x1xf32>
      %375 = vector.broadcast %374 : vector<1x1xf32> to vector<1x128xf32>
      %376 = arith.divf %368, %375 : vector<1x128xf32>
      %c0_152 = arith.constant 0 : index
      %c1 = arith.constant 1 : index
      %c0_153 = arith.constant 0 : index
      %377 = vector.load %arg22[%c0_152, %c1, %c0_153] : memref<1x2x128xf32, #tpu.memory_space<vmem>>, vector<1x1x128xf32>
      %378 = vector.shape_cast %377 : vector<1x1x128xf32> to vector<1x128xf32>
      %379 = vector.shape_cast %376 : vector<1x128xf32> to vector<1x1x128xf32>
      tpu.vector_store %arg22[%c0_152, %c1, %c0_153], %379 {strides = array<i32>} : memref<1x2x128xf32, #tpu.memory_space<vmem>>, vector<1x1x128xf32>,
    } else {
    }
    return
  }
  func.func @transform_0(%arg0: i32, %arg1: i32) -> (i32, i32, i32) {
    %c0_i32 = arith.constant 0 : i32
    %c0_i32_0 = arith.constant 0 : i32
    %c0_i32_1 = arith.constant 0 : i32
    return %arg0, %c0_i32, %c0_i32_0 : i32, i32, i32
  }
  func.func @transform_1(%arg0: i32, %arg1: i32) -> (i32, i32) {
    %c0_i32 = arith.constant 0 : i32
    %c0_i32_0 = arith.constant 0 : i32
    %c0_i32_1 = arith.constant 0 : i32
    return %c0_i32, %c0_i32_0 : i32, i32
  }
  func.func @transform_2(%arg0: i32, %arg1: i32) -> (i32, i32) {
    %c0_i32 = arith.constant 0 : i32
    %c0_i32_0 = arith.constant 0 : i32
    %c0_i32_1 = arith.constant 0 : i32
    return %c0_i32, %c0_i32_0 : i32, i32
  }
  func.func @transform_3(%arg0: i32, %arg1: i32) -> (i32, i32) {
    %c0_i32 = arith.constant 0 : i32
    %c0_i32_0 = arith.constant 0 : i32
    %c0_i32_1 = arith.constant 0 : i32
    return %c0_i32, %c0_i32_0 : i32, i32
  }
  func.func @transform_4(%arg0: i32, %arg1: i32) -> (i32, i32) {
    %c0_i32 = arith.constant 0 : i32
    %c0_i32_0 = arith.constant 0 : i32
    %c0_i32_1 = arith.constant 0 : i32
    return %c0_i32, %c0_i32_0 : i32, i32
  }
  func.func @transform_5(%arg0: i32, %arg1: i32) -> (i32, i32, i32) {
    %c0_i32 = arith.constant 0 : i32
    %c0_i32_0 = arith.constant 0 : i32
    %c0_i32_1 = arith.constant 0 : i32
    return %arg1, %c0_i32, %c0_i32_0 : i32, i32, i32
  }
  func.func @transform_6(%arg0: i32, %arg1: i32) -> (i32, i32, i32) {
    %c0_i32 = arith.constant 0 : i32
    %c0_i32_0 = arith.constant 0 : i32
    %c0_i32_1 = arith.constant 0 : i32
    return %arg1, %c0_i32, %c0_i32_0 : i32, i32, i32
  }
  func.func @transform_7(%arg0: i32, %arg1: i32) -> (i32, i32, i32) {
    %c0_i32 = arith.constant 0 : i32
    %c0_i32_0 = arith.constant 0 : i32
    %c0_i32_1 = arith.constant 0 : i32
    return %arg1, %c0_i32, %c0_i32_0 : i32, i32, i32
  }
  func.func @transform_8(%arg0: i32, %arg1: i32) -> (i32, i32, i32) {
    %c0_i32 = arith.constant 0 : i32
    %c0_i32_0 = arith.constant 0 : i32
    %c0_i32_1 = arith.constant 0 : i32
    return %arg1, %c0_i32, %c0_i32_0 : i32, i32, i32
  }
  func.func @transform_9(%arg0: i32, %arg1: i32) -> (i32, i32, i32) {
    %c0_i32 = arith.constant 0 : i32
    %c0_i32_0 = arith.constant 0 : i32
    %c0_i32_1 = arith.constant 0 : i32
    return %arg1, %c0_i32, %c0_i32_0 : i32, i32, i32
  }
  func.func @transform_10(%arg0: i32, %arg1: i32) -> (i32, i32, i32) {
    %c0_i32 = arith.constant 0 : i32
    %c0_i32_0 = arith.constant 0 : i32
    %c0_i32_1 = arith.constant 0 : i32
    return %arg1, %c0_i32, %c0_i32_0 : i32, i32, i32
  }
  func.func @transform_11(%arg0: i32, %arg1: i32) -> (i32, i32, i32) {
    %c0_i32 = arith.constant 0 : i32
    %c0_i32_0 = arith.constant 0 : i32
    %c0_i32_1 = arith.constant 0 : i32
    return %arg1, %c0_i32, %c0_i32_0 : i32, i32, i32
  }
  func.func @transform_12(%arg0: i32, %arg1: i32) -> (i32, i32, i32) {
    %c0_i32 = arith.constant 0 : i32
    %c0_i32_0 = arith.constant 0 : i32
    %c0_i32_1 = arith.constant 0 : i32
    return %arg1, %c0_i32, %c0_i32_0 : i32, i32, i32
  }
  func.func @transform_13(%arg0: i32, %arg1: i32) -> (i32, i32, i32) {
    %c0_i32 = arith.constant 0 : i32
    %c0_i32_0 = arith.constant 0 : i32
    %c0_i32_1 = arith.constant 0 : i32
    return %arg1, %c0_i32, %c0_i32_0 : i32, i32, i32
  }
  func.func @transform_14(%arg0: i32, %arg1: i32) -> (i32, i32, i32) {
    %c0_i32 = arith.constant 0 : i32
    %c0_i32_0 = arith.constant 0 : i32
    %c0_i32_1 = arith.constant 0 : i32
    return %arg1, %c0_i32, %c0_i32_0 : i32, i32, i32
  }
  func.func @transform_15(%arg0: i32, %arg1: i32) -> (i32, i32, i32) {
    %c0_i32 = arith.constant 0 : i32
    %c0_i32_0 = arith.constant 0 : i32
    %c0_i32_1 = arith.constant 0 : i32
    return %arg1, %c0_i32, %c0_i32_0 : i32, i32, i32
  }
  func.func @transform_16(%arg0: i32, %arg1: i32) -> (i32, i32, i32) {
    %c0_i32 = arith.constant 0 : i32
    %c0_i32_0 = arith.constant 0 : i32
    %c0_i32_1 = arith.constant 0 : i32
    return %arg1, %c0_i32, %c0_i32_0 : i32, i32, i32
  }
  func.func @transform_17(%arg0: i32, %arg1: i32) -> (i32, i32) {
    %c0_i32 = arith.constant 0 : i32
    %c0_i32_0 = arith.constant 0 : i32
    %c0_i32_1 = arith.constant 0 : i32
    return %c0_i32, %c0_i32_0 : i32, i32
  }
  func.func @transform_18(%arg0: i32, %arg1: i32) -> (i32, i32) {
    %c0_i32 = arith.constant 0 : i32
    %c0_i32_0 = arith.constant 0 : i32
    %c0_i32_1 = arith.constant 0 : i32
    return %c0_i32, %c0_i32_0 : i32, i32
  }
  func.func @transform_19(%arg0: i32, %arg1: i32) -> (i32, i32) {
    %c0_i32 = arith.constant 0 : i32
    %c0_i32_0 = arith.constant 0 : i32
    %c0_i32_1 = arith.constant 0 : i32
    return %c0_i32, %c0_i32_0 : i32, i32
  }
  func.func @transform_20(%arg0: i32, %arg1: i32) -> (i32, i32, i32) {
    %c0_i32 = arith.constant 0 : i32
    %c0_i32_0 = arith.constant 0 : i32
    %c0_i32_1 = arith.constant 0 : i32
    return %arg0, %c0_i32, %c0_i32_0 : i32, i32, i32
  }
}

</mosaic_0001>

<bundles_post_ra>
// kernel: tpu_custom_call.1
= control target key start
LH: loop header
LB: loop body
LE: loop exit
PB: predicated region body
PF: predicated region fallthrough
CT: control target
= control target key end

     0   :  { %s7817_s0 = inlined_call_operand.hbm [shape: bf16[1,10,768], index: 0, kind: input, shape index: {}]   ;;  %s7818_s1 = inlined_call_operand.hbm [shape: bf16[768,128], index: 1, kind: input, shape index: {}]   ;;  %s7819_s2 = inlined_call_operand.hbm [shape: f32[10,128], index: 2, kind: input, shape index: {}]   ;;  %s7820_s3 = inlined_call_operand.vmem [shape: f32[1,128], index: 3, kind: input, shape index: {}]   ;;  %s7821_s4 = inlined_call_operand.hbm [shape: f32[1,128], index: 4, kind: input, shape index: {}]   ;;  %s7822_s5 = inlined_call_operand.hbm [shape: f32[2,1,128], index: 5, kind: input, shape index: {}]   ;;  %s7823_s6 = inlined_call_operand.hbm [shape: f32[2,1,128], index: 6, kind: input, shape index: {}]   ;;  %s7824_s7 = inlined_call_operand.hbm [shape: bf16[2,128,384], index: 7, kind: input, shape index: {}]   ;;  %s7825_s8 = inlined_call_operand.vmem [shape: f32[2,1,384], index: 8, kind: input, shape index: {}]   ;;  %s7826_s9 = inlined_call_operand.hbm [shape: bf16[2,128,128], index: 9, kind: input, shape index: {}]   ;;  %s7827_s10 = inlined_call_operand.hbm [shape: f32[2,1,128], index: 10, kind: input, shape index: {}]   ;;  %s7828_s11 = inlined_call_operand.hbm [shape: f32[2,1,128], index: 11, kind: input, shape index: {}]   ;;  %s7829_s12 = inlined_call_operand.hbm [shape: f32[2,1,128], index: 12, kind: input, shape index: {}]   ;;  %s7830_s13 = inlined_call_operand.hbm [shape: bf16[2,128,512], index: 13, kind: input, shape index: {}]   ;;  %s7831_s14 = inlined_call_operand.hbm [shape: f32[2,1,512], index: 14, kind: input, shape index: {}]   ;;  %s7832_s15 = inlined_call_operand.hbm [shape: bf16[2,512,128], index: 15, kind: input, shape index: {}]   ;;  %s7833_s16 = inlined_call_operand.hbm [shape: f32[2,1,128], index: 16, kind: input, shape index: {}]   ;;  %s7834_s17 = inlined_call_operand.hbm [shape: f32[1,128], index: 17, kind: input, shape index: {}]   ;;  %s7835_s18 = inlined_call_operand.hbm [shape: f32[1,128], index: 18, kind: input, shape index: {}]   ;;  %s7836_s19 = inlined_call_operand.vmem [shape: bf16[128,128], index: 19, kind: input, shape index: {}]   ;;  %s7837_s20 = inlined_call_operand.hbm [shape: f32[1,2,128], index: 20, kind: output, shape index: {}]  }
   0x1   :  { %7883 = sst [smem:[#allocation42_spill]] %s7817_s0 }
   0x2   :  { %7884 = sst [smem:[#allocation43_spill]] %s7818_s1 }
   0x3   :  { %7885 = sst [smem:[#allocation44_spill]] %s7819_s2 }
   0x4   :  { %7886 = sst [smem:[#allocation45_spill]] %s7820_s3 }
   0x5   :  { %7887 = sst [smem:[#allocation46_spill]] %s7821_s4 }
   0x6   :  { %7888 = sst [smem:[#allocation47_spill]] %s7822_s5 }
   0x7   :  { %7889 = sst [smem:[#allocation48_spill]] %s7823_s6 }
   0x8   :  { %7890 = sst [smem:[#allocation49_spill]] %s7824_s7 }
   0x9   :  { %7891 = sst [smem:[#allocation50_spill]] %s7825_s8 }
   0xa   :  { %7892 = sst [smem:[#allocation51_spill]] %s7826_s9 }
   0xb   :  { %7893 = sst [smem:[#allocation52_spill]] %s7827_s10 }
   0xc   :  { %7894 = sst [smem:[#allocation53_spill]] %s7828_s11 }
   0xd   :  { %7895 = sst [smem:[#allocation54_spill]] %s7829_s12 }
   0xe   :  { %7896 = sst [smem:[#allocation55_spill]] %s7830_s13 }
   0xf   :  { %7897 = sst [smem:[#allocation56_spill]] %s7831_s14 }
  0x10   :  { %7898 = sst [smem:[#allocation57_spill]] %s7833_s16 }
  0x11   :  { %7899 = sst [smem:[#allocation58_spill]] %s7834_s17 }
  0x12   :  { %7900 = sst [smem:[#allocation59_spill]] %s7835_s18 }
  0x13   :  { %7901 = sst [smem:[#allocation60_spill]] %s7836_s19 }
  0x14   :  { %7902 = sst [smem:[#allocation61_spill]] %s7837_s20 }
  0x15   :  { %25 = vsyncpa [#allocation4], 0 }
  0x16   :  { %26 = vsyncpa [#allocation7], 0 }
  0x17   :  { %27 = vsyncpa [#allocation10], 0 }
  0x18   :  { %28 = vsyncpa [#allocation5], 0  ;;  %s6712_s1 = smov 0   ;;  %s6714_s22 = smov 0  }
  0x19   :  { %s6716_s23 = smov 0   ;;  %s6718_s24 = smov 0  }
  0x1a   :  { %s6720_s2 = smov 0   ;;  %s6722_s25 = smov 0  }
  0x1b LB: > { %7903 = sst [smem:[#allocation32_spill]] %s6552_s22  ;;  %s6741_s3 = sadd.s32 4294967295, %s6568_s25   ;;  %s6568_s25 = sphi %s6722_s25, %s34_s25   ;;  %s6564_s2 = sphi %s6720_s2, %s7987_s2   ;;  %s6560_s24 = sphi %s6718_s24, %s7986_s24   ;;  %s6556_s23 = sphi %s6716_s23, %s7984_s23   ;;  %s6552_s22 = sphi %s6714_s22, %s7983_s22   ;;  %s6548_s1 = sphi %s6712_s1, %s7982_s1  }
  0x1c   : > { %7904 = sst [smem:[#allocation33_spill]] %s6556_s23  ;;  %p170_p0 = scmp.ne.s32.totalorder %s6556_s23, %s6552_s22 }
  0x1d   : > { %7905 = sst [smem:[#allocation34_spill]] %s6560_s24  ;;  %p171_p1 = scmp.eq.s32.totalorder %s6568_s25, 0 }
  0x1e   : > { %7906 = sst [smem:[#allocation35_spill]] %s6568_s25  ;;  %p176_p2 = scmp.ne.s32.totalorder %s6552_s22, %s6548_s1 }
  0x1f   : > { %7907 = sst [smem:[#allocation36_spill]] %s6741_s3  ;;  %p7848_p3 = scmp.eq.s32.totalorder %s6741_s3, 0 }
  0x20   : > { %p172_p4 = por %p171_p1, %p170_p0  ;;  %p4792_p5 = scmp.ge.s32.totalorder %s6568_s25, 1 }
  0x21   : > { %p6752_p6 = por %p7848_p3, %p176_p2  ;;  %p562_p7 = scmp.lt.s32.totalorder %s6568_s25, 3 }
  0x22   : > { %s6570_s4 = smov [#allocation3]   ;;  %p5596_p10 = scmp.lt.s32.totalorder %s6568_s25, 2 }
  0x23   : > { %s7908_s27 = scalar_select %p6752_p6, 1, 0 }
  0x24   : > { %p6757_p8 = pnand %p4792_p5, %p562_p7  ;;  %s577_s29 = sshll.u32 %s6570_s4, 4  ;;  %s578_s29 = int_to_ptr.vmem [resolvable:$true] %s577_s29 }
  0x25   : > { %7909 = sst [smem:[#allocation37_spill]] %s7908_s27  ;;  %p6770_p12 = pnand %p5596_p10, %p172_p4 }
  0x26   : > { %s7910_s28 = scalar_select %p6757_p8, 1, 0 }
  0x27   : > { %p5537_p9 = pneg %p6757_p8  ;;  %s43_s21 = sadd.s32 1, %s6564_s2 }
  0x28   : > { %7911 = sst [smem:[#allocation38_spill]] %s7910_s28  ;;  %s7914_s20 = sld [smem:[#allocation42_spill]] }
  0x29   : > { %p6766_p11 = pnand %p5537_p9, %p7848_p3 }
  0x2a   : > { %s7913_s0 = scalar_select %p6770_p12, 1, 0 }
  0x2b   : > { %s7912_s30 = scalar_select %p6766_p11, 1, 0 }
  0x2c   : > { %p6783_p0 = pneg %p6766_p11 }
  0x2e   : > { %s5970_s19 = scalar_lea.hbm %s7914_s20, 768 }
  0x2f   : > { %p5971_p13 = scmp.ne.s32.totalorder %s7914_s20, %s5970_s19  ;;  %p5977_p4 = scmp.lt.u32.totalorder %s5970_s19, %s7914_s20 }
  0x30   : > { %s7915_s24 = scalar_select %p6783_p0, 1, 0 }
  0x31   : > { %p5973_p1 = pnand %p6783_p0, %p5971_p13 }
  0x33   : > { %p5974_p2 = pneg %p5973_p1 }
  0x35   : > { %p5979_p5 = pnand %p5977_p4, %p5974_p2 }
  0x37   : > { %5982 = shalt.err (!%p5979_p5)
}
  0x38   : > { %s5983_s26 = scalar_lea.vmem %s578_s29, 768  ;;  %p5991_p3 = scmp.lt.s32.totalorder %s578_s29, %s578_s29 }
  0x39   : > { %p5984_p7 = scmp.ne.s32.totalorder %s578_s29, %s5983_s26  ;;  %p5992_p6 = scmp.lt.s32.totalorder %s5983_s26, %s5983_s26 }
  0x3b   : > { %p5986_p9 = pnand %p5984_p7, %p6783_p0  ;;  %p5993_p8 = por %p5992_p6, %p5991_p3 }
  0x3d   : > { %p5987_p10 = pneg %p5986_p9 }
  0x3f   : > { %p5994_p12 = pnand %p5993_p8, %p5987_p10 }
  0x41   : > { %5997 = shalt.err (!%p5994_p12)
}
  0x42   : > { %s6571_s8 = smov 384   ;;  %s6572_s19 = smov 24  }
  0x43   : > { %5540 = dma.hbm_to_vmem [thread:$0]  (!%p6766_p11), %s7914_s20, 768, %s578_s29, [#allocation4], %s6571_s8, %s6571_s8, %s6572_s19  }
  0x44   : > { %p44_p13 = scmp.ge.s32.totalorder %s43_s21, 2  ;;  %s656_s1 = sand.u32 1, %s6568_s25  }
  0x45   : > { %s6801_s4 = sand.u32 1, %s6556_s23   ;;  %s6808_s3 = sshll.u32 %s6564_s2, 4 }
  0x46   : > { %s7989_s21 = smov (%p44_p13, %s43_s21), 0  ;;  %7917 = sst [smem:[#allocation40_spill]] %s6808_s3 }
  0x47   : > { %7916 = sst [smem:[#allocation39_spill]] %s7989_s21  ;;  %s160_s26 = ssub.s32 %s6564_s2, %s7989_s21 }
  0x48   : > { %p161_p3 = scmp.eq.s32.totalorder %s160_s26, 0  ;;  %s7918_s5 = sld [smem:[#allocation47_spill]] }
  0x49   : > { %s659_s29 = scalar_lea.vmem [#allocation11], %s6801_s4  ;;  %s7919_s19 = sadd.s32 1, %s6556_s23 }
  0x4a   : > { %s666_s8 = sshll.u32 %s659_s29, 4  ;;  %s7921_s6 = sld [smem:[#allocation48_spill]]  ;;  %s6822_s8 = int_to_ptr.vmem [resolvable:$true] %s666_s8 }
  0x4b   : > { %s6820_s27 = scalar_select %p161_p3, %s6556_s23, %s7919_s19  }
  0x4c   : > { %s6830_s25 = scalar_lea.sflag [#allocation4], %s656_s1  ;;  %p7922_p8 = scmp.ne.s32.totalorder %s7913_s0, 0 }
  0x4d   : > { %7920 = sst [smem:[#allocation41_spill]] %s6820_s27 }
  0x4e   : > { %s6814_s22 = scalar_lea.hbm %s7918_s5, %s6808_s3  ;;  %p6836_p12 = pneg %p7922_p8 }
  0x4f   : > { %s5998_s16 = scalar_lea.hbm %s6814_s22, 16  ;;  %s6003_s27 = scalar_lea.hbm %s7918_s5, 32 }
  0x50   : > { %s6828_s26 = scalar_lea.hbm %s7921_s6, %s6808_s3  ;;  %p5999_p6 = scmp.ne.s32.totalorder %s6814_s22, %s5998_s16 }
  0x51   : > { %s7923_s28 = scalar_select %p6836_p12, 1, 0 }
  0x52   : > { %p6001_p1 = pnand %p6836_p12, %p5999_p6  ;;  %p6004_p4 = scmp.lt.u32.totalorder %s6814_s22, %s7918_s5 }
  0x53   : > { %p6005_p5 = scmp.lt.u32.totalorder %s6003_s27, %s5998_s16  ;;  %p6007_p9 = scmp.lt.u32.totalorder %s5998_s16, %s6814_s22 }
  0x54   : > { %p6002_p2 = pneg %p6001_p1 }
  0x55   : > { %p6006_p7 = por %p6005_p5, %p6004_p4 }
  0x57   : > { %p6008_p10 = por %p6007_p9, %p6006_p7 }
  0x59   : > { %p6009_p13 = pnand %p6008_p10, %p6002_p2 }
  0x5b   : > { %6012 = shalt.err (!%p6009_p13)
}
  0x5c   : > { %s6013_s1 = scalar_lea.vmem %s6822_s8, 16  ;;  %s6573_s29 = smov [#allocation11]  }
  0x5d   : > { %p6014_p3 = scmp.ne.s32.totalorder %s6822_s8, %s6013_s1  ;;  %s6018_s19 = sshll.u32 %s6573_s29, 4  ;;  %s6019_s19 = int_to_ptr.vmem [resolvable:$false] %s6018_s19 }
  0x5e   : > { %s6020_s20 = scalar_lea.vmem %s6019_s19, 32  ;;  %p6021_p11 = scmp.lt.s32.totalorder %s6822_s8, %s6019_s19 }
  0x5f   : > { %p6016_p6 = pnand %p6014_p3, %p6836_p12  ;;  %p6022_p0 = scmp.lt.s32.totalorder %s6020_s20, %s6013_s1 }
  0x61   : > { %p6017_p1 = pneg %p6016_p6  ;;  %p6023_p4 = por %p6022_p0, %p6021_p11 }
  0x63   : > { %p6024_p5 = pnand %p6023_p4, %p6017_p1 }
  0x65   : > { %6027 = shalt.err (!%p6024_p5)
}
  0x66   : > { %5559 = dma.hbm_to_vmem [thread:$0]  (!%p7922_p8), %s6814_s22, 16, %s6822_s8, %s6830_s25  }
  0x67   : > { %s676_s27 = scalar_lea.vmem [#allocation12], %s6801_s4  ;;  %s5483_s21 = smul.u32 192, %s6801_s4 }
  0x68   : > { %s683_s16 = sshll.u32 %s676_s27, 4  ;;  %s5484_s1 = smul.u32 3072, %s6564_s2  ;;  %s684_s16 = int_to_ptr.vmem [resolvable:$true] %s683_s16 }
  0x69   : > { %s6028_s29 = scalar_lea.hbm %s6828_s26, 16  ;;  %s6033_s5 = scalar_lea.hbm %s7921_s6, 32 }
  0x6a   : > { %p6029_p11 = scmp.ne.s32.totalorder %s6828_s26, %s6028_s29  ;;  %p6034_p7 = scmp.lt.u32.totalorder %s6828_s26, %s7921_s6 }
  0x6b   : > { %p6035_p9 = scmp.lt.u32.totalorder %s6033_s5, %s6028_s29  ;;  %p6037_p13 = scmp.lt.u32.totalorder %s6028_s29, %s6828_s26 }
  0x6c   : > { %p6031_p0 = pnand %p6029_p11, %p6836_p12 }
  0x6d   : > { %p6036_p10 = por %p6035_p9, %p6034_p7 }
  0x6e   : > { %p6032_p2 = pneg %p6031_p0 }
  0x6f   : > { %p6038_p3 = por %p6037_p13, %p6036_p10 }
  0x71   : > { %p6039_p6 = pnand %p6038_p3, %p6032_p2 }
  0x73   : > { %6042 = shalt.err (!%p6039_p6)
}
  0x74   : > { %s6043_s22 = scalar_lea.vmem %s684_s16, 16  ;;  %s6574_s8 = smov [#allocation12]  }
  0x75   : > { %p6044_p1 = scmp.ne.s32.totalorder %s684_s16, %s6043_s22  ;;  %s6048_s27 = sshll.u32 %s6574_s8, 4  ;;  %s6049_s27 = int_to_ptr.vmem [resolvable:$false] %s6048_s27 }
  0x76   : > { %s6050_s19 = scalar_lea.vmem %s6049_s27, 32  ;;  %p6051_p11 = scmp.lt.s32.totalorder %s684_s16, %s6049_s27 }
  0x77   : > { %p6046_p4 = pnand %p6044_p1, %p6836_p12  ;;  %p6052_p0 = scmp.lt.s32.totalorder %s6050_s19, %s6043_s22 }
  0x79   : > { %p6047_p5 = pneg %p6046_p4  ;;  %p6053_p8 = por %p6052_p0, %p6051_p11 }
  0x7b   : > { %p6054_p7 = pnand %p6053_p8, %p6047_p5 }
  0x7d   : > { %6057 = shalt.err (!%p6054_p7)
}
  0x7e   : > { %p7924_p9 = scmp.ne.s32.totalorder %s7913_s0, 0  ;;  %s7925_s7 = sld [smem:[#allocation49_spill]] }
  0x7f   : > { %s694_s29 = scalar_lea.vmem [#allocation13], %s5483_s21 }
  0x80   : > { %5562 = dma.hbm_to_vmem [thread:$0]  (!%p7924_p9), %s6828_s26, 16, %s684_s16, %s6830_s25  }
  0x81   : > { %s701_s20 = sshll.u32 %s694_s29, 4  ;;  %s6888_s20 = int_to_ptr.vmem [resolvable:$true] %s701_s20 }
  0x84   : > { %s6884_s23 = scalar_lea.hbm %s7925_s7, %s5484_s1  ;;  %s6063_s8 = scalar_lea.hbm %s7925_s7, 6144 }
  0x85   : > { %s6058_s22 = scalar_lea.hbm %s6884_s23, 3072  ;;  %p6064_p13 = scmp.lt.u32.totalorder %s6884_s23, %s7925_s7 }
  0x86   : > { %p6059_p8 = scmp.ne.s32.totalorder %s6884_s23, %s6058_s22  ;;  %p6065_p3 = scmp.lt.u32.totalorder %s6063_s8, %s6058_s22 }
  0x87   : > { %p6067_p1 = scmp.lt.u32.totalorder %s6058_s22, %s6884_s23 }
  0x88   : > { %p6061_p2 = pnand %p6059_p8, %p6836_p12  ;;  %p6066_p6 = por %p6065_p3, %p6064_p13 }
  0x8a   : > { %p6062_p10 = pneg %p6061_p2  ;;  %p6068_p4 = por %p6067_p1, %p6066_p6 }
  0x8c   : > { %p6069_p5 = pnand %p6068_p4, %p6062_p10 }
  0x8e   : > { %6072 = shalt.err (!%p6069_p5)
}
  0x8f   : > { %s6073_s21 = scalar_lea.vmem %s6888_s20, 3072  ;;  %s6575_s19 = smov [#allocation13]  }
  0x90   : > { %p6074_p11 = scmp.ne.s32.totalorder %s6888_s20, %s6073_s21  ;;  %s6078_s5 = sshll.u32 %s6575_s19, 4  ;;  %s6079_s5 = int_to_ptr.vmem [resolvable:$false] %s6078_s5 }
  0x91   : > { %s6080_s18 = scalar_lea.vmem %s6079_s5, 6144  ;;  %p6081_p8 = scmp.lt.s32.totalorder %s6888_s20, %s6079_s5 }
  0x92   : > { %p6076_p0 = pnand %p6074_p11, %p6836_p12  ;;  %p6082_p2 = scmp.lt.s32.totalorder %s6080_s18, %s6073_s21 }
  0x94   : > { %p6077_p7 = pneg %p6076_p0  ;;  %p6083_p13 = por %p6082_p2, %p6081_p8 }
  0x96   : > { %p6084_p3 = pnand %p6083_p13, %p6077_p7 }
  0x98   : > { %6087 = shalt.err (!%p6084_p3)
}
  0x99   : > { %s6576_s29 = smov 192   ;;  %s6577_s22 = smov 12  }
  0x9a   : > { %5565 = dma.hbm_to_vmem [thread:$0]  (!%p7924_p9), %s6884_s23, 3072, %s6888_s20, %s6830_s25, %s6576_s29, %s6576_s29, %s6577_s22  }
  0x9b   : > { %s4803_s26 = sshll.u32 %s6801_s4, 6  ;;  %s5053_s16 = sshll.u32 %s6564_s2, 10 }
  0x9c   : > { %s7926_s9 = sld [smem:[#allocation51_spill]]  ;;  %s722_s21 = scalar_lea.vmem [#allocation14], %s4803_s26 }
  0x9d   : > { %s729_s19 = sshll.u32 %s722_s21, 4  ;;  %s7927_s10 = sld [smem:[#allocation52_spill]]  ;;  %s6919_s19 = int_to_ptr.vmem [resolvable:$true] %s729_s19 }
  0xa2   : > { %s6917_s27 = scalar_lea.hbm %s7926_s9, %s5053_s16  ;;  %s6093_s22 = scalar_lea.hbm %s7926_s9, 2048 }
  0xa3   : > { %s6925_s6 = scalar_lea.hbm %s7927_s10, %s6808_s3  ;;  %s6088_s23 = scalar_lea.hbm %s6917_s27, 1024 }
  0xa4   : > { %p6089_p10 = scmp.ne.s32.totalorder %s6917_s27, %s6088_s23  ;;  %p6094_p4 = scmp.lt.u32.totalorder %s6917_s27, %s7926_s9 }
  0xa5   : > { %p6095_p5 = scmp.lt.u32.totalorder %s6093_s22, %s6088_s23  ;;  %p6097_p0 = scmp.lt.u32.totalorder %s6088_s23, %s6917_s27 }
  0xa6   : > { %p6091_p6 = pnand %p6089_p10, %p6836_p12 }
  0xa7   : > { %p6096_p11 = por %p6095_p5, %p6094_p4 }
  0xa8   : > { %p6092_p1 = pneg %p6091_p6 }
  0xa9   : > { %p6098_p7 = por %p6097_p0, %p6096_p11 }
  0xab   : > { %p6099_p8 = pnand %p6098_p7, %p6092_p1 }
  0xad   : > { %6102 = shalt.err (!%p6099_p8)
}
  0xae   : > { %s6103_s26 = scalar_lea.vmem %s6919_s19, 1024  ;;  %s6578_s1 = smov [#allocation14]  }
  0xaf   : > { %p6104_p2 = scmp.ne.s32.totalorder %s6919_s19, %s6103_s26  ;;  %s6108_s21 = sshll.u32 %s6578_s1, 4  ;;  %s6109_s21 = int_to_ptr.vmem [resolvable:$false] %s6108_s21 }
  0xb0   : > { %s6110_s5 = scalar_lea.vmem %s6109_s21, 2048  ;;  %p6111_p10 = scmp.lt.s32.totalorder %s6919_s19, %s6109_s21 }
  0xb1   : > { %p6106_p13 = pnand %p6104_p2, %p6836_p12  ;;  %p6112_p6 = scmp.lt.s32.totalorder %s6110_s5, %s6103_s26 }
  0xb3   : > { %p6107_p3 = pneg %p6106_p13  ;;  %p6113_p4 = por %p6112_p6, %p6111_p10 }
  0xb5   : > { %p6114_p5 = pnand %p6113_p4, %p6107_p3 }
  0xb7   : > { %6117 = shalt.err (!%p6114_p5)
}
  0xb8   : > { %s7870_s18 = smov 64   ;;  %s7872_s23 = smov 4  }
  0xb9   : > { %5568 = dma.hbm_to_vmem [thread:$0]  (!%p7924_p9), %s6917_s27, 1024, %s6919_s19, %s6830_s25, %s7870_s18, %s7870_s18, %s7872_s23  }
  0xba   : > { %s742_s20 = scalar_lea.vmem [#allocation15], %s6801_s4  ;;  %s7928_s11 = sld [smem:[#allocation53_spill]] }
  0xbb   : > { %s749_s29 = sshll.u32 %s742_s20, 4  ;;  %s6118_s26 = scalar_lea.hbm %s6925_s6, 16  ;;  %s750_s29 = int_to_ptr.vmem [resolvable:$true] %s749_s29 }
  0xbc   : > { %p6119_p1 = scmp.ne.s32.totalorder %s6925_s6, %s6118_s26  ;;  %s6123_s5 = scalar_lea.hbm %s7927_s10, 32 }
  0xbd   : > { %p6124_p7 = scmp.lt.u32.totalorder %s6925_s6, %s7927_s10  ;;  %p6125_p8 = scmp.lt.u32.totalorder %s6123_s5, %s6118_s26 }
  0xbe   : > { %p6121_p11 = pnand %p6119_p1, %p6836_p12  ;;  %p6127_p13 = scmp.lt.u32.totalorder %s6118_s26, %s6925_s6 }
  0xbf   : > { %p6126_p2 = por %p6125_p8, %p6124_p7 }
  0xc0   : > { %s6957_s8 = scalar_lea.hbm %s7928_s11, %s6808_s3  ;;  %p6122_p0 = pneg %p6121_p11 }
  0xc1   : > { %p6128_p3 = por %p6127_p13, %p6126_p2 }
  0xc3   : > { %p6129_p10 = pnand %p6128_p3, %p6122_p0 }
  0xc5   : > { %6132 = shalt.err (!%p6129_p10)
}
  0xc6   : > { %s6133_s27 = scalar_lea.vmem %s750_s29, 16  ;;  %s6581_s19 = smov [#allocation15]  }
  0xc7   : > { %p6134_p6 = scmp.ne.s32.totalorder %s750_s29, %s6133_s27  ;;  %s6138_s20 = sshll.u32 %s6581_s19, 4  ;;  %s6139_s20 = int_to_ptr.vmem [resolvable:$false] %s6138_s20 }
  0xc8   : > { %s6140_s22 = scalar_lea.vmem %s6139_s20, 32  ;;  %p6141_p1 = scmp.lt.s32.totalorder %s750_s29, %s6139_s20 }
  0xc9   : > { %p6136_p4 = pnand %p6134_p6, %p6836_p12  ;;  %p6142_p11 = scmp.lt.s32.totalorder %s6140_s22, %s6133_s27 }
  0xcb   : > { %p6137_p5 = pneg %p6136_p4  ;;  %p6143_p9 = por %p6142_p11, %p6141_p1 }
  0xcd   : > { %p6144_p7 = pnand %p6143_p9, %p6137_p5 }
  0xcf   : > { %6147 = shalt.err (!%p6144_p7)
}
  0xd0   : > { %p7929_p8 = scmp.ne.s32.totalorder %s7913_s0, 0  ;;  %s759_s7 = scalar_lea.vmem [#allocation16], %s6801_s4 }
  0xd1   : > { %s766_s9 = sshll.u32 %s759_s7, 4  ;;  %s7930_s12 = sld [smem:[#allocation54_spill]]  ;;  %s767_s9 = int_to_ptr.vmem [resolvable:$true] %s766_s9 }
  0xd2   : > { %5571 = dma.hbm_to_vmem [thread:$0]  (!%p7929_p8), %s6925_s6, 16, %s750_s29, %s6830_s25  }
  0xd3   : > { %s6148_s21 = scalar_lea.hbm %s6957_s8, 16  ;;  %s6153_s19 = scalar_lea.hbm %s7928_s11, 32 }
  0xd4   : > { %p6149_p9 = scmp.ne.s32.totalorder %s6957_s8, %s6148_s21  ;;  %p6154_p13 = scmp.lt.u32.totalorder %s6957_s8, %s7928_s11 }
  0xd5   : > { %p6155_p3 = scmp.lt.u32.totalorder %s6153_s19, %s6148_s21  ;;  %p6157_p6 = scmp.lt.u32.totalorder %s6148_s21, %s6957_s8 }
  0xd6   : > { %p6151_p0 = pnand %p6149_p9, %p6836_p12 }
  0xd7   : > { %s6982_s1 = scalar_lea.hbm %s7930_s12, %s6808_s3  ;;  %p6156_p10 = por %p6155_p3, %p6154_p13 }
  0xd8   : > { %p6152_p2 = pneg %p6151_p0 }
  0xd9   : > { %p6158_p4 = por %p6157_p6, %p6156_p10 }
  0xdb   : > { %p6159_p5 = pnand %p6158_p4, %p6152_p2 }
  0xdd   : > { %6162 = shalt.err (!%p6159_p5)
}
  0xde   : > { %s6163_s6 = scalar_lea.vmem %s767_s9, 16  ;;  %s6582_s29 = smov [#allocation16]  }
  0xdf   : > { %p6164_p1 = scmp.ne.s32.totalorder %s767_s9, %s6163_s6  ;;  %s6168_s7 = sshll.u32 %s6582_s29, 4  ;;  %s6169_s7 = int_to_ptr.vmem [resolvable:$false] %s6168_s7 }
  0xe0   : > { %s6170_s16 = scalar_lea.vmem %s6169_s7, 32  ;;  %p6171_p9 = scmp.lt.s32.totalorder %s767_s9, %s6169_s7 }
  0xe1   : > { %p6166_p11 = pnand %p6164_p1, %p6836_p12  ;;  %p6172_p0 = scmp.lt.s32.totalorder %s6170_s16, %s6163_s6 }
  0xe3   : > { %p6167_p7 = pneg %p6166_p11  ;;  %p6173_p8 = por %p6172_p0, %p6171_p9 }
  0xe5   : > { %p6174_p3 = pnand %p6173_p8, %p6167_p7 }
  0xe7   : > { %6177 = shalt.err (!%p6174_p3)
}
  0xe8   : > { %p7931_p13 = scmp.ne.s32.totalorder %s7913_s0, 0  ;;  %s776_s26 = scalar_lea.vmem [#allocation17], %s6801_s4 }
  0xe9   : > { %s783_s21 = sshll.u32 %s776_s26, 4  ;;  %s7868_s5 = sshll.u32 %s6801_s4, 8  ;;  %s784_s21 = int_to_ptr.vmem [resolvable:$true] %s783_s21 }
  0xea   : > { %5574 = dma.hbm_to_vmem [thread:$0]  (!%p7931_p13), %s6957_s8, 16, %s767_s9, %s6830_s25  }
  0xeb   : > { %s6178_s27 = scalar_lea.hbm %s6982_s1, 16  ;;  %s6183_s22 = scalar_lea.hbm %s7930_s12, 32 }
  0xec   : > { %p6179_p2 = scmp.ne.s32.totalorder %s6982_s1, %s6178_s27  ;;  %p6184_p6 = scmp.lt.u32.totalorder %s6982_s1, %s7930_s12 }
  0xed   : > { %p6185_p4 = scmp.lt.u32.totalorder %s6183_s22, %s6178_s27  ;;  %p6187_p1 = scmp.lt.u32.totalorder %s6178_s27, %s6982_s1 }
  0xee   : > { %p6181_p8 = pnand %p6179_p2, %p6836_p12 }
  0xef   : > { %p6186_p5 = por %p6185_p4, %p6184_p6 }
  0xf0   : > { %p6182_p10 = pneg %p6181_p8 }
  0xf1   : > { %p6188_p11 = por %p6187_p1, %p6186_p5 }
  0xf3   : > { %p6189_p7 = pnand %p6188_p11, %p6182_p10 }
  0xf5   : > { %6192 = shalt.err (!%p6189_p7)
}
  0xf6   : > { %s6193_s8 = scalar_lea.vmem %s784_s21, 16  ;;  %s6583_s9 = smov [#allocation17]  }
  0xf7   : > { %p6194_p9 = scmp.ne.s32.totalorder %s784_s21, %s6193_s8  ;;  %s6198_s7 = sshll.u32 %s6583_s9, 4  ;;  %s6199_s7 = int_to_ptr.vmem [resolvable:$false] %s6198_s7 }
  0xf8   : > { %s6200_s16 = scalar_lea.vmem %s6199_s7, 32  ;;  %p6201_p2 = scmp.lt.s32.totalorder %s784_s21, %s6199_s7 }
  0xf9   : > { %p6196_p0 = pnand %p6194_p9, %p6836_p12  ;;  %p6202_p8 = scmp.lt.s32.totalorder %s6200_s16, %s6193_s8 }
  0xfb   : > { %p6197_p3 = pneg %p6196_p0  ;;  %p6203_p13 = por %p6202_p8, %p6201_p2 }
  0xfd   : > { %p6204_p4 = pnand %p6203_p13, %p6197_p3 }
  0xff   : > { %6207 = shalt.err (!%p6204_p4)
}
 0x100   : > { %p7932_p6 = scmp.ne.s32.totalorder %s7913_s0, 0  ;;  %s7869_s26 = sshll.u32 %s6564_s2, 12 }
 0x101   : > { %s794_s27 = scalar_lea.vmem [#allocation18], %s7868_s5  ;;  %s7933_s13 = sld [smem:[#allocation55_spill]] }
 0x102   : > { %5577 = dma.hbm_to_vmem [thread:$0]  (!%p7932_p6), %s6982_s1, 16, %s784_s21, %s6830_s25  }
 0x103   : > { %s801_s19 = sshll.u32 %s794_s27, 4  ;;  %s7032_s19 = int_to_ptr.vmem [resolvable:$true] %s801_s19 }
 0x107   : > { %s7030_s6 = scalar_lea.hbm %s7933_s13, %s7869_s26  ;;  %s6213_s8 = scalar_lea.hbm %s7933_s13, 8192 }
 0x108   : > { %s6208_s29 = scalar_lea.hbm %s7030_s6, 4096  ;;  %p6214_p1 = scmp.lt.u32.totalorder %s7030_s6, %s7933_s13 }
 0x109   : > { %p6209_p13 = scmp.ne.s32.totalorder %s7030_s6, %s6208_s29  ;;  %p6215_p11 = scmp.lt.u32.totalorder %s6213_s8, %s6208_s29 }
 0x10a   : > { %p6217_p9 = scmp.lt.u32.totalorder %s6208_s29, %s7030_s6 }
 0x10b   : > { %p6211_p10 = pnand %p6209_p13, %p6836_p12  ;;  %p6216_p7 = por %p6215_p11, %p6214_p1 }
 0x10d   : > { %p6212_p5 = pneg %p6211_p10  ;;  %p6218_p0 = por %p6217_p9, %p6216_p7 }
 0x10f   : > { %p6219_p3 = pnand %p6218_p0, %p6212_p5 }
 0x111   : > { %6222 = shalt.err (!%p6219_p3)
}
 0x112   : > { %s6223_s16 = scalar_lea.vmem %s7032_s19, 4096  ;;  %s6584_s27 = smov [#allocation18]  }
 0x113   : > { %p6224_p2 = scmp.ne.s32.totalorder %s7032_s19, %s6223_s16  ;;  %s6228_s20 = sshll.u32 %s6584_s27, 4  ;;  %s6229_s20 = int_to_ptr.vmem [resolvable:$false] %s6228_s20 }
 0x114   : > { %s6230_s22 = scalar_lea.vmem %s6229_s20, 8192  ;;  %p6231_p13 = scmp.lt.s32.totalorder %s7032_s19, %s6229_s20 }
 0x115   : > { %p6226_p8 = pnand %p6224_p2, %p6836_p12  ;;  %p6232_p10 = scmp.lt.s32.totalorder %s6230_s22, %s6223_s16 }
 0x117   : > { %p6227_p4 = pneg %p6226_p8  ;;  %p6233_p1 = por %p6232_p10, %p6231_p13 }
 0x119   : > { %p6234_p11 = pnand %p6233_p1, %p6227_p4 }
 0x11b   : > { %6237 = shalt.err (!%p6234_p11)
}
 0x11c   : > { %s6585_s29 = smov 256   ;;  %s6586_s1 = smov 16  }
 0x11d   : > { %5580 = dma.hbm_to_vmem [thread:$0]  (!%p7932_p6), %s7030_s6, 4096, %s7032_s19, %s6830_s25, %s6585_s29, %s6585_s29, %s6586_s1  }
 0x11e   : > { %s4812_s21 = sshll.u32 %s6801_s4, 2  ;;  %s6587_s8 = smov [#allocation6]  }
 0x11f   : > { %s590_s9 = sshll.u32 %s6587_s8, 4  ;;  %s5055_s7 = sshll.u32 %s6564_s2, 6  ;;  %s591_s9 = int_to_ptr.vmem [resolvable:$true] %s590_s9 }
 0x120   : > { %s7934_s20 = sld [smem:[#allocation43_spill]]  ;;  %p7935_p7 = scmp.ne.s32.totalorder %s7915_s24, 0 }
 0x126   : > { %s6238_s22 = scalar_lea.hbm %s7934_s20, 6144 }
 0x127   : > { %p6239_p5 = scmp.ne.s32.totalorder %s7934_s20, %s6238_s22  ;;  %p6245_p3 = scmp.lt.u32.totalorder %s6238_s22, %s7934_s20 }
 0x129   : > { %p6241_p9 = pnand %p6239_p5, %p7935_p7 }
 0x12b   : > { %p6242_p0 = pneg %p6241_p9 }
 0x12d   : > { %p6247_p2 = pnand %p6245_p3, %p6242_p0 }
 0x12f   : > { %6250 = shalt.err (!%p6247_p2)
}
 0x130   : > { %s6251_s19 = scalar_lea.vmem %s591_s9, 6144  ;;  %p6259_p10 = scmp.lt.s32.totalorder %s591_s9, %s591_s9 }
 0x131   : > { %p6252_p8 = scmp.ne.s32.totalorder %s591_s9, %s6251_s19  ;;  %p6260_p1 = scmp.lt.s32.totalorder %s6251_s19, %s6251_s19 }
 0x133   : > { %p6254_p4 = pnand %p6252_p8, %p7935_p7  ;;  %p6261_p11 = por %p6260_p1, %p6259_p10 }
 0x135   : > { %p6255_p13 = pneg %p6254_p4 }
 0x137   : > { %p6262_p6 = pnand %p6261_p11, %p6255_p13 }
 0x139   : > { %6265 = shalt.err (!%p6262_p6)
}
 0x13a   : > { %p7936_p5 = scmp.ne.s32.totalorder %s7912_s30, 0  ;;  %s7937_s5 = smov 4  }
 0x13b   : > { %s7938_s26 = smov 64   ;;  %s7939_s14 = sld [smem:[#allocation56_spill]] }
 0x13c   : > { %5543 = dma.hbm_to_vmem [thread:$0]  (!%p7936_p5), %s7934_s20, 6144, %s591_s9, [#allocation7], %s7938_s26, %s7938_s26, %s7937_s5  }
 0x13d   : > { %s815_s8 = scalar_lea.vmem [#allocation19], %s4812_s21 }
 0x13e   : > { %s823_s16 = sshll.u32 %s815_s8, 4  ;;  %s824_s16 = int_to_ptr.vmem [resolvable:$true] %s823_s16 }
 0x141   : > { %s7082_s1 = scalar_lea.hbm %s7939_s14, %s5055_s7  ;;  %s6271_s9 = scalar_lea.hbm %s7939_s14, 128 }
 0x142   : > { %s6266_s27 = scalar_lea.hbm %s7082_s1, 64  ;;  %p6272_p3 = scmp.lt.u32.totalorder %s7082_s1, %s7939_s14 }
 0x143   : > { %p6267_p6 = scmp.ne.s32.totalorder %s7082_s1, %s6266_s27  ;;  %p6273_p2 = scmp.lt.u32.totalorder %s6271_s9, %s6266_s27 }
 0x144   : > { %p6275_p4 = scmp.lt.u32.totalorder %s6266_s27, %s7082_s1 }
 0x145   : > { %p6269_p9 = pnand %p6267_p6, %p6836_p12  ;;  %p6274_p8 = por %p6273_p2, %p6272_p3 }
 0x147   : > { %p6270_p0 = pneg %p6269_p9  ;;  %p6276_p13 = por %p6275_p4, %p6274_p8 }
 0x149   : > { %p6277_p10 = pnand %p6276_p13, %p6270_p0 }
 0x14b   : > { %6280 = shalt.err (!%p6277_p10)
}
 0x14c   : > { %s6281_s21 = scalar_lea.vmem %s824_s16, 64  ;;  %s6588_s7 = smov [#allocation19]  }
 0x14d   : > { %p6282_p1 = scmp.ne.s32.totalorder %s824_s16, %s6281_s21  ;;  %s6286_s6 = sshll.u32 %s6588_s7, 4  ;;  %s6287_s6 = int_to_ptr.vmem [resolvable:$false] %s6286_s6 }
 0x14e   : > { %s6288_s29 = scalar_lea.vmem %s6287_s6, 128  ;;  %p6289_p9 = scmp.lt.s32.totalorder %s824_s16, %s6287_s6 }
 0x14f   : > { %p6284_p11 = pnand %p6282_p1, %p6836_p12  ;;  %p6290_p5 = scmp.lt.s32.totalorder %s6288_s29, %s6281_s21 }
 0x151   : > { %p6285_p6 = pneg %p6284_p11  ;;  %p6291_p7 = por %p6290_p5, %p6289_p9 }
 0x153   : > { %p6292_p2 = pnand %p6291_p7, %p6285_p6 }
 0x155   : > { %6295 = shalt.err (!%p6292_p2)
}
 0x156   : > { %p7940_p3 = scmp.ne.s32.totalorder %s7913_s0, 0  ;;  %s6589_s8 = smov [#allocation8]  }
 0x157   : > { %s603_s27 = sshll.u32 %s6589_s8, 4  ;;  %s7941_s9 = sld [smem:[#allocation44_spill]]  ;;  %s604_s27 = int_to_ptr.vmem [resolvable:$true] %s603_s27 }
 0x158   : > { %5583 = dma.hbm_to_vmem [thread:$0]  (!%p7940_p3), %s7082_s1, 64, %s824_s16, %s6830_s25  }
 0x159   : > { %p7942_p5 = scmp.ne.s32.totalorder %s7915_s24, 0 }
 0x15d   : > { %s6296_s18 = scalar_lea.hbm %s7941_s9, 256 }
 0x15e   : > { %p6297_p0 = scmp.ne.s32.totalorder %s7941_s9, %s6296_s18  ;;  %p6303_p4 = scmp.lt.u32.totalorder %s6296_s18, %s7941_s9 }
 0x160   : > { %p6299_p7 = pnand %p6297_p0, %p7942_p5 }
 0x162   : > { %p6300_p8 = pneg %p6299_p7 }
 0x164   : > { %p6305_p13 = pnand %p6303_p4, %p6300_p8 }
 0x166   : > { %6308 = shalt.err (!%p6305_p13)
}
 0x167   : > { %s6309_s1 = scalar_lea.vmem %s604_s27, 256  ;;  %p6317_p6 = scmp.lt.s32.totalorder %s604_s27, %s604_s27 }
 0x168   : > { %p6310_p10 = scmp.ne.s32.totalorder %s604_s27, %s6309_s1  ;;  %p6318_p9 = scmp.lt.s32.totalorder %s6309_s1, %s6309_s1 }
 0x16a   : > { %p6312_p1 = pnand %p6310_p10, %p7942_p5  ;;  %p6319_p2 = por %p6318_p9, %p6317_p6 }
 0x16c   : > { %p6313_p11 = pneg %p6312_p1 }
 0x16e   : > { %p6320_p3 = pnand %p6319_p2, %p6313_p11 }
 0x170   : > { %6323 = shalt.err (!%p6320_p3)
}
 0x171   : > { %s6590_s16 = smov 128   ;;  %s6591_s29 = smov 8  }
 0x172   : > { %p7943_p0 = scmp.ne.s32.totalorder %s7912_s30, 0  ;;  %s6592_s19 = smov [#allocation9]  }
 0x173   : > { %s620_s18 = sshll.u32 %s6592_s19, 4  ;;  %s7944_s23 = sshll.u32 %s6564_s2, 12  ;;  %s621_s18 = int_to_ptr.vmem [resolvable:$true] %s620_s18 }
 0x174   : > { %5546 = dma.hbm_to_vmem [thread:$0]  (!%p7943_p0), %s7941_s9, 256, %s604_s27, [#allocation7], %s6590_s16, %s6590_s16, %s6591_s29  }
 0x175   : > { %s7125_s6 = scalar_lea.hbm %s7832_s15, %s7944_s23  ;;  %s7945_s1 = sshll.u32 %s6801_s4, 8 }
 0x176   : > { %s834_s10 = scalar_lea.vmem [#allocation20], %s7945_s1  ;;  %s7946_s14 = sld [smem:[#allocation46_spill]] }
 0x177   : > { %s841_s11 = sshll.u32 %s834_s10, 4  ;;  %s7147_s11 = int_to_ptr.vmem [resolvable:$true] %s841_s11 }
 0x17c   : > { %s6324_s20 = scalar_lea.hbm %s7946_s14, 16 }
 0x17d   : > { %p6325_p3 = scmp.ne.s32.totalorder %s7946_s14, %s6324_s20  ;;  %p6331_p4 = scmp.lt.u32.totalorder %s6324_s20, %s7946_s14 }
 0x17f   : > { %p6327_p7 = pnand %p6325_p3, %p7942_p5 }
 0x181   : > { %p6328_p8 = pneg %p6327_p7 }
 0x183   : > { %p6333_p13 = pnand %p6331_p4, %p6328_p8 }
 0x185   : > { %6336 = shalt.err (!%p6333_p13)
}
 0x186   : > { %s6337_s29 = scalar_lea.vmem %s621_s18, 16  ;;  %s6344_s10 = scalar_lea.vmem %s621_s18, 32 }
 0x187   : > { %p6338_p10 = scmp.ne.s32.totalorder %s621_s18, %s6337_s29  ;;  %p6345_p6 = scmp.lt.s32.totalorder %s621_s18, %s621_s18 }
 0x188   : > { %p6346_p9 = scmp.lt.s32.totalorder %s6344_s10, %s6337_s29 }
 0x189   : > { %p6340_p1 = pnand %p6338_p10, %p7942_p5 }
 0x18a   : > { %p6347_p2 = por %p6346_p9, %p6345_p6 }
 0x18b   : > { %p6341_p11 = pneg %p6340_p1 }
 0x18d   : > { %p6348_p12 = pnand %p6347_p2, %p6341_p11 }
 0x18f   : > { %6351 = shalt.err (!%p6348_p12)
}
 0x190   : > { %5549 = dma.hbm_to_vmem [thread:$0]  (!%p7943_p0), %s7946_s14, 16, %s621_s18, [#allocation10]  }
 0x191   : > { %s6352_s17 = scalar_lea.hbm %s7125_s6, 4096  ;;  %p7947_p7 = scmp.ne.s32.totalorder %s7923_s28, 0 }
 0x192   : > { %p6353_p3 = scmp.ne.s32.totalorder %s7125_s6, %s6352_s17  ;;  %s6357_s8 = scalar_lea.hbm %s7832_s15, 8192 }
 0x193   : > { %p6358_p12 = scmp.lt.u32.totalorder %s7125_s6, %s7832_s15  ;;  %p6359_p13 = scmp.lt.u32.totalorder %s6357_s8, %s6352_s17 }
 0x194   : > { %p6355_p8 = pnand %p6353_p3, %p7947_p7  ;;  %p6361_p1 = scmp.lt.u32.totalorder %s6352_s17, %s7125_s6 }
 0x195   : > { %p6360_p10 = por %p6359_p13, %p6358_p12 }
 0x196   : > { %p6356_p4 = pneg %p6355_p8 }
 0x197   : > { %p6362_p11 = por %p6361_p1, %p6360_p10 }
 0x199   : > { %p6363_p6 = pnand %p6362_p11, %p6356_p4 }
 0x19b   : > { %6366 = shalt.err (!%p6363_p6)
}
 0x19c   : > { %s6367_s18 = scalar_lea.vmem %s7147_s11, 4096  ;;  %s6593_s23 = smov [#allocation20]  }
 0x19d   : > { %p6368_p9 = scmp.ne.s32.totalorder %s7147_s11, %s6367_s18  ;;  %s6372_s7 = sshll.u32 %s6593_s23, 4  ;;  %s6373_s7 = int_to_ptr.vmem [resolvable:$false] %s6372_s7 }
 0x19e   : > { %s6374_s21 = scalar_lea.vmem %s6373_s7, 8192  ;;  %p6375_p8 = scmp.lt.s32.totalorder %s7147_s11, %s6373_s7 }
 0x19f   : > { %p6370_p2 = pnand %p6368_p9, %p7947_p7  ;;  %p6376_p0 = scmp.lt.s32.totalorder %s6374_s21, %s6367_s18 }
 0x1a1   : > { %p6371_p3 = pneg %p6370_p2  ;;  %p6377_p12 = por %p6376_p0, %p6375_p8 }
 0x1a3   : > { %p6378_p13 = pnand %p6377_p12, %p6371_p3 }
 0x1a5   : > { %6381 = shalt.err (!%p6378_p13)
}
 0x1a6   : > { %p7948_p4 = scmp.ne.s32.totalorder %s7913_s0, 0  ;;  %s6594_s1 = smov [#allocation22]  }
 0x1a7   : > { %s631_s27 = sshll.u32 %s6594_s1, 4  ;;  %s6595_s16 = smov [#allocation23]   ;;  %s632_s27 = int_to_ptr.vmem [resolvable:$true] %s631_s27 }
 0x1a8   : > { %5586 = dma.hbm_to_vmem [thread:$0]  (!%p7948_p4), %s7125_s6, 4096, %s7147_s11, %s6830_s25, %s7938_s26, %s7938_s26, %s7937_s5  }
 0x1a9   : > { %s642_s29 = sshll.u32 %s6595_s16, 4  ;;  %s7949_s13 = sld [smem:[#allocation58_spill]]  ;;  %s643_s29 = int_to_ptr.vmem [resolvable:$true] %s642_s29 }
 0x1af   : > { %s6382_s17 = scalar_lea.hbm %s7949_s13, 16 }
 0x1b0   : > { %p6383_p0 = scmp.ne.s32.totalorder %s7949_s13, %s6382_s17  ;;  %p6389_p11 = scmp.lt.u32.totalorder %s6382_s17, %s7949_s13 }
 0x1b2   : > { %p6385_p10 = pnand %p6383_p0, %p7942_p5 }
 0x1b4   : > { %p6386_p1 = pneg %p6385_p10 }
 0x1b6   : > { %p6391_p6 = pnand %p6389_p11, %p6386_p1 }
 0x1b8   : > { %6394 = shalt.err (!%p6391_p6)
}
 0x1b9   : > { %s6395_s11 = scalar_lea.vmem %s632_s27, 16  ;;  %s6402_s5 = scalar_lea.vmem %s632_s27, 32 }
 0x1ba   : > { %p6396_p9 = scmp.ne.s32.totalorder %s632_s27, %s6395_s11  ;;  %p6403_p8 = scmp.lt.s32.totalorder %s632_s27, %s632_s27 }
 0x1bb   : > { %p6404_p12 = scmp.lt.s32.totalorder %s6402_s5, %s6395_s11 }
 0x1bc   : > { %p6398_p2 = pnand %p6396_p9, %p7942_p5 }
 0x1bd   : > { %p6405_p13 = por %p6404_p12, %p6403_p8 }
 0x1be   : > { %p6399_p3 = pneg %p6398_p2 }
 0x1c0   : > { %p6406_p4 = pnand %p6405_p13, %p6399_p3 }
 0x1c2   : > { %6409 = shalt.err (!%p6406_p4)
}
 0x1c3   : > { %p7950_p0 = scmp.ne.s32.totalorder %s7912_s30, 0  ;;  %s7951_s23 = sld [smem:[#allocation59_spill]] }
 0x1c5   : > { %5552 = dma.hbm_to_vmem [thread:$0]  (!%p7950_p0), %s7949_s13, 16, %s632_s27, [#allocation7]  }
 0x1c9   : > { %s7952_s7 = smov %s7951_s23  ;;  %s6410_s21 = scalar_lea.hbm %s7951_s23, 16 }
 0x1ca   : > { %p6411_p10 = scmp.ne.s32.totalorder %s7952_s7, %s6410_s21  ;;  %p6417_p4 = scmp.lt.u32.totalorder %s6410_s21, %s7952_s7 }
 0x1cc   : > { %p6413_p1 = pnand %p6411_p10, %p7942_p5 }
 0x1ce   : > { %p6414_p11 = pneg %p6413_p1 }
 0x1d0   : > { %p6419_p6 = pnand %p6417_p4, %p6414_p11 }
 0x1d2   : > { %6422 = shalt.err (!%p6419_p6)
}
 0x1d3   : > { %s6423_s17 = scalar_lea.vmem %s643_s29, 16  ;;  %s6430_s27 = scalar_lea.vmem %s643_s29, 32 }
 0x1d4   : > { %p6424_p9 = scmp.ne.s32.totalorder %s643_s29, %s6423_s17  ;;  %p6431_p8 = scmp.lt.s32.totalorder %s643_s29, %s643_s29 }
 0x1d5   : > { %p6432_p12 = scmp.lt.s32.totalorder %s6430_s27, %s6423_s17 }
 0x1d6   : > { %p6426_p2 = pnand %p6424_p9, %p7942_p5 }
 0x1d7   : > { %p6433_p13 = por %p6432_p12, %p6431_p8 }
 0x1d8   : > { %p6427_p3 = pneg %p6426_p2 }
 0x1da   : > { %p6434_p7 = pnand %p6433_p13, %p6427_p3 }
 0x1dc   : > { %6437 = shalt.err (!%p6434_p7)
}
 0x1dd   : > { %s7953_s8 = sld [smem:[#allocation40_spill]]  ;;  %s7954_s24 = sld [smem:[#allocation57_spill]] }
 0x1de   : > { %5555 = dma.hbm_to_vmem [thread:$0]  (!%p7950_p0), %s7952_s7, 16, %s643_s29, [#allocation10]  }
 0x1df   : > { %s854_s6 = scalar_lea.vmem [#allocation21], %s6801_s4  ;;  %p7956_p7 = scmp.ne.s32.totalorder %s7923_s28, 0 }
 0x1e0   : > { %s861_s19 = sshll.u32 %s854_s6, 4  ;;  %s862_s19 = int_to_ptr.vmem [resolvable:$true] %s861_s19 }
 0x1e3   : > { %s7955_s5 = smov %s7954_s24  ;;  %s7214_s26 = scalar_lea.hbm %s7954_s24, %s7953_s8 }
 0x1e4   : > { %s6438_s30 = scalar_lea.hbm %s7214_s26, 16  ;;  %s6443_s29 = scalar_lea.hbm %s7955_s5, 32 }
 0x1e5   : > { %p6439_p5 = scmp.ne.s32.totalorder %s7214_s26, %s6438_s30  ;;  %p6444_p0 = scmp.lt.u32.totalorder %s7214_s26, %s7955_s5 }
 0x1e6   : > { %p6445_p11 = scmp.lt.u32.totalorder %s6443_s29, %s6438_s30  ;;  %p6447_p6 = scmp.lt.u32.totalorder %s6438_s30, %s7214_s26 }
 0x1e7   : > { %p6441_p10 = pnand %p6439_p5, %p7956_p7 }
 0x1e8   : > { %p6446_p4 = por %p6445_p11, %p6444_p0 }
 0x1e9   : > { %p6442_p1 = pneg %p6441_p10 }
 0x1ea   : > { %p6448_p9 = por %p6447_p6, %p6446_p4 }
 0x1ec   : > { %p6449_p2 = pnand %p6448_p9, %p6442_p1 }
 0x1ee   : > { %6452 = shalt.err (!%p6449_p2)
}
 0x1ef   : > { %s6453_s4 = scalar_lea.vmem %s862_s19, 16  ;;  %s6596_s16 = smov [#allocation21]  }
 0x1f0   : > { %p6454_p3 = scmp.ne.s32.totalorder %s862_s19, %s6453_s4  ;;  %s6458_s10 = sshll.u32 %s6596_s16, 4  ;;  %s6459_s10 = int_to_ptr.vmem [resolvable:$false] %s6458_s10 }
 0x1f1   : > { %s6460_s12 = scalar_lea.vmem %s6459_s10, 32  ;;  %p6461_p13 = scmp.lt.s32.totalorder %s862_s19, %s6459_s10 }
 0x1f2   : > { %p6456_p8 = pnand %p6454_p3, %p7956_p7  ;;  %p6462_p5 = scmp.lt.s32.totalorder %s6460_s12, %s6453_s4 }
 0x1f4   : > { %p6457_p12 = pneg %p6456_p8  ;;  %p6463_p10 = por %p6462_p5, %p6461_p13 }
 0x1f6   : > { %p6464_p0 = pnand %p6463_p10, %p6457_p12 }
 0x1f8   : > { %6467 = shalt.err (!%p6464_p0)
}
 0x1f9   : > { %p7957_p11 = scmp.ne.s32.totalorder %s7913_s0, 0  ;;  %s7958_s17 = sld [smem:[#allocation38_spill]] }
 0x1fb   : > { %5589 = dma.hbm_to_vmem [thread:$0]  (!%p7957_p11), %s7214_s26, 16, %s862_s19, %s6830_s25  }
 0x1ff   : > { %p7959_p1 = scmp.ne.s32.totalorder %s7958_s17, 0 }
 0x200   : > { %s7960_s28 = sld [smem:[#allocation36_spill]] (!%p7959_p1) }
 0x201   : > { %870 = sbr.rel (%p7959_p1) target bundleno = 7442 (0x1d12), region = 100 }
 0x206   : > { %p7961_p7 = scmp.eq.s32.totalorder (!%p7959_p1), %s7960_s28, 0 }
 0x208   : > { %6519 = dma.done.wait (%p7961_p7), [#allocation4], 768   ;;  %p7962_p4 = pmov %p7961_p7 }
 0x20a   : > { %6521 = vsyncadd (%p7962_p4), [#allocation4], 4294966528  ;;  %p7963_p6 = pmov %p7962_p4 }
 0x20b   : > { %p7964_p9 = pmov %p7962_p4 }
 0x20c   : > { %6523 = dma.done.wait (%p7963_p6), [#allocation7], 6400  }
 0x20d   : > { %6525 = vsyncadd (%p7964_p9), [#allocation7], 4294960896  ;;  %p7965_p2 = pmov %p7962_p4 }
 0x20f   : > { %6527 = dma.done.wait (%p7965_p2), [#allocation10], 16   ;;  %p7966_p3 = pmov %p7965_p2 }
 0x210   : > { %s7967_s25 = sld [smem:[#allocation32_spill]]  ;;  %s7968_s0 = sld [smem:[#allocation37_spill]] }
 0x211   : > { %6529 = vsyncadd (%p7966_p3), [#allocation10], 4294967280  ;;  %s888_s27 = sand.u32 1, %s7960_s28  }
 0x212   : > { %s889_s20 = scalar_lea.sflag [#allocation4], %s888_s27 }
 0x216   : > { %s7251_s3 = sand.u32 1, %s7967_s25   ;;  %p7969_p8 = scmp.ne.s32.totalorder %s7968_s0, 0 }
 0x217   : > { %s891_s8 = scalar_lea.vmem [#allocation11], %s7251_s3 }
 0x218   : > { %6531 = dma.done.wait (%p7969_p8), %s889_s20, 12448  }
 0x219   : > { %6533 = vsyncadd (%p7969_p8), %s889_s20, 4294954848  ;;  %s5485_s22 = smul.u32 192, %s7251_s3  ;;  %s4824_s11 = sshll.u32 %s7251_s3, 6 }
 0x21a   : > { %s4825_s24 = sshll.u32 %s7251_s3, 8  ;;  %s4826_s26 = sshll.u32 %s7251_s3, 2 }
 0x21b   : > { %s899_s6 = scalar_lea.vmem [#allocation12], %s7251_s3  ;;  %s7263_s19 = scalar_lea.vmem [#allocation13], %s5485_s22 }
 0x21c   : > { %s7265_s30 = scalar_lea.vmem [#allocation14], %s4824_s11  ;;  %s925_s18 = scalar_lea.vmem [#allocation15], %s7251_s3 }
 0x21d   : > { %s933_s23 = scalar_lea.vmem [#allocation16], %s7251_s3  ;;  %s941_s29 = scalar_lea.vmem [#allocation17], %s7251_s3 }
 0x21e   : > { %s7270_s21 = scalar_lea.vmem [#allocation18], %s4825_s24  ;;  %s7272_s1 = scalar_lea.vmem [#allocation19], %s4826_s26 }
 0x21f   : > { %s7274_s4 = scalar_lea.vmem [#allocation20], %s4825_s24  ;;  %s976_s16 = scalar_lea.vmem [#allocation21], %s7251_s3 }
 0x220   : > { %p7970_p12 = pmov %p7965_p2 }
 0x221   : > { %p7971_p13 = pmov %p7965_p2 }
 0x222   : > { %6535 = dma.done.wait (%p7970_p12), [#allocation7], 16  }
 0x223   : > { %6537 = vsyncadd (%p7971_p13), [#allocation7], 4294967280  ;;  %p7972_p5 = pmov %p7965_p2 }
 0x224   : > { %p7973_p10 = pmov %p7965_p2 }
 0x225   : > { %6539 = dma.done.wait (%p7972_p5), [#allocation10], 16  }
 0x226   : > { %6541 = vsyncadd (%p7973_p10), [#allocation10], 4294967280  ;;  %s7974_s10 = sld [smem:[#allocation34_spill]]  ;;  %s7975_s27 = sld [smem:[#allocation50_spill]] }
 0x22c   : > { %p1084_p0 = scmp.lt.s32.totalorder %s7974_s10, 1  ;;  %p4830_p11 = scmp.ne.s32.totalorder %s7974_s10, 0 }
 0x22d   : > { %v5679_v0 = vld [vmem:[#allocation6 + $0x40] sm:$0xff] (!%p4830_p11)   ;;  %v5683_v4 = vld [vmem:[#allocation6 + $0x48] sm:$0xff] (!%p4830_p11)   ;;  %v5687_v8 = vld [vmem:[#allocation6 + $0x50] sm:$0xff] (!%p4830_p11)   ;;  %vm1642_vm0 = vcmask (!%p4830_p11), 1041408   ;;  %s7976_s11 = sld [smem:[#allocation45_spill]] (!%p4830_p11) }
 0x22e   : > { %s1085_s12 = scalar_select %p1084_p0, %s7974_s10, 1 }
 0x22f   : > { %1092 = sbr.rel (%p4830_p11) target bundleno = 1163 (0x48b), region = 172  ;;  %v5680_v1 = vld [vmem:[#allocation6] sm:$0xff] (!%p4830_p11)   ;;  %5057 = vmatprep.subr.bf16.mxu0 (!%p4830_p11), %v5679_v0  ;;  %v5684_v5 = vld [vmem:[#allocation6 + $0x8] sm:$0xff] (!%p4830_p11)   ;;  %v5688_v9 = vld [vmem:[#allocation6 + $0x10] sm:$0xff] (!%p4830_p11)  }
 0x230   : > { %s5486_s17 = smul.u32 3, %s1085_s12  ;;  %v5681_v2 = vld [vmem:[#allocation6 + $0xc0] sm:$0xff] (!%p4830_p11)   ;;  %5058 = vmatpush3.bf16.msra.mxu0 (!%p4830_p11), %v5680_v1  ;;  %v5685_v6 = vld [vmem:[#allocation6 + $0xc8] sm:$0xff] (!%p4830_p11)   ;;  %v5689_v10 = vld [vmem:[#allocation6 + $0xd0] sm:$0xff] (!%p4830_p11)  }
 0x231   : > { %v5682_v3 = vld [vmem:[#allocation6 + $0x80] sm:$0xff] (!%p4830_p11)   ;;  %5079 = vmatprep.subr.bf16.mxu1 (!%p4830_p11), %v5681_v2  ;;  %5059 = vmatprep.subr.bf16.mxu0 (!%p4830_p11), %v5683_v4  ;;  %v5686_v7 = vld [vmem:[#allocation6 + $0x88] sm:$0xff] (!%p4830_p11)   ;;  %v5690_v11 = vld [vmem:[#allocation6 + $0x90] sm:$0xff] (!%p4830_p11)  }
 0x232   : > { %s7290_s20 = scalar_lea.vmem %s7975_s27, %s5486_s17  ;;  %5080 = vmatpush3.bf16.msra.mxu1 (!%p4830_p11), %v5682_v3  ;;  %v5691_v12 = vld [vmem:[#allocation6 + $0x58] sm:$0xff] (!%p4830_p11)   ;;  %v5695_v16 = vld [vmem:[#allocation6 + $0x60] sm:$0xff] (!%p4830_p11)   ;;  %v5699_v20 = vld [vmem:[#allocation6 + $0x68] sm:$0xff] (!%p4830_p11)  }
 0x233   : > { %5081 = vmatprep.subr.bf16.mxu1 (!%p4830_p11), %v5685_v6  ;;  %v5692_v13 = vld [vmem:[#allocation6 + $0x18] sm:$0xff] (!%p4830_p11)   ;;  %v5696_v17 = vld [vmem:[#allocation6 + $0x20] sm:$0xff] (!%p4830_p11)   ;;  %v5700_v21 = vld [vmem:[#allocation6 + $0x28] sm:$0xff] (!%p4830_p11)  }
 0x234   : > { %5060 = vmatpush3.bf16.msra.mxu0 (!%p4830_p11), %v5684_v5  ;;  %v5693_v14 = vld [vmem:[#allocation6 + $0xd8] sm:$0xff] (!%p4830_p11)   ;;  %v5697_v18 = vld [vmem:[#allocation6 + $0xe0] sm:$0xff] (!%p4830_p11)   ;;  %v5701_v22 = vld [vmem:[#allocation6 + $0xe8] sm:$0xff] (!%p4830_p11)  }
 0x235   : > { %5061 = vmatprep.subr.bf16.mxu0 (!%p4830_p11), %v5687_v8  ;;  %v5694_v15 = vld [vmem:[#allocation6 + $0x98] sm:$0xff] (!%p4830_p11)   ;;  %v5698_v19 = vld [vmem:[#allocation6 + $0xa0] sm:$0xff] (!%p4830_p11)   ;;  %v5702_v23 = vld [vmem:[#allocation6 + $0xa8] sm:$0xff] (!%p4830_p11)  }
 0x236   : > { %5082 = vmatpush3.bf16.msra.mxu1 %v5686_v7  ;;  %v5703_v24 = vld [vmem:[#allocation6 + $0x70] sm:$0xff]   ;;  %v5707_v28 = vld [vmem:[#allocation6 + $0x78] sm:$0xff]   ;;  %v5714_v34 = vld [vmem:[#allocation6 + $0x140] sm:$0xff]  }
 0x237   : > { %5083 = vmatprep.subr.bf16.mxu1 %v5689_v10  ;;  %v5704_v25 = vld [vmem:[#allocation6 + $0x30] sm:$0xff]   ;;  %v5708_v29 = vld [vmem:[#allocation6 + $0x38] sm:$0xff]   ;;  %v5718_v37 = vld [vmem:[#allocation6 + $0x100] sm:$0xff]  }
 0x238   : > { %5062 = vmatpush3.bf16.msra.mxu0 %v5688_v9  ;;  %v5705_v26 = vld [vmem:[#allocation6 + $0xf0] sm:$0xff]   ;;  %v5709_v30 = vld [vmem:[#allocation6 + $0xf8] sm:$0xff]   ;;  %v5719_v38 = vld [vmem:[#allocation6 + $0x148] sm:$0xff]  }
 0x239   : > { %5063 = vmatprep.subr.bf16.mxu0 %v5691_v12  ;;  %v5706_v27 = vld [vmem:[#allocation6 + $0xb0] sm:$0xff]   ;;  %v5713_v33 = vld [vmem:[#allocation6 + $0xb8] sm:$0xff]   ;;  %v5720_v39 = vld [vmem:[#allocation6 + $0x108] sm:$0xff]  }
 0x23a   : > { %5084 = vmatpush3.bf16.msra.mxu1 %v5690_v11  ;;  %v5710_v31 = vld [vmem:[#allocation3] ss:$24 sps:$4 sm:$0x1f]   ;;  %v5712_v32 = vld [vmem:[#allocation3 + $0x4] ss:$24 sps:$4 sm:$0x1f]  }
 0x23b   : > { %5085 = vmatprep.subr.bf16.mxu1 %v5693_v14  ;;  %1547 = vmatprep.mubr.bf16.mxu0 %v5712_v32  ;;  %v5715_v35 = vld [vmem:[#allocation3 + $0x8] ss:$24 sps:$4 sm:$0x1f]   ;;  %v5717_v36 = vld [vmem:[#allocation3 + $0xc] ss:$24 sps:$4 sm:$0x1f]  }
 0x23c   : > { %5064 = vmatpush3.bf16.msra.mxu0 %v5692_v13  ;;  %1588 = vmatprep.mubr.bf16.mxu1 %v5717_v36  ;;  %v5721_v40 = vld [vmem:[#allocation6 + $0x150] sm:$0xff]   ;;  %v5723_v42 = vld [vmem:[#allocation6 + $0x158] sm:$0xff]   ;;  %v5725_v44 = vld [vmem:[#allocation6 + $0x160] sm:$0xff]  }
 0x23d   : > { %5065 = vmatprep.subr.bf16.mxu0 %v5695_v16  ;;  %v5722_v41 = vld [vmem:[#allocation6 + $0x110] sm:$0xff]   ;;  %v5724_v43 = vld [vmem:[#allocation6 + $0x118] sm:$0xff]   ;;  %v5726_v45 = vld [vmem:[#allocation6 + $0x120] sm:$0xff]  }
 0x23e   : > { %5086 = vmatpush3.bf16.msra.mxu1 %v5694_v15  ;;  %v5727_v46 = vld [vmem:[#allocation6 + $0x168] sm:$0xff]   ;;  %v5735_v47 = vld [vmem:[#allocation3 + $0x14] ss:$24 sps:$4 sm:$0x1f]   ;;  %v5729_v49 = vld [vmem:[#allocation6 + $0x170] sm:$0xff]  }
 0x23f   : > { %5087 = vmatprep.subr.bf16.mxu1 %v5697_v18  ;;  %v5728_v48 = vld [vmem:[#allocation6 + $0x128] sm:$0xff]   ;;  %v5730_v50 = vld [vmem:[#allocation6 + $0x130] sm:$0xff]   ;;  %v5731_v51 = vld [vmem:[#allocation6 + $0x178] sm:$0xff]  }
 0x240   : > { %5066 = vmatpush3.bf16.msra.mxu0 %v5696_v17  ;;  %v5732_v52 = vld [vmem:[#allocation6 + $0x138] sm:$0xff]   ;;  %v1195_v55 = vld [vmem:[#allocation8] sm:$0xff]  ;;  %v1196_v60 = vld [vmem:[#allocation8 + $0x8] sm:$0x3] }
 0x241   : > { %5067 = vmatprep.subr.bf16.mxu0 %v5699_v20  ;;  %v5733_v53 = vld [vmem:[#allocation3 + $0x10] ss:$24 sps:$4 sm:$0x1f]  }
 0x242   : > { %5088 = vmatpush3.bf16.msra.mxu1 %v5698_v19 }
 0x243   : > { %5089 = vmatprep.subr.bf16.mxu1 %v5701_v22 }
 0x244   : > { %5068 = vmatpush3.bf16.msra.mxu0 %v5700_v21 }
 0x245   : > { %5069 = vmatprep.subr.bf16.mxu0 %v5703_v24 }
 0x246   : > { %5090 = vmatpush3.bf16.msra.mxu1 %v5702_v23 }
 0x247   : > { %5091 = vmatprep.subr.bf16.mxu1 %v5705_v26 }
 0x248   : > { %5070 = vmatpush3.bf16.msra.mxu0 %v5704_v25 }
 0x249   : > { %5071 = vmatprep.subr.bf16.mxu0 %v5707_v28 }
 0x24a   : > { %5092 = vmatpush3.bf16.msra.mxu1 %v5706_v27 }
 0x24b   : > { %5093 = vmatprep.subr.bf16.mxu1 %v5709_v30 }
 0x24c   : > { %5072 = vmatpush3.bf16.msra.mxu0 %v5708_v29 }
 0x24d   : > { %5101 = vmatprep.subr.bf16.mxu0 %v5714_v34 }
 0x24e   : > { %5094 = vmatpush3.bf16.msra.mxu1 %v5713_v33  ;;  %v4885_v33 = vld [vmem:[%s7976_s11] ss:$0 sm:$0xff] }
 0x24f   : > { %1548 = vmatmul.mubr.bf16.vlgmr.msra.gmra.mrb[0].mxu0 %v5710_v31 }
 0x250   : > { %5102 = vmatpush3.bf16.msra.mxu0 %v5718_v37  ;;  %1629 = vmatprep.mubr.bf16.mxu0 %v5735_v47 }
 0x251   : > { %1589 = vmatmul.mubr.bf16.vlgmr.msra.gmra.mrb[0].mxu1 %v5715_v35  ;;  %5103 = vmatprep.subr.bf16.mxu0 %v5719_v38  ;;  %v4886_v35 = vld [vmem:[#allocation9] ss:$0 sm:$0xff] }
 0x254   : > { %5104 = vmatpush3.bf16.msra.mxu0 %v5720_v39 }
 0x255   : > { %5105 = vmatprep.subr.bf16.mxu0 %v5721_v40 }
 0x258   : > { %5106 = vmatpush3.bf16.msra.mxu0 %v5722_v41 }
 0x259   : > { %5107 = vmatprep.subr.bf16.mxu0 %v5723_v42 }
 0x25c   : > { %5108 = vmatpush3.bf16.msra.mxu0 %v5724_v43 }
 0x25d   : > { %5109 = vmatprep.subr.bf16.mxu0 %v5725_v44 }
 0x260   : > { %5110 = vmatpush3.bf16.msra.mxu0 %v5726_v45 }
 0x261   : > { %5111 = vmatprep.subr.bf16.mxu0 %v5727_v46 }
 0x264   : > { %5112 = vmatpush3.bf16.msra.mxu0 %v5728_v48 }
 0x265   : > { %5113 = vmatprep.subr.bf16.mxu0 %v5729_v49 }
 0x268   : > { %5114 = vmatpush3.bf16.msra.mxu0 %v5730_v50 }
 0x269   : > { %5115 = vmatprep.subr.bf16.mxu0 %v5731_v51 }
 0x26c   : > { %5116 = vmatpush3.bf16.msra.mxu0 %v5732_v52 }
 0x26f   : > { %1630 = vmatmul.mubr.bf16.vlgmr.msra.gmra.mrb[4].mxu0 %v5733_v53 }
 0x322   : > { %v5073_v54 = vpop.f32.mrb[0].mxu0 }
 0x323   : > { %v5074_v56 = vpop.f32.mrb[1].mxu0 }
 0x324   : > { %v5075_v57 = vadd.f32 %v5074_v56, %v5073_v54  ;;  %v5076_v58 = vpop.f32.mrb[2].mxu0  ;;  %v5095_v59 = vpop.f32.mrb[0].mxu1 }
 0x325   : > { %v5077_v61 = vpop.f32.mrb[3].mxu0  ;;  %v5096_v0 = vpop.f32.mrb[1].mxu1 }
 0x326   : > { %v1550_v62 = vadd.f32 %v5075_v57, %v1195_v55  ;;  %v5078_v63 = vadd.f32 %v5077_v61, %v5076_v58  ;;  %v5097_v1 = vadd.f32 %v5096_v0, %v5095_v59  ;;  %v5098_v2 = vpop.f32.mrb[2].mxu1 }
 0x327   : > { %v5099_v4 = vpop.f32.mrb[3].mxu1 }
 0x328   : > { %v1553_v3 = vadd.f32 %v5078_v63, %v1196_v60  ;;  %v1591_v5 = vadd.f32 %v5097_v1, %v1550_v62  ;;  %v5100_v6 = vadd.f32 %v5099_v4, %v5098_v2 }
 0x32a   : > { %v1594_v7 = vadd.f32 %v5100_v6, %v1553_v3 }
 0x342   : > { %v5117_v8 = vpop.f32.mrb[4].mxu0 }
 0x343   : > { %v5118_v9 = vpop.f32.mrb[5].mxu0 }
 0x344   : > { %v5119_v10 = vadd.f32 %v5118_v9, %v5117_v8  ;;  %v5120_v11 = vpop.f32.mrb[6].mxu0 }
 0x345   : > { %v5121_v12 = vpop.f32.mrb[7].mxu0 }
 0x346   : > { %v5122_v13 = vadd.f32 %v5121_v12, %v5120_v11  ;;  %v1632_v14 = vadd.f32 %v5119_v10, %v1591_v5 }
 0x348   : > { %v1635_v15 = vadd.f32 %v5122_v13, %v1594_v7 }
 0x34a   : > { %v1643_v16 = vsel %vm1642_vm0, %v1635_v15, 0.0 }
 0x34b   : > { %1644 = vadd.xlane.f32.xlu0 %v1643_v16 }
 0x34f   : > { %1640 = vadd.xlane.f32.xlu0 %v1632_v14 }
 0x3d8   : > { %v1645_v17 = vpop.xlane.xlu0 %1644 }
 0x3d9   : > { %v1648_v18 = vmul.f32 0.0078125, %v1645_v17 }
 0x3db   : > { %v1650_v21 = vsub.f32 %v1635_v15, %v1648_v18 }
 0x3dc   : > { %v1641_v19 = vpop.xlane.xlu0 %1640 }
 0x3dd   : > { %v1647_v20 = vmul.f32 0.0078125, %v1641_v19  ;;  %v1652_v24 = vmul.f32 %v1650_v21, %v1650_v21 }
 0x3df   : > { %v1649_v22 = vsub.f32 %v1632_v14, %v1647_v20  ;;  %v1655_v25 = vsel %vm1642_vm0, %v1652_v24, 0.0 }
 0x3e1   : > { %v1651_v23 = vmul.f32 %v1649_v22, %v1649_v22 }
 0x3e3   : > { %1653 = vadd.xlane.f32.xlu1 %v1651_v23 }
 0x3e7   : > { %1656 = vadd.xlane.f32.xlu1 %v1655_v25 }
 0x470   : > { %v1654_v26 = vpop.xlane.xlu1 %1653 }
 0x471   : > { %v1658_v27 = vmul.f32 0.0078125, %v1654_v26 }
 0x473   : > { %v1660_v28 = vadd.f32 1e-05, %v1658_v27 }
 0x474   : > { %v1657_v29 = vpop.xlane.xlu1 %1656 }
 0x475   : > { %5736 = vrsqrt.f32 %v1660_v28  ;;  %v1659_v30 = vmul.f32 0.0078125, %v1657_v29 }
 0x477   : > { %v1661_v31 = vadd.f32 1e-05, %v1659_v30 }
 0x479   : > { %5738 = vrsqrt.f32 %v1661_v31 }
 0x47f   : > { %v5737_v32 = vpop.eup %5736 }
 0x480   : > { %v1664_v34 = vmul.f32 %v5737_v32, %v1649_v22 }
 0x482   : > { %v1672_v36 = vmul.f32 %v4885_v33, %v1664_v34 }
 0x483   : > { %v5739_v37 = vpop.eup %5738 }
 0x484   : > { %v1680_v38 = vadd.f32 %v4886_v35, %v1672_v36  ;;  %v1665_v39 = vmul.f32 %v5739_v37, %v1650_v21 }
 0x486   : > { %1682 = vst [vmem:[#allocation2] sm:$0xff] %v1680_v38  ;;  %v1673_v40 = vmul.f32 %v4885_v33, %v1665_v39 }
 0x488   : > { %v1681_v41 = vadd.f32 %v4886_v35, %v1673_v40 }
 0x48a   : > { %1683 = vst [vmem:[#allocation2 + $0x8] sm:$0x3] %v1681_v41 }
 0x48b PF: > { %vm1690_vm1 = vcmask 1041408   ;;  %v5740_v45 = vld [vmem:[%s7263_s19 + $0x4] ss:$12 sps:$4 sm:$0xff]   ;;  %v5742_v46 = vld [vmem:[%s7263_s19] ss:$12 sps:$4 sm:$0xff]   ;;  %v6597_v47 = vmov 0.0   ;;  %v1765_v33 = vlaneseq }
 0x48c   : > { %5250 = vmatprep.subr.bf16.mxu1 %v6597_v47  ;;  %v5743_v48 = vld [vmem:[%s7263_s19 + $0x8] ss:$12 sps:$4 sm:$0xff]   ;;  %1908 = vmatprep.subr.bf16.mxu0 %v5740_v45  ;;  %v5746_v59 = vld [vmem:[%s7263_s19 + $0x18] ss:$12 sps:$4 sm:$0xff]   ;;  %v5747_v60 = vld [vmem:[%s7263_s19 + $0x20] ss:$12 sps:$4 sm:$0xff]  }
 0x48d   : > { %v1684_v44 = vld [vmem:[#allocation2] sm:$0xff]  ;;  %1909 = vmatpush1.bf16.msra.mxu0 %v5742_v46  ;;  %5251 = vmatpush3.bf16.msra.mxu1 %v5743_v48  ;;  %v5748_v61 = vld [vmem:[%s7263_s19 + $0x34] ss:$12 sps:$4 sm:$0xff]   ;;  %v5751_v63 = vld [vmem:[%s7263_s19 + $0x38] ss:$12 sps:$4 sm:$0xff]   ;;  %v6598_v10 = vmov 0  }
 0x48e   : > { %v5744_v49 = vld [vmem:[%s7263_s19 + $0x1c] ss:$12 sps:$4 sm:$0xff]   ;;  %5252 = vmatprep.subr.bf16.mxu1 %v6597_v47  ;;  %v5752_v0 = vld [vmem:[%s7263_s19 + $0x4c] ss:$12 sps:$4 sm:$0xff]   ;;  %v5756_v3 = vld [vmem:[%s7263_s19 + $0x64] ss:$12 sps:$4 sm:$0xff]   ;;  %1940 = vmatprep.mubr.bf16.mxu0 %v6598_v10 }
 0x48f   : > { %1910 = vmatprep.subr.bf16.mxu0 %v5744_v49  ;;  %v5750_v62 = vld [vmem:[%s7263_s19 + $0x30] ss:$12 sps:$4 sm:$0xff]   ;;  %v5754_v1 = vld [vmem:[%s7263_s19 + $0x48] ss:$12 sps:$4 sm:$0xff]   ;;  %v5758_v4 = vld [vmem:[%s7263_s19 + $0x60] ss:$12 sps:$4 sm:$0xff]  }
 0x490   : > { %v5755_v2 = vld [vmem:[%s7263_s19 + $0x50] ss:$12 sps:$4 sm:$0xff]   ;;  %v5759_v5 = vld [vmem:[%s7263_s19 + $0x68] ss:$12 sps:$4 sm:$0xff]   ;;  %v5762_v7 = vld [vmem:[%s7263_s19 + $0x78] ss:$12 sps:$4 sm:$0xff]  }
 0x491   : > { %v1685_v42 = vld [vmem:[#allocation2 + $0x8] sm:$0x3]  ;;  %1911 = vmatpush1.bf16.msra.mxu0 %v5746_v59  ;;  %5253 = vmatpush3.bf16.msra.mxu1 %v5747_v60  ;;  %v5760_v6 = vld [vmem:[%s7263_s19 + $0x7c] ss:$12 sps:$4 sm:$0xff]   ;;  %v5763_v8 = vld [vmem:[%s7263_s19 + $0x80] ss:$12 sps:$4 sm:$0xff]  }
 0x492   : > { %v1691_v43 = vsel %vm1690_vm1, %v1685_v42, 0.0  ;;  %5254 = vmatprep.subr.bf16.mxu1 %v6597_v47  ;;  %1912 = vmatprep.subr.bf16.mxu0 %v5748_v61  ;;  %v5764_v9 = vld [vmem:[%s7263_s19 + $0x94] ss:$12 sps:$4 sm:$0xff]   ;;  %vm6599_vm2 = vmmov 0   ;;  %v5766_v11 = vld [vmem:[%s7263_s19 + $0x90] ss:$12 sps:$4 sm:$0xff]  }
 0x493   : > { %1692 = vadd.xlane.f32.xlu0 %v1691_v43  ;;  %5266 = vmatprep.mubr.msk.bf16.mxu1 %vm6599_vm2, %v6597_v47  ;;  %v5767_v12 = vld [vmem:[%s7263_s19 + $0x98] ss:$12 sps:$4 sm:$0xff]   ;;  %v5770_v14 = vld [vmem:[%s7263_s19 + $0xa8] ss:$12 sps:$4 sm:$0xff]   ;;  %v5771_v15 = vld [vmem:[%s7263_s19 + $0xb0] ss:$12 sps:$4 sm:$0xff]  }
 0x494   : > { %v5768_v13 = vld [vmem:[%s7263_s19 + $0xac] ss:$12 sps:$4 sm:$0xff]   ;;  %v4887_v24 = vld [vmem:[%s891_s8] ss:$0 sm:$0xff]  ;;  %v7353_v34 = vshrl.u32 %v1765_v33, 7  ;;  %vm1996_vm3 = vcmask 261120  }
 0x495   : > { %1913 = vmatpush1.bf16.msra.mxu0 %v5750_v62  ;;  %5255 = vmatpush3.bf16.msra.mxu1 %v5751_v63  ;;  %v4888_v28 = vld [vmem:[%s899_s6] ss:$0 sm:$0xff]  ;;  %vm2060_vm4 = vcmask 1042432   ;;  %v6600_v62 = vmov 65535   ;;  %vm2043_vm5 = vcmask 36864   ;;  %s6601_s8 = smov 96  }
 0x496   : > { %5256 = vmatprep.subr.bf16.mxu1 %v6597_v47  ;;  %1914 = vmatprep.subr.bf16.mxu0 %v5752_v0  ;;  %v1771_v35 = vsub.s32 1, %v7353_v34  ;;  %v1763_v36 = vld [vmem:[%s7290_s20] sm:$0x7]  ;;  %v1767_v37 = vsub.s32 0, %v7353_v34  ;;  %v1775_v38 = vsub.s32 2, %v7353_v34  ;;  %v2061_v63 = vsel %vm1690_vm1, 4294967295, %v6600_v62 }
 0x497   : > { %1688 = vadd.xlane.f32.xlu0 %v1684_v44  ;;  %vm2056_vm6 = vcmask 39936   ;;  %s6602_s24 = smov 64   ;;  %v5775_v62 = vld [vmem:[%s7265_s30 + $0x18] sm:$0xff]   ;;  %s6603_s26 = smov 32  }
 0x498   : > { %v1772_v39 = vrot.slane %v1763_v36, %v1771_v35  ;;  %v1768_v40 = vrot.slane %v1763_v36, %v1767_v37  ;;  %v1776_v41 = vrot.slane %v1763_v36, %v1775_v38  ;;  %s7977_s3 = sld [smem:[#allocation34_spill]] }
 0x499   : > { %1915 = vmatpush1.bf16.msra.mxu0 %v5754_v1  ;;  %5257 = vmatpush3.bf16.msra.mxu1 %v5755_v2  ;;  %v7379_v1 = vsel %vm2060_vm4, %v2061_v63, 0 }
 0x49a   : > { %5258 = vmatprep.subr.bf16.mxu1 %v6597_v47  ;;  %1916 = vmatprep.subr.bf16.mxu0 %v5756_v3 }
 0x49d   : > { %1917 = vmatpush1.bf16.msra.mxu0 %v5758_v4  ;;  %5259 = vmatpush3.bf16.msra.mxu1 %v5759_v5 }
 0x49e   : > { %1918 = vmatprep.subr.bf16.mxu0 %v5760_v6  ;;  %5260 = vmatprep.subr.bf16.mxu1 %v6597_v47  ;;  %p5030_p1 = scmp.ne.s32.totalorder %s7977_s3, 1 }
 0x49f   : > { %vm4316_vm7 = vcmask (!%p5030_p1), 1045509   ;;  %vm4178_vm8 = vcmask (!%p5030_p1), 1040384   ;;  %vm6605_vm9 = vmmov (!%p5030_p1), 0  }
 0x4a1   : > { %1919 = vmatpush1.bf16.msra.mxu0 %v5762_v7  ;;  %5261 = vmatpush3.bf16.msra.mxu1 %v5763_v8 }
 0x4a2   : > { %1920 = vmatprep.subr.bf16.mxu0 %v5764_v9  ;;  %5262 = vmatprep.subr.bf16.mxu1 %v6597_v47 }
 0x4a5   : > { %1921 = vmatpush1.bf16.msra.mxu0 %v5766_v11  ;;  %5263 = vmatpush3.bf16.msra.mxu1 %v5767_v12 }
 0x4a6   : > { %1922 = vmatprep.subr.bf16.mxu0 %v5768_v13  ;;  %5264 = vmatprep.subr.bf16.mxu1 %v6597_v47 }
 0x4a9   : > { %1923 = vmatpush1.bf16.msra.mxu0 %v5770_v14  ;;  %5265 = vmatpush3.bf16.msra.mxu1 %v5771_v15  ;;  %v5772_v15 = vld [vmem:[%s7265_s30] sm:$0xff]  }
 0x4aa   : > { %5270 = vmatprep.subr.bf16.mxu1 %v6597_v47  ;;  %5282 = vmatprep.subr.bf16.mxu0 %v6597_v47 }
 0x520   : > { %v1693_v50 = vpop.xlane.xlu0 %1692 }
 0x521   : > { %v1696_v51 = vmul.f32 0.0078125, %v1693_v50 }
 0x523   : > { %v7303_v54 = vsub.f32 %v1685_v42, %v1696_v51 }
 0x524   : > { %v1689_v52 = vpop.xlane.xlu0 %1688 }
 0x525   : > { %v1695_v53 = vmul.f32 0.0078125, %v1689_v52  ;;  %v1700_v57 = vmul.f32 %v7303_v54, %v7303_v54 }
 0x527   : > { %v7305_v55 = vsub.f32 %v1684_v44, %v1695_v53  ;;  %v1703_v58 = vsel %vm1690_vm1, %v1700_v57, 0.0 }
 0x529   : > { %v1699_v56 = vmul.f32 %v7305_v55, %v7305_v55 }
 0x52b   : > { %1701 = vadd.xlane.f32.xlu1 %v1699_v56 }
 0x52f   : > { %1704 = vadd.xlane.f32.xlu1 %v1703_v58 }
 0x5b8   : > { %v1702_v16 = vpop.xlane.xlu1 %1701 }
 0x5b9   : > { %v1706_v17 = vmul.f32 0.0078125, %v1702_v16 }
 0x5bb   : > { %v1708_v18 = vadd.f32 1e-05, %v1706_v17 }
 0x5bc   : > { %v1705_v19 = vpop.xlane.xlu1 %1704 }
 0x5bd   : > { %5868 = vrsqrt.f32 %v1708_v18  ;;  %v1707_v20 = vmul.f32 0.0078125, %v1705_v19 }
 0x5bf   : > { %v1709_v21 = vadd.f32 1e-05, %v1707_v20 }
 0x5c1   : > { %5870 = vrsqrt.f32 %v1709_v21 }
 0x5c7   : > { %v5869_v22 = vpop.eup %5868 }
 0x5c8   : > { %v1712_v23 = vmul.f32 %v5869_v22, %v7305_v55 }
 0x5ca   : > { %v1720_v27 = vmul.f32 %v4887_v24, %v1712_v23  ;;  %v5773_v23 = vld [vmem:[%s7265_s30 + $0x8] sm:$0xff]  }
 0x5cb   : > { %v5871_v25 = vpop.eup %5870 }
 0x5cc   : > { %v1713_v26 = vmul.f32 %v5871_v25, %v7303_v54  ;;  %v1728_v30 = vadd.f32 %v4888_v28, %v1720_v27 }
 0x5ce   : > { %v1721_v29 = vmul.f32 %v4887_v24, %v1713_v26 }
 0x5d0   : > { %v1729_v31 = vadd.f32 %v4888_v28, %v1721_v29 }
 0x5d2   : > { %v1730_v32 = vpack.c.bf16 %v1729_v31, %v1728_v30 }
 0x5d4   : > { %1941 = vmatmul.mubr.bf16.vlgmr.msra.gmra.mrb[0].mxu0 %v1730_v32  ;;  %5267 = vmatmul.mubr.bf16.vlgmr.msra.gmra.mrb[0].mxu1 %v1730_v32 }
 0x5d5   : > { %5272 = vmatprep.mubr.msk.bf16.mxu1 %vm6599_vm2, %v6597_v47  ;;  %5286 = vmatprep.mubr.msk.bf16.mxu0 %vm6599_vm2, %v6597_v47 }
 0x5d6   : > { %5283 = vmatpush3.bf16.msra.mxu0 %v5772_v15 }
 0x5d7   : > { %5284 = vmatprep.subr.bf16.mxu0 %v6597_v47 }
 0x5da   : > { %5285 = vmatpush3.bf16.msra.mxu0 %v5773_v23 }
 0x5db   : > { %5296 = vmatprep.subr.bf16.mxu0 %v6597_v47 }
 0x6a7   : > { %v1942_v42 = vpop.f32.mrb[0].mxu0  ;;  %v1985_v43 = vpop.f32.mrb[0].mxu1 }
 0x6a8   : > { %v1944_v44 = vpop.f32.mrb[1].mxu0  ;;  %v5268_v45 = vpop.f32.mrb[1].mxu1  ;;  %v1943_v50 = vadd.f32 %v1942_v42, %v1768_v40  ;;  %v1986_v51 = vadd.f32 %v1985_v43, %v1776_v41  ;;  %v5774_v43 = vld [vmem:[%s7265_s30 + $0x10] sm:$0xff]  }
 0x6a9   : > { %v1945_v46 = vadd.f32 %v1944_v44, %v1772_v39  ;;  %v1946_v48 = vpop.f32.mrb[2].mxu0  ;;  %v1988_v49 = vpop.f32.mrb[2].mxu1 }
 0x6aa   : > { %v1947_v52 = vadd.f32 %v1946_v48, %v1768_v40  ;;  %v1989_v53 = vadd.f32 %v1988_v49, %v1776_v41  ;;  %v1948_v54 = vpop.f32.mrb[3].mxu0  ;;  %v5269_v55 = vpop.f32.mrb[3].mxu1  ;;  %v7377_v0 = vpack.c.bf16 %v1986_v51, %v1986_v51  ;;  %v7381_v2 = vpack.c.bf16 %v1943_v50, %v1943_v50 }
 0x6ab   : > { %v7365_v56 = vpack.c.bf16 %v1945_v46, %v1945_v46  ;;  %v1949_v57 = vadd.f32 %v1948_v54, %v1772_v39 }
 0x6ac   : > { %v7367_v58 = vpack.c.bf16 %v1947_v52, %v1943_v50  ;;  %v7369_v59 = vpack.c.bf16 %v1989_v53, %v1986_v51  ;;  %v2064_v3 = vand.u32 %v7379_v1, %v7377_v0 }
 0x6ad   : > { %v7371_v60 = vpack.c.bf16 %v1949_v57, %v1945_v46  ;;  %v2001_v61 = vsel %vm1996_vm3, %v7365_v56, 0 }
 0x6ae   : > { %5271 = vmatpush3.bf16.xpose.msra.mxu1 %v2001_v61 }
 0x6af   : > { %5276 = vmatprep.subr.bf16.mxu1 %v6597_v47 }
 0x6b5   : > { %5273 = vmatmul.mubr.msk.bf16.vlgmr.msra.gmra.mrb[4].mxu1 %vm1996_vm3, %v7381_v2 }
 0x6b6   : > { %5277 = vmatpush3.bf16.msra.mxu1 %v2064_v3  ;;  %5278 = vmatprep.mubr.msk.bf16.mxu1 %vm6599_vm2, %v6597_v47 }
 0x6b7   : > { %5290 = vmatprep.subr.bf16.mxu1 %v6597_v47 }
 0x788   : > { %v2037_v4 = vpop.f32.mrb[4].mxu1 }
 0x789   : > { %v5274_v5 = vpop.f32.mrb[5].mxu1  ;;  %v2044_v6 = vsel %vm2043_vm5, %v2037_v4, -inf }
 0x78a   : > { %2045 = vmax.xlane.f32.xlu0 %v2044_v6  ;;  %v2040_v7 = vpop.f32.mrb[6].mxu1 }
 0x78b   : > { %v5275_v8 = vpop.f32.mrb[7].mxu1 }
 0x7a0   : > { %2177 = vrot.lane.b32.xlu0 %v7365_v56, %s6601_s8 }
 0x817   : > { %v2046_v9 = vpop.xlane.xlu0 %2045 }
 0x818   : > { %v2047_v11 = vsub.f32 %v2037_v4, %v2046_v9 }
 0x81a   : > { %v2048_v12 = vmul.f32 1.442695, %v2047_v11 }
 0x81b   : > { %v2178_v19 = vpop.permute.xlu0 %2177 }
 0x81c   : > { %5872 = vpow2.f32 %v2048_v12  ;;  %v2183_v21 = vsel %vm1996_vm3, %v2178_v19, 0 }
 0x826   : > { %v5873_v13 = vpop.eup %5872 }
 0x827   : > { %v2050_v14 = vsel %vm2043_vm5, %v5873_v13, 0.0 }
 0x828   : > { %2051 = vadd.xlane.f32.xlu1 %v2050_v14 }
 0x839   : > { %2174 = vrot.lane.b32.xlu1 %v7381_v2, %s6601_s8 }
 0x8b5   : > { %v2052_v16 = vpop.xlane.xlu1 %2051 }
 0x8b6   : > { %5874 = vrcp.f32 %v2052_v16 }
 0x8b9   : > { %v2175_v22 = vpop.permute.xlu1 %2174 }
 0x8c0   : > { %v5875_v17 = vpop.eup %5874 }
 0x8c1   : > { %v2054_v18 = vmul.f32 %v5875_v17, %v5873_v13 }
 0x8c3   : > { %v2055_v20 = vpack.c.bf16 %v2054_v18, %v2054_v18  ;;  %v5776_v18 = vld [vmem:[%s7265_s30 + $0x20] sm:$0xff]  }
 0x8c5   : > { %5279 = vmatmul.mubr.msk.bf16.vlgmr.msra.gmra.mrb[8].mxu1 %vm2056_vm6, %v2055_v20 }
 0x8c6   : > { %5291 = vmatpush3.bf16.xpose.msra.mxu1 %v2183_v21  ;;  %5292 = vmatprep.mubr.msk.bf16.mxu1 %vm6599_vm2, %v6597_v47 }
 0x8c7   : > { %5302 = vmatprep.subr.bf16.mxu1 %v6597_v47 }
 0x8cd   : > { %5293 = vmatmul.mubr.msk.bf16.vlgmr.msra.gmra.mrb[12].mxu1 %vm1996_vm3, %v2175_v22 }
 0x8ce   : > { %5306 = vmatprep.mubr.msk.bf16.mxu1 %vm6599_vm2, %v6597_v47  ;;  %5303 = vmatpush3.bf16.msra.mxu1 %v5774_v43 }
 0x8cf   : > { %5304 = vmatprep.subr.bf16.mxu1 %v6597_v47 }
 0x8d2   : > { %5305 = vmatpush3.bf16.msra.mxu1 %v5775_v62 }
 0x8d3   : > { %5316 = vmatprep.subr.bf16.mxu1 %v6597_v47 }
 0x998   : > { %v2100_v24 = vpop.f32.mrb[8].mxu1 }
 0x999   : > { %v2106_v25 = vpack.c.bf16 %v2100_v24, %v2100_v24  ;;  %v5280_v26 = vpop.f32.mrb[9].mxu1 }
 0x99a   : > { %v2103_v27 = vpop.f32.mrb[10].mxu1 }
 0x99b   : > { %v5281_v28 = vpop.f32.mrb[11].mxu1  ;;  %5287 = vmatmul.mubr.msk.bf16.vlgmr.msra.gmra.mrb[4].mxu0 %vm1996_vm3, %v2106_v25 }
 0x99c   : > { %5298 = vmatprep.mubr.msk.bf16.mxu0 %vm6599_vm2, %v6597_v47 }
 0x9a0   : > { %v2219_v29 = vpop.f32.mrb[12].mxu1 }
 0x9a1   : > { %v5294_v30 = vpop.f32.mrb[13].mxu1  ;;  %v2225_v31 = vsel %vm2043_vm5, %v2219_v29, -inf }
 0x9a2   : > { %2226 = vmax.xlane.f32.xlu1 %v2225_v31  ;;  %v2222_v32 = vpop.f32.mrb[14].mxu1 }
 0x9a3   : > { %v5295_v33 = vpop.f32.mrb[15].mxu1 }
 0x9a4   : > { %v5777_v33 = vld [vmem:[%s7265_s30 + $0x28] sm:$0xff]  }
 0x9b3   : > { %2349 = vrot.lane.b32.xlu1 %v7365_v56, %s6602_s24 }
 0x9b7   : > { %2347 = vrot.lane.b32.xlu1 %v7381_v2, %s6602_s24 }
 0xa2f   : > { %v2227_v36 = vpop.xlane.xlu1 %2226 }
 0xa30   : > { %v2228_v39 = vsub.f32 %v2219_v29, %v2227_v36 }
 0xa32   : > { %v2229_v40 = vmul.f32 1.442695, %v2228_v39 }
 0xa33   : > { %v2350_v54 = vpop.permute.xlu1 %2349 }
 0xa34   : > { %5876 = vpow2.f32 %v2229_v40  ;;  %v2355_v57 = vsel %vm1996_vm3, %v2350_v54, 0  ;;  %v2707_v54 = vshll.u32 %v7371_v60, 16 }
 0xa37   : > { %v2348_v61 = vpop.permute.xlu1 %2347 }
 0xa3e   : > { %v5877_v41 = vpop.eup %5876 }
 0xa3f   : > { %v2231_v42 = vsel %vm2043_vm5, %v5877_v41, 0.0 }
 0xa40   : > { %2232 = vadd.xlane.f32.xlu0 %v2231_v42 }
 0xa56   : > { %2238 = vrot.lane.b32.xlu0 %v7377_v0, %s6601_s8 }
 0xa6e   : > { %v2160_v44 = vpop.f32.mrb[4].mxu0 }
 0xa6f   : > { %v5288_v45 = vpop.f32.mrb[5].mxu0 }
 0xa70   : > { %v2163_v46 = vpop.f32.mrb[6].mxu0 }
 0xa71   : > { %v5289_v48 = vpop.f32.mrb[7].mxu0 }
 0xacd   : > { %v2233_v49 = vpop.xlane.xlu0 %2232 }
 0xace   : > { %5878 = vrcp.f32 %v2233_v49  ;;  %v2696_v49 = vshrl.u32 %v7367_v58, 16 }
 0xad1   : > { %v2239_v50 = vpop.permute.xlu0 %2238 }
 0xad2   : > { %v2244_v51 = vand.u32 %v2239_v50, %v7379_v1  ;;  %v2699_v50 = vshll.u32 %v7367_v58, 16 }
 0xad4   : > { %5297 = vmatpush3.bf16.msra.mxu0 %v2244_v51  ;;  %v2698_v51 = vrot.slane %v2696_v49, 2 }
 0xad5   : > { %5310 = vmatprep.subr.bf16.mxu0 %v6597_v47 }
 0xad8   : > { %v5879_v52 = vpop.eup %5878 }
 0xad9   : > { %v2235_v53 = vmul.f32 %v5879_v52, %v5877_v41  ;;  %v2701_v52 = vrot.slane %v2699_v50, 3 }
 0xadb   : > { %v2236_v55 = vpack.c.bf16 %v2235_v53, %v2235_v53  ;;  %v2704_v53 = vshrl.u32 %v7371_v60, 16 }
 0xadd   : > { %5299 = vmatmul.mubr.msk.bf16.vlgmr.msra.gmra.mrb[8].mxu0 %vm2056_vm6, %v2236_v55  ;;  %v7475_v55 = vor.u32 %v2701_v52, %v2698_v51 }
 0xade   : > { %5311 = vmatpush3.bf16.xpose.msra.mxu0 %v2355_v57  ;;  %5312 = vmatprep.mubr.msk.bf16.mxu0 %vm6599_vm2, %v6597_v47  ;;  %v2706_v57 = vrot.slane %v2704_v53, 2 }
 0xadf   : > { %5322 = vmatprep.subr.bf16.mxu0 %v6597_v47 }
 0xae5   : > { %5313 = vmatmul.mubr.msk.bf16.vlgmr.msra.gmra.mrb[12].mxu0 %vm1996_vm3, %v2348_v61  ;;  %v2709_v61 = vrot.slane %v2707_v54, 3 }
 0xae6   : > { %5326 = vmatprep.mubr.msk.bf16.mxu0 %vm6599_vm2, %v6597_v47  ;;  %5323 = vmatpush3.bf16.msra.mxu0 %v5776_v18 }
 0xae7   : > { %5324 = vmatprep.subr.bf16.mxu0 %v6597_v47  ;;  %v7479_v62 = vor.u32 %v2709_v61, %v2706_v57 }
 0xae9   : > { %v2715_v18 = vsel %vm1996_vm3, %v7479_v62, 0 }
 0xaea   : > { %5325 = vmatpush3.bf16.msra.mxu0 %v5777_v33 }
 0xaeb   : > { %5336 = vmatprep.subr.bf16.mxu0 %v6597_v47 }
 0xbb0   : > { %v2280_v63 = vpop.f32.mrb[8].mxu0 }
 0xbb1   : > { %v2286_v3 = vpack.c.bf16 %v2280_v63, %v2280_v63  ;;  %v5300_v4 = vpop.f32.mrb[9].mxu0 }
 0xbb2   : > { %v2283_v5 = vpop.f32.mrb[10].mxu0 }
 0xbb3   : > { %v5301_v6 = vpop.f32.mrb[11].mxu0  ;;  %5307 = vmatmul.mubr.msk.bf16.vlgmr.msra.gmra.mrb[16].mxu1 %vm1996_vm3, %v2286_v3 }
 0xbb4   : > { %5318 = vmatprep.mubr.msk.bf16.mxu1 %vm6599_vm2, %v6597_v47  ;;  %v5778_v6 = vld [vmem:[%s7265_s30 + $0x30] sm:$0xff]  }
 0xbb8   : > { %v2391_v7 = vpop.f32.mrb[12].mxu0 }
 0xbb9   : > { %v5314_v8 = vpop.f32.mrb[13].mxu0  ;;  %v2397_v9 = vsel %vm2043_vm5, %v2391_v7, -inf }
 0xbba   : > { %2398 = vmax.xlane.f32.xlu1 %v2397_v9  ;;  %v2394_v11 = vpop.f32.mrb[14].mxu0 }
 0xbbb   : > { %v5315_v12 = vpop.f32.mrb[15].mxu0 }
 0xbcb   : > { %2520 = vrot.lane.b32.xlu1 %v7365_v56, %s6603_s26  ;;  %v7448_v56 = vld [vmem:[%s925_s18] ss:$0 sm:$0xff] }
 0xbcf   : > { %2518 = vrot.lane.b32.xlu1 %v7381_v2, %s6603_s26  ;;  %v2172_v2 = vadd.f32 %v7448_v56, %v2160_v44 }
 0xc47   : > { %v2399_v13 = vpop.xlane.xlu1 %2398 }
 0xc48   : > { %v2400_v14 = vsub.f32 %v2391_v7, %v2399_v13  ;;  %v5779_v7 = vld [vmem:[%s7265_s30 + $0x38] sm:$0xff]  }
 0xc4a   : > { %v2401_v15 = vmul.f32 1.442695, %v2400_v14 }
 0xc4b   : > { %v2521_v29 = vpop.permute.xlu1 %2520 }
 0xc4c   : > { %5880 = vpow2.f32 %v2401_v15  ;;  %v2526_v31 = vsel %vm1996_vm3, %v2521_v29, 0 }
 0xc4f   : > { %v2519_v32 = vpop.permute.xlu1 %2518 }
 0xc56   : > { %v5881_v16 = vpop.eup %5880 }
 0xc57   : > { %v2403_v17 = vsel %vm2043_vm5, %v5881_v16, 0.0 }
 0xc58   : > { %2404 = vadd.xlane.f32.xlu0 %v2403_v17 }
 0xc6e   : > { %2409 = vrot.lane.b32.xlu0 %v7377_v0, %s6602_s24 }
 0xc86   : > { %v2340_v19 = vpop.f32.mrb[16].mxu1 }
 0xc87   : > { %v7451_v20 = vadd.f32 %v2340_v19, %v2172_v2  ;;  %v5308_v21 = vpop.f32.mrb[17].mxu1  ;;  %v2770_v2 = vshrl.u32 %v7369_v59, 16  ;;  %v2773_v19 = vshll.u32 %v7369_v59, 16 }
 0xc88   : > { %v2343_v22 = vpop.f32.mrb[18].mxu1 }
 0xc89   : > { %v5309_v23 = vpop.f32.mrb[19].mxu1  ;;  %v2775_v21 = vrot.slane %v2773_v19, 3 }
 0xce5   : > { %v2405_v24 = vpop.xlane.xlu0 %2404 }
 0xce6   : > { %5882 = vrcp.f32 %v2405_v24 }
 0xce9   : > { %v2410_v25 = vpop.permute.xlu0 %2409 }
 0xcea   : > { %v2415_v26 = vand.u32 %v2410_v25, %v7379_v1 }
 0xcec   : > { %5317 = vmatpush3.bf16.msra.mxu1 %v2415_v26 }
 0xced   : > { %5330 = vmatprep.subr.bf16.mxu1 %v6597_v47 }
 0xcf0   : > { %v5883_v27 = vpop.eup %5882 }
 0xcf1   : > { %v2407_v28 = vmul.f32 %v5883_v27, %v5881_v16 }
 0xcf3   : > { %v2408_v30 = vpack.c.bf16 %v2407_v28, %v2407_v28 }
 0xcf5   : > { %5319 = vmatmul.mubr.msk.bf16.vlgmr.msra.gmra.mrb[20].mxu1 %vm2056_vm6, %v2408_v30 }
 0xcf6   : > { %5331 = vmatpush3.bf16.xpose.msra.mxu1 %v2526_v31  ;;  %5332 = vmatprep.mubr.msk.bf16.mxu1 %vm6599_vm2, %v6597_v47 }
 0xcf7   : > { %5342 = vmatprep.subr.bf16.mxu1 %v6597_v47 }
 0xcfd   : > { %5333 = vmatmul.mubr.msk.bf16.vlgmr.msra.gmra.mrb[24].mxu1 %vm1996_vm3, %v2519_v32 }
 0xcfe   : > { %5346 = vmatprep.mubr.msk.bf16.mxu1 %vm6599_vm2, %v6597_v47  ;;  %5343 = vmatpush3.bf16.msra.mxu1 %v5778_v6 }
 0xcff   : > { %5344 = vmatprep.subr.bf16.mxu1 %v6597_v47 }
 0xd02   : > { %5345 = vmatpush3.bf16.msra.mxu1 %v5779_v7 }
 0xd03   : > { %5356 = vmatprep.subr.bf16.mxu1 %v6597_v47 }
 0xdc8   : > { %v2451_v36 = vpop.f32.mrb[20].mxu1 }
 0xdc9   : > { %v2457_v39 = vpack.c.bf16 %v2451_v36, %v2451_v36  ;;  %v5320_v40 = vpop.f32.mrb[21].mxu1 }
 0xdca   : > { %v2454_v41 = vpop.f32.mrb[22].mxu1 }
 0xdcb   : > { %v5321_v42 = vpop.f32.mrb[23].mxu1  ;;  %5327 = vmatmul.mubr.msk.bf16.vlgmr.msra.gmra.mrb[16].mxu0 %vm1996_vm3, %v2457_v39 }
 0xdcc   : > { %5338 = vmatprep.mubr.msk.bf16.mxu0 %vm6599_vm2, %v6597_v47  ;;  %v5780_v42 = vld [vmem:[%s7265_s30] sm:$0xff]  }
 0xdd0   : > { %v2562_v43 = vpop.f32.mrb[24].mxu1 }
 0xdd1   : > { %v5334_v44 = vpop.f32.mrb[25].mxu1  ;;  %v2568_v45 = vsel %vm2043_vm5, %v2562_v43, -inf }
 0xdd2   : > { %2569 = vmax.xlane.f32.xlu0 %v2568_v45  ;;  %v2565_v46 = vpop.f32.mrb[26].mxu1 }
 0xdd3   : > { %v5335_v48 = vpop.f32.mrb[27].mxu1 }
 0xdd4   : > { %v7519_v48 = vld [vmem:[#allocation2] sm:$0xff] }
 0xde8   : > { %2580 = vrot.lane.b32.xlu0 %v7377_v0, %s6603_s26 }
 0xdec   : > { %2890 = vrot.lane.b32.xlu0 %v7475_v55, %s6601_s8 }
 0xdf0   : > { %3063 = vrot.lane.b32.xlu0 %v7479_v62, %s6602_s24 }
 0xdf4   : > { %3061 = vrot.lane.b32.xlu0 %v7475_v55, %s6602_s24 }
 0xe5f   : > { %v2570_v58 = vpop.xlane.xlu0 %2569 }
 0xe60   : > { %v2571_v60 = vsub.f32 %v2562_v43, %v2570_v58 }
 0xe62   : > { %v2572_v0 = vmul.f32 1.442695, %v2571_v60 }
 0xe63   : > { %v2581_v63 = vpop.permute.xlu0 %2580 }
 0xe64   : > { %5884 = vpow2.f32 %v2572_v0  ;;  %v2586_v3 = vand.u32 %v2581_v63, %v7379_v1 }
 0xe66   : > { %5337 = vmatpush3.bf16.msra.mxu0 %v2586_v3  ;;  %v5781_v3 = vld [vmem:[%s7265_s30 + $0x8] sm:$0xff]  }
 0xe67   : > { %5350 = vmatprep.subr.bf16.mxu0 %v6597_v47  ;;  %v2891_v61 = vpop.permute.xlu0 %2890 }
 0xe6b   : > { %v3064_v60 = vpop.permute.xlu0 %3063 }
 0xe6c   : > { %v3069_v0 = vsel %vm1996_vm3, %v3064_v60, 0  ;;  %v5783_v60 = vld [vmem:[%s7265_s30 + $0x18] sm:$0xff]  }
 0xe6e   : > { %v5885_v4 = vpop.eup %5884 }
 0xe6f   : > { %v2574_v5 = vsel %vm2043_vm5, %v5885_v4, 0.0  ;;  %v3062_v63 = vpop.permute.xlu0 %3061 }
 0xe70   : > { %2575 = vadd.xlane.f32.xlu1 %v2574_v5 }
 0xe9e   : > { %v2511_v8 = vpop.f32.mrb[16].mxu0 }
 0xe9f   : > { %v2517_v9 = vadd.f32 %v2511_v8, %v7451_v20  ;;  %v5328_v11 = vpop.f32.mrb[17].mxu0  ;;  %v2772_v20 = vrot.slane %v2770_v2, 2 }
 0xea0   : > { %v2514_v12 = vpop.f32.mrb[18].mxu0 }
 0xea1   : > { %v5329_v13 = vpop.f32.mrb[19].mxu0  ;;  %v7505_v22 = vor.u32 %v2775_v21, %v2772_v20 }
 0xea3   : > { %v2781_v27 = vand.u32 %v7505_v22, %v7379_v1 }
 0xefd   : > { %v2576_v14 = vpop.xlane.xlu1 %2575 }
 0xefe   : > { %5886 = vrcp.f32 %v2576_v14 }
 0xf08   : > { %v5887_v15 = vpop.eup %5886 }
 0xf09   : > { %v2578_v16 = vmul.f32 %v5887_v15, %v5885_v4 }
 0xf0b   : > { %v2579_v17 = vpack.c.bf16 %v2578_v16, %v2578_v16 }
 0xf0d   : > { %5339 = vmatmul.mubr.msk.bf16.vlgmr.msra.gmra.mrb[20].mxu0 %vm2056_vm6, %v2579_v17 }
 0xf0e   : > { %5351 = vmatpush3.bf16.xpose.msra.mxu0 %v2715_v18  ;;  %5352 = vmatprep.mubr.msk.bf16.mxu0 %vm6599_vm2, %v6597_v47 }
 0xf0f   : > { %5362 = vmatprep.subr.bf16.mxu0 %v6597_v47 }
 0xf15   : > { %5353 = vmatmul.mubr.msk.bf16.vlgmr.msra.gmra.mrb[24].mxu0 %vm1996_vm3, %v7475_v55 }
 0xf16   : > { %5366 = vmatprep.mubr.msk.bf16.mxu0 %vm6599_vm2, %v6597_v47  ;;  %5363 = vmatpush3.bf16.msra.mxu0 %v5780_v42 }
 0xf17   : > { %5364 = vmatprep.subr.bf16.mxu0 %v6597_v47 }
 0xf1a   : > { %5365 = vmatpush3.bf16.msra.mxu0 %v5781_v3 }
 0xf1b   : > { %5376 = vmatprep.subr.bf16.mxu0 %v6597_v47 }
 0xfe0   : > { %v2622_v23 = vpop.f32.mrb[20].mxu0 }
 0xfe1   : > { %v2628_v24 = vpack.c.bf16 %v2622_v23, %v2622_v23  ;;  %v5340_v25 = vpop.f32.mrb[21].mxu0 }
 0xfe2   : > { %v2625_v26 = vpop.f32.mrb[22].mxu0 }
 0xfe3   : > { %v5341_v28 = vpop.f32.mrb[23].mxu0  ;;  %5347 = vmatmul.mubr.msk.bf16.vlgmr.msra.gmra.mrb[28].mxu1 %vm1996_vm3, %v2628_v24 }
 0xfe4   : > { %5357 = vmatpush3.bf16.msra.mxu1 %v2781_v27  ;;  %5358 = vmatprep.mubr.msk.bf16.mxu1 %vm6599_vm2, %v6597_v47 }
 0xfe5   : > { %5370 = vmatprep.subr.bf16.mxu1 %v6597_v47 }
 0xfe8   : > { %v2751_v59 = vpop.f32.mrb[24].mxu0 }
 0xfe9   : > { %v5354_v29 = vpop.f32.mrb[25].mxu0  ;;  %v2757_v30 = vsel %vm2043_vm5, %v2751_v59, -inf }
 0xfea   : > { %2758 = vmax.xlane.f32.xlu1 %v2757_v30  ;;  %v2754_v31 = vpop.f32.mrb[26].mxu0 }
 0xfeb   : > { %v5355_v32 = vpop.f32.mrb[27].mxu0 }
0x1077   : > { %v2759_v33 = vpop.xlane.xlu1 %2758 }
0x1078   : > { %v2760_v36 = vsub.f32 %v2751_v59, %v2759_v33 }
0x107a   : > { %v2761_v39 = vmul.f32 1.442695, %v2760_v36 }
0x107c   : > { %5888 = vpow2.f32 %v2761_v39 }
0x1086   : > { %v5889_v40 = vpop.eup %5888 }
0x1087   : > { %v2763_v41 = vsel %vm2043_vm5, %v5889_v40, 0.0 }
0x1088   : > { %2764 = vadd.xlane.f32.xlu1 %v2763_v41 }
0x1099   : > { %2892 = vrot.lane.b32.xlu1 %v7479_v62, %s6601_s8 }
0x10b6   : > { %v2682_v43 = vpop.f32.mrb[28].mxu1 }
0x10b7   : > { %v2688_v44 = vadd.f32 %v2682_v43, %v2517_v9  ;;  %v5348_v45 = vpop.f32.mrb[29].mxu1 }
0x10b8   : > { %v2685_v46 = vpop.f32.mrb[30].mxu1 }
0x10b9   : > { %v2689_v49 = vadd.f32 %v7519_v48, %v2688_v44  ;;  %v5349_v50 = vpop.f32.mrb[31].mxu1 }
0x10bb   : > { %2690 = vst [vmem:[#allocation2] sm:$0x1f] %v2689_v49 }
0x1115   : > { %v2765_v51 = vpop.xlane.xlu1 %2764 }
0x1116   : > { %5890 = vrcp.f32 %v2765_v51 }
0x1119   : > { %v2893_v54 = vpop.permute.xlu1 %2892 }
0x111a   : > { %v2898_v58 = vsel %vm1996_vm3, %v2893_v54, 0 }
0x1120   : > { %v5891_v52 = vpop.eup %5890 }
0x1121   : > { %v2767_v53 = vmul.f32 %v5891_v52, %v5889_v40 }
0x1123   : > { %v2768_v57 = vpack.c.bf16 %v2767_v53, %v2767_v53 }
0x1125   : > { %5359 = vmatmul.mubr.msk.bf16.vlgmr.msra.gmra.mrb[32].mxu1 %vm2056_vm6, %v2768_v57 }
0x1126   : > { %5371 = vmatpush3.bf16.xpose.msra.mxu1 %v2898_v58  ;;  %5372 = vmatprep.mubr.msk.bf16.mxu1 %vm6599_vm2, %v6597_v47  ;;  %v5782_v58 = vld [vmem:[%s7265_s30 + $0x10] sm:$0xff]  }
0x1127   : > { %5390 = vmatprep.subr.bf16.mxu1 %v6597_v47 }
0x112d   : > { %5373 = vmatmul.mubr.msk.bf16.vlgmr.msra.gmra.mrb[36].mxu1 %vm1996_vm3, %v2891_v61 }
0x112e   : > { %5391 = vmatpush3.bf16.xpose.msra.mxu1 %v3069_v0  ;;  %5392 = vmatprep.mubr.msk.bf16.mxu1 %vm6599_vm2, %v6597_v47 }
0x112f   : > { %5396 = vmatprep.subr.bf16.mxu1 %v6597_v47 }
0x1135   : > { %5393 = vmatmul.mubr.msk.bf16.vlgmr.msra.gmra.mrb[40].mxu1 %vm1996_vm3, %v3062_v63 }
0x1136   : > { %5398 = vmatprep.mubr.msk.bf16.mxu1 %vm6599_vm2, %v6597_v47 }
0x11f8   : > { %v2817_v4 = vpop.f32.mrb[32].mxu1 }
0x11f9   : > { %v2823_v5 = vpack.c.bf16 %v2817_v4, %v2817_v4  ;;  %v5360_v6 = vpop.f32.mrb[33].mxu1 }
0x11fa   : > { %v2820_v7 = vpop.f32.mrb[34].mxu1 }
0x11fb   : > { %v5361_v8 = vpop.f32.mrb[35].mxu1  ;;  %5367 = vmatmul.mubr.msk.bf16.vlgmr.msra.gmra.mrb[28].mxu0 %vm1996_vm3, %v2823_v5  ;;  %v5784_v7 = vld [vmem:[%s7265_s30 + $0x20] sm:$0xff]  }
0x11fc   : > { %5378 = vmatprep.mubr.msk.bf16.mxu0 %vm6599_vm2, %v6597_v47 }
0x1200   : > { %v2934_v9 = vpop.f32.mrb[36].mxu1 }
0x1201   : > { %v5374_v11 = vpop.f32.mrb[37].mxu1  ;;  %v2940_v24 = vsel %vm2043_vm5, %v2934_v9, -inf }
0x1202   : > { %v2937_v12 = vpop.f32.mrb[38].mxu1 }
0x1203   : > { %v5375_v13 = vpop.f32.mrb[39].mxu1 }
0x1204   : > { %v5785_v13 = vld [vmem:[%s7265_s30 + $0x28] sm:$0xff]  }
0x1208   : > { %v3105_v14 = vpop.f32.mrb[40].mxu1 }
0x1209   : > { %v5394_v15 = vpop.f32.mrb[41].mxu1  ;;  %v3111_v16 = vsel %vm2043_vm5, %v3105_v14, -inf }
0x120a   : > { %3112 = vmax.xlane.f32.xlu1 %v3111_v16  ;;  %v3108_v17 = vpop.f32.mrb[42].mxu1 }
0x120b   : > { %v5395_v18 = vpop.f32.mrb[43].mxu1 }
0x121b   : > { %3234 = vrot.lane.b32.xlu1 %v7479_v62, %s6603_s26 }
0x121f   : > { %3232 = vrot.lane.b32.xlu1 %v7475_v55, %s6603_s26 }
0x1297   : > { %v3113_v2 = vpop.xlane.xlu1 %3112 }
0x1298   : > { %v3114_v19 = vsub.f32 %v3105_v14, %v3113_v2  ;;  %v5786_v2 = vld [vmem:[%s7265_s30 + $0x30] sm:$0xff]  }
0x129a   : > { %v3115_v20 = vmul.f32 1.442695, %v3114_v19 }
0x129b   : > { %v3235_v28 = vpop.permute.xlu1 %3234 }
0x129c   : > { %5892 = vpow2.f32 %v3115_v20  ;;  %v3240_v29 = vsel %vm1996_vm3, %v3235_v28, 0  ;;  %v5787_v20 = vld [vmem:[%s7265_s30 + $0x38] sm:$0xff]   ;;  %s7978_s30 = sld [smem:[#allocation60_spill]] (!%p5030_p1) }
0x129f   : > { %v3233_v30 = vpop.permute.xlu1 %3232 }
0x12a6   : > { %v5893_v21 = vpop.eup %5892 }
0x12a7   : > { %v3117_v23 = vsel %vm2043_vm5, %v5893_v21, 0.0 }
0x12a8   : > { %3118 = vadd.xlane.f32.xlu0 %v3117_v23 }
0x12be   : > { %3123 = vrot.lane.b32.xlu0 %v7505_v22, %s6602_s24 }
0x12dd   : > { %2941 = vmax.xlane.f32.xlu0 %v2940_v24 }
0x12f3   : > { %2952 = vrot.lane.b32.xlu0 %v7505_v22, %s6601_s8 }
0x1335   : > { %v3119_v62 = vpop.xlane.xlu0 %3118 }
0x1336   : > { %5894 = vrcp.f32 %v3119_v62 }
0x1339   : > { %v3124_v55 = vpop.permute.xlu0 %3123 }
0x133a   : > { %v3129_v25 = vand.u32 %v3124_v55, %v7379_v1 }
0x133c   : > { %5397 = vmatpush3.bf16.msra.mxu1 %v3129_v25 }
0x133d   : > { %5410 = vmatprep.subr.bf16.mxu1 %v6597_v47 }
0x1340   : > { %v5895_v26 = vpop.eup %5894 }
0x1341   : > { %v3121_v27 = vmul.f32 %v5895_v26, %v5893_v21 }
0x1343   : > { %v3122_v59 = vpack.c.bf16 %v3121_v27, %v3121_v27 }
0x1345   : > { %5399 = vmatmul.mubr.msk.bf16.vlgmr.msra.gmra.mrb[44].mxu1 %vm2056_vm6, %v3122_v59 }
0x1346   : > { %5411 = vmatpush3.bf16.xpose.msra.mxu1 %v3240_v29  ;;  %5412 = vmatprep.mubr.msk.bf16.mxu1 %vm6599_vm2, %v6597_v47  ;;  %v5941_v29 = vld [vmem:[#allocation2 + $0x8] sm:$0x3] }
0x134d   : > { %5413 = vmatmul.mubr.msk.bf16.vlgmr.msra.gmra.mrb[48].mxu1 %vm1996_vm3, %v3233_v30 }
0x134e   : > { %3701 = vmatprep.mubr.bf16.mxu1 %v6598_v10 }
0x136a   : > { %v2942_v31 = vpop.xlane.xlu0 %2941 }
0x136b   : > { %v2943_v32 = vsub.f32 %v2934_v9, %v2942_v31 }
0x136d   : > { %v2944_v33 = vmul.f32 1.442695, %v2943_v32  ;;  %v5788_v32 = vld [vmem:[%s7270_s21] ss:$16 sps:$4 sm:$0xff]  }
0x136e   : > { %v2953_v36 = vpop.permute.xlu0 %2952 }
0x136f   : > { %5896 = vpow2.f32 %v2944_v33  ;;  %v2958_v39 = vand.u32 %v2953_v36, %v7379_v1  ;;  %v5790_v33 = vld [vmem:[%s7270_s21 + $0x4] ss:$16 sps:$4 sm:$0xff]   ;;  %v5793_v36 = vld [vmem:[%s7270_s21 + $0xc] ss:$16 sps:$4 sm:$0xff]  }
0x1370   : > { %3669 = vmatprep.subr.bf16.mxu1 %v5790_v33  ;;  %v5837_v33 = vld [vmem:[%s7274_s4 + $0xc0] sm:$0xff]  }
0x1371   : > { %5377 = vmatpush3.bf16.msra.mxu0 %v2958_v39  ;;  %v5796_v39 = vld [vmem:[%s7270_s21 + $0x24] ss:$16 sps:$4 sm:$0xff]   ;;  %3670 = vmatpush1.bf16.msra.mxu1 %v5788_v32  ;;  %v5836_v32 = vld [vmem:[%s7274_s4 + $0x40] sm:$0xff]  }
0x1372   : > { %5382 = vmatprep.subr.bf16.mxu0 %v6597_v47  ;;  %3671 = vmatprep.subr.bf16.mxu1 %v5796_v39  ;;  %v5840_v39 = vld [vmem:[%s7274_s4 + $0x48] sm:$0xff]  }
0x1379   : > { %v5897_v40 = vpop.eup %5896 }
0x137a   : > { %v2946_v41 = vsel %vm2043_vm5, %v5897_v40, 0.0 }
0x137b   : > { %2947 = vadd.xlane.f32.xlu1 %v2946_v41  ;;  %v5794_v41 = vld [vmem:[%s7270_s21 + $0x20] ss:$16 sps:$4 sm:$0xff]  }
0x137c   : > { %3672 = vmatpush1.bf16.msra.mxu1 %v5794_v41  ;;  %v5842_v41 = vld [vmem:[%s7274_s4 + $0x8] sm:$0xff]  }
0x1408   : > { %v2948_v42 = vpop.xlane.xlu1 %2947 }
0x1409   : > { %5898 = vrcp.f32 %v2948_v42  ;;  %v5797_v42 = vld [vmem:[%s7270_s21 + $0x28] ss:$16 sps:$4 sm:$0xff]  }
0x1413   : > { %v5899_v43 = vpop.eup %5898 }
0x1414   : > { %v2950_v44 = vmul.f32 %v5899_v43, %v5897_v40  ;;  %v5799_v40 = vld [vmem:[%s7270_s21 + $0x2c] ss:$16 sps:$4 sm:$0xff]  }
0x1416   : > { %v2951_v45 = vpack.c.bf16 %v2950_v44, %v2950_v44 }
0x1418   : > { %5379 = vmatmul.mubr.msk.bf16.vlgmr.msra.gmra.mrb[32].mxu0 %vm2056_vm6, %v2951_v45  ;;  %v3165_v46 = vpop.f32.mrb[44].mxu1 }
0x1419   : > { %v5400_v49 = vpop.f32.mrb[45].mxu1  ;;  %5386 = vmatprep.mubr.msk.bf16.mxu0 %vm6599_vm2, %v6597_v47  ;;  %5383 = vmatpush3.bf16.msra.mxu0 %v5782_v58  ;;  %v5803_v58 = vld [vmem:[%s7270_s21 + $0x48] ss:$16 sps:$4 sm:$0xff]  }
0x141a   : > { %v3168_v50 = vpop.f32.mrb[46].mxu1  ;;  %5384 = vmatprep.subr.bf16.mxu0 %v6597_v47 }
0x141b   : > { %v5401_v51 = vpop.f32.mrb[47].mxu1 }
0x141d   : > { %5385 = vmatpush3.bf16.msra.mxu0 %v5783_v60  ;;  %v5808_v60 = vld [vmem:[%s7270_s21 + $0x64] ss:$16 sps:$4 sm:$0xff]  }
0x141e   : > { %5402 = vmatprep.subr.bf16.mxu0 %v6597_v47 }
0x1420   : > { %v3276_v52 = vpop.f32.mrb[48].mxu1 }
0x1421   : > { %v5414_v53 = vpop.f32.mrb[49].mxu1  ;;  %v3282_v54 = vsel %vm2043_vm5, %v3276_v52, -inf }
0x1422   : > { %3283 = vmax.xlane.f32.xlu1 %v3282_v54  ;;  %v3279_v57 = vpop.f32.mrb[50].mxu1  ;;  %v5802_v54 = vld [vmem:[%s7270_s21 + $0x44] ss:$16 sps:$4 sm:$0xff]  }
0x1423   : > { %v5415_v61 = vpop.f32.mrb[51].mxu1  ;;  %v5805_v57 = vld [vmem:[%s7270_s21 + $0x4c] ss:$16 sps:$4 sm:$0xff]   ;;  %3673 = vmatprep.subr.bf16.mxu1 %v5802_v54 }
0x1424   : > { %v5800_v61 = vld [vmem:[%s7270_s21 + $0x40] ss:$16 sps:$4 sm:$0xff]   ;;  %v5853_v54 = vld [vmem:[%s7274_s4 + $0xe0] sm:$0xff]  }
0x1425   : > { %3674 = vmatpush1.bf16.msra.mxu1 %v5800_v61  ;;  %v5855_v61 = vld [vmem:[%s7274_s4 + $0xa0] sm:$0xff]  }
0x1426   : > { %3675 = vmatprep.subr.bf16.mxu1 %v5808_v60  ;;  %v5857_v60 = vld [vmem:[%s7274_s4 + $0xe8] sm:$0xff]  }
0x14af   : > { %v3284_v0 = vpop.xlane.xlu1 %3283 }
0x14b0   : > { %v3285_v63 = vsub.f32 %v3276_v52, %v3284_v0  ;;  %v5811_v0 = vld [vmem:[%s7270_s21 + $0x6c] ss:$16 sps:$4 sm:$0xff]  }
0x14b2   : > { %v3286_v3 = vmul.f32 1.442695, %v3285_v63  ;;  %v5806_v63 = vld [vmem:[%s7270_s21 + $0x60] ss:$16 sps:$4 sm:$0xff]  }
0x14b3   : > { %3676 = vmatpush1.bf16.msra.mxu1 %v5806_v63  ;;  %v5859_v63 = vld [vmem:[%s7274_s4 + $0xa8] sm:$0xff]  }
0x14b4   : > { %5900 = vpow2.f32 %v3286_v3  ;;  %v5809_v3 = vld [vmem:[%s7270_s21 + $0x68] ss:$16 sps:$4 sm:$0xff]  }
0x14be   : > { %v5901_v4 = vpop.eup %5900 }
0x14bf   : > { %v3288_v5 = vsel %vm2043_vm5, %v5901_v4, 0.0 }
0x14c0   : > { %3289 = vadd.xlane.f32.xlu1 %v3288_v5  ;;  %v5817_v5 = vld [vmem:[%s7270_s21 + $0x8c] ss:$16 sps:$4 sm:$0xff]  }
0x14d1   : > { %3294 = vrot.lane.b32.xlu1 %v7505_v22, %s6603_s26  ;;  %v3171_v22 = vpack.c.bf16 %v3165_v46, %v3165_v46 }
0x14eb   : > { %v2994_v6 = vpop.f32.mrb[32].mxu0 }
0x14ec   : > { %v3000_v8 = vpack.c.bf16 %v2994_v6, %v2994_v6  ;;  %v5380_v9 = vpop.f32.mrb[33].mxu0  ;;  %v5812_v6 = vld [vmem:[%s7270_s21 + $0x80] ss:$16 sps:$4 sm:$0xff]  }
0x14ed   : > { %v2997_v11 = vpop.f32.mrb[34].mxu0  ;;  %v5823_v9 = vld [vmem:[%s7270_s21 + $0xac] ss:$16 sps:$4 sm:$0xff]  }
0x14ee   : > { %v5381_v12 = vpop.f32.mrb[35].mxu0  ;;  %5387 = vmatmul.mubr.msk.bf16.vlgmr.msra.gmra.mrb[28].mxu0 %vm1996_vm3, %v3000_v8  ;;  %v5820_v8 = vld [vmem:[%s7270_s21 + $0xa4] ss:$16 sps:$4 sm:$0xff]   ;;  %v5818_v11 = vld [vmem:[%s7270_s21 + $0xa0] ss:$16 sps:$4 sm:$0xff]  }
0x14ef   : > { %5403 = vmatpush3.bf16.msra.mxu0 %v5784_v7  ;;  %5406 = vmatprep.mubr.msk.bf16.mxu0 %vm6599_vm2, %v6597_v47  ;;  %v5815_v7 = vld [vmem:[%s7270_s21 + $0x88] ss:$16 sps:$4 sm:$0xff]  }
0x14f0   : > { %5404 = vmatprep.subr.bf16.mxu0 %v6597_v47  ;;  %v5821_v12 = vld [vmem:[%s7270_s21 + $0xa8] ss:$16 sps:$4 sm:$0xff]  }
0x14f3   : > { %5405 = vmatpush3.bf16.msra.mxu0 %v5785_v13  ;;  %v5826_v13 = vld [vmem:[%s7270_s21 + $0xc4] ss:$16 sps:$4 sm:$0xff]  }
0x14f4   : > { %5416 = vmatprep.subr.bf16.mxu0 %v6597_v47 }
0x14fa   : > { %5407 = vmatmul.mubr.msk.bf16.vlgmr.msra.gmra.mrb[28].mxu0 %vm1996_vm3, %v3171_v22  ;;  %v5829_v22 = vld [vmem:[%s7270_s21 + $0xcc] ss:$16 sps:$4 sm:$0xff]  }
0x14fb   : > { %5418 = vmatprep.mubr.msk.bf16.mxu0 %vm6599_vm2, %v6597_v47 }
0x154d   : > { %v3290_v14 = vpop.xlane.xlu1 %3289 }
0x154e   : > { %5902 = vrcp.f32 %v3290_v14  ;;  %v5824_v14 = vld [vmem:[%s7270_s21 + $0xc0] ss:$16 sps:$4 sm:$0xff]  }
0x1551   : > { %v3295_v15 = vpop.permute.xlu1 %3294 }
0x1552   : > { %v3300_v16 = vand.u32 %v3295_v15, %v7379_v1  ;;  %v5827_v15 = vld [vmem:[%s7270_s21 + $0xc8] ss:$16 sps:$4 sm:$0xff]  }
0x1554   : > { %5417 = vmatpush3.bf16.msra.mxu0 %v3300_v16  ;;  %v5832_v16 = vld [vmem:[%s7270_s21 + $0xe4] ss:$16 sps:$4 sm:$0xff]  }
0x1555   : > { %5422 = vmatprep.subr.bf16.mxu0 %v6597_v47 }
0x1558   : > { %v5903_v17 = vpop.eup %5902 }
0x1559   : > { %v3292_v18 = vmul.f32 %v5903_v17, %v5901_v4  ;;  %v5814_v4 = vld [vmem:[%s7270_s21 + $0x84] ss:$16 sps:$4 sm:$0xff]   ;;  %v5835_v17 = vld [vmem:[%s7270_s21 + $0xec] ss:$16 sps:$4 sm:$0xff]  }
0x155a   : > { %3677 = vmatprep.subr.bf16.mxu1 %v5814_v4  ;;  %v5861_v4 = vld [vmem:[%s7274_s4 + $0xf0] sm:$0xff]  }
0x155b   : > { %v3293_v19 = vpack.c.bf16 %v3292_v18, %v3292_v18  ;;  %3678 = vmatpush1.bf16.msra.mxu1 %v5812_v6  ;;  %v5830_v18 = vld [vmem:[%s7270_s21 + $0xe0] ss:$16 sps:$4 sm:$0xff]   ;;  %v5863_v6 = vld [vmem:[%s7274_s4 + $0xb0] sm:$0xff]  }
0x155c   : > { %3679 = vmatprep.subr.bf16.mxu1 %v5820_v8  ;;  %v5865_v8 = vld [vmem:[%s7274_s4 + $0xf8] sm:$0xff]  }
0x155d   : > { %5419 = vmatmul.mubr.msk.bf16.vlgmr.msra.gmra.mrb[36].mxu0 %vm2056_vm6, %v3293_v19 }
0x155e   : > { %5423 = vmatpush3.bf16.msra.mxu0 %v5786_v2  ;;  %5426 = vmatprep.mubr.msk.bf16.mxu0 %vm6599_vm2, %v6597_v47  ;;  %v5833_v2 = vld [vmem:[%s7270_s21 + $0xe8] ss:$16 sps:$4 sm:$0xff]  }
0x155f   : > { %5424 = vmatprep.subr.bf16.mxu0 %v6597_v47  ;;  %3680 = vmatpush1.bf16.msra.mxu1 %v5818_v11  ;;  %v5867_v11 = vld [vmem:[%s7274_s4 + $0xb8] sm:$0xff]  }
0x1560   : > { %3681 = vmatprep.subr.bf16.mxu1 %v5826_v13  ;;  %v3503_v13 = vsub.s32 3, %v7353_v34 }
0x1562   : > { %5425 = vmatpush3.bf16.msra.mxu0 %v5787_v20 }
0x1563   : > { %3712 = vmatprep.subr.bf16.mxu0 %v5793_v36  ;;  %3682 = vmatpush1.bf16.msra.mxu1 %v5824_v14  ;;  %v5839_v36 = vld [vmem:[%s7274_s4 + $0x80] sm:$0xff]  }
0x1564   : > { %3683 = vmatprep.subr.bf16.mxu1 %v5832_v16 }
0x1567   : > { %3684 = vmatpush1.bf16.msra.mxu1 %v5830_v18 }
0x1568   : > { %5188 = vmatprep.subr.bf16.mxu1 %v5836_v32 }
0x1630   : > { %v3336_v21 = vpop.f32.mrb[36].mxu0 }
0x1631   : > { %v3342_v23 = vpack.c.bf16 %v3336_v21, %v3336_v21  ;;  %v5420_v1 = vpop.f32.mrb[37].mxu0 }
0x1632   : > { %v3339_v24 = vpop.f32.mrb[38].mxu0 }
0x1633   : > { %v5421_v62 = vpop.f32.mrb[39].mxu0  ;;  %5427 = vmatmul.mubr.msk.bf16.vlgmr.msra.gmra.mrb[28].mxu0 %vm1996_vm3, %v3342_v23 }
0x1634   : > { %3744 = vmatprep.mubr.bf16.mxu0 %v6598_v10 }
0x1706   : > { %v3396_v55 = vpop.f32.mrb[28].mxu0 }
0x1707   : > { %v5470_v25 = vadd.f32 %v7448_v56, %v3396_v55  ;;  %v5428_v26 = vpop.f32.mrb[29].mxu0 }
0x1708   : > { %v3399_v27 = vpop.f32.mrb[30].mxu0 }
0x1709   : > { %v3404_v47 = vrot.slane %v5470_v25, 3  ;;  %v5429_v28 = vpop.f32.mrb[31].mxu0  ;;  %v4955_v25 = vld [vmem:[%s933_s23] ss:$0 sm:$0xff] }
0x170a   : > { %v4956_v28 = vld [vmem:[%s941_s29] ss:$0 sm:$0xff] }
0x170b   : > { %v3406_v59 = vadd.f32 %v7519_v48, %v3404_v47  ;;  %v3407_v30 = vadd.f32 %v5941_v29, %v3404_v47  ;;  %v5791_v48 = vld [vmem:[%s7270_s21 + $0x8] ss:$16 sps:$4 sm:$0xff]  }
0x170c   : > { %3713 = vmatpush1.bf16.msra.mxu0 %v5791_v48  ;;  %v5838_v48 = vld [vmem:[%s7274_s4] sm:$0xff]  }
0x170d   : > { %3408 = vst [vmem:[#allocation2] sm:$0xe0] %v3406_v59  ;;  %3409 = vst [vmem:[#allocation2 + $0x8] sm:$0x3] %v3407_v30  ;;  %3714 = vmatprep.subr.bf16.mxu0 %v5799_v40  ;;  %v5841_v40 = vld [vmem:[%s7274_s4 + $0xc8] sm:$0xff]  }
0x1710   : > { %3715 = vmatpush1.bf16.msra.mxu0 %v5797_v42  ;;  %v5843_v42 = vld [vmem:[%s7274_s4 + $0x88] sm:$0xff]  }
0x1711   : > { %3716 = vmatprep.subr.bf16.mxu0 %v5805_v57  ;;  %v5854_v57 = vld [vmem:[%s7274_s4 + $0x20] sm:$0xff]  }
0x1714   : > { %v7595_v10 = vld [vmem:[#allocation2] sm:$0xff]  ;;  %v7597_v31 = vld [vmem:[#allocation2 + $0x8] sm:$0x3]  ;;  %3717 = vmatpush1.bf16.msra.mxu0 %v5803_v58  ;;  %v5856_v58 = vld [vmem:[%s7274_s4 + $0x68] sm:$0xff]  }
0x1715   : > { %3414 = vadd.xlane.f32.xlu1 %v7595_v10  ;;  %v3416_v56 = vsel %vm1690_vm1, %v7597_v31, 0.0  ;;  %3718 = vmatprep.subr.bf16.mxu0 %v5811_v0  ;;  %v5858_v0 = vld [vmem:[%s7274_s4 + $0x28] sm:$0xff]  }
0x1716   : > { %3417 = vadd.xlane.f32.xlu0 %v3416_v56 }
0x1718   : > { %3719 = vmatpush1.bf16.msra.mxu0 %v5809_v3  ;;  %v5860_v3 = vld [vmem:[%s7274_s4 + $0x70] sm:$0xff]  }
0x1719   : > { %3720 = vmatprep.subr.bf16.mxu0 %v5817_v5  ;;  %v5862_v5 = vld [vmem:[%s7274_s4 + $0x30] sm:$0xff]  }
0x171c   : > { %3721 = vmatpush1.bf16.msra.mxu0 %v5815_v7  ;;  %v5864_v7 = vld [vmem:[%s7274_s4 + $0x78] sm:$0xff]  }
0x171d   : > { %3722 = vmatprep.subr.bf16.mxu0 %v5823_v9  ;;  %v5866_v9 = vld [vmem:[%s7274_s4 + $0x38] sm:$0xff]  }
0x1720   : > { %3723 = vmatpush1.bf16.msra.mxu0 %v5821_v12  ;;  %v3487_v12 = vld [vmem:[%s7272_s1] sm:$0xf] }
0x1721   : > { %3724 = vmatprep.subr.bf16.mxu0 %v5829_v22  ;;  %v3492_v22 = vrot.slane %v3487_v12, %v1767_v37  ;;  %v3500_v14 = vrot.slane %v3487_v12, %v1775_v38  ;;  %v3504_v16 = vrot.slane %v3487_v12, %v3503_v13 }
0x1724   : > { %3725 = vmatpush1.bf16.msra.mxu0 %v5827_v15  ;;  %v3496_v15 = vrot.slane %v3487_v12, %v1771_v35 }
0x1725   : > { %3726 = vmatprep.subr.bf16.mxu0 %v5835_v17 }
0x1728   : > { %3727 = vmatpush1.bf16.msra.mxu0 %v5833_v2 }
0x1729   : > { %5210 = vmatprep.subr.bf16.mxu0 %v5837_v33 }
0x17a2   : > { %v3415_v43 = vpop.xlane.xlu1 %3414 }
0x17a3   : > { %v3419_v44 = vmul.f32 0.0078125, %v3415_v43  ;;  %v3418_v45 = vpop.xlane.xlu0 %3417  ;;  %v5844_v43 = vld [vmem:[%s7274_s4 + $0x50] sm:$0xff]  }
0x17a4   : > { %v3420_v46 = vmul.f32 0.0078125, %v3418_v45  ;;  %v5846_v45 = vld [vmem:[%s7274_s4 + $0x10] sm:$0xff]  }
0x17a5   : > { %v7611_v49 = vsub.f32 %v7595_v10, %v3419_v44  ;;  %v5845_v44 = vld [vmem:[%s7274_s4 + $0xd0] sm:$0xff]  }
0x17a6   : > { %v7614_v50 = vsub.f32 %v7597_v31, %v3420_v46  ;;  %v5847_v46 = vld [vmem:[%s7274_s4 + $0x90] sm:$0xff]  }
0x17a7   : > { %v3423_v51 = vmul.f32 %v7611_v49, %v7611_v49 }
0x17a8   : > { %v3424_v52 = vmul.f32 %v7614_v50, %v7614_v50 }
0x17a9   : > { %3425 = vadd.xlane.f32.xlu0 %v3423_v51  ;;  %v5850_v51 = vld [vmem:[%s7274_s4 + $0x18] sm:$0xff]  }
0x17aa   : > { %v3427_v53 = vsel %vm1690_vm1, %v3424_v52, 0.0  ;;  %v5851_v52 = vld [vmem:[%s7274_s4 + $0x98] sm:$0xff]  }
0x17ad   : > { %3428 = vadd.xlane.f32.xlu0 %v3427_v53  ;;  %v5852_v53 = vld [vmem:[%s7274_s4 + $0x60] sm:$0xff]  }
0x1836   : > { %v3426_v19 = vpop.xlane.xlu0 %3425 }
0x1837   : > { %v3430_v20 = vmul.f32 0.0078125, %v3426_v19 }
0x1839   : > { %v3432_v21 = vadd.f32 1e-05, %v3430_v20 }
0x183a   : > { %v3429_v23 = vpop.xlane.xlu0 %3428 }
0x183b   : > { %5904 = vrsqrt.f32 %v3432_v21  ;;  %v3431_v1 = vmul.f32 0.0078125, %v3429_v23 }
0x183d   : > { %v3433_v24 = vadd.f32 1e-05, %v3431_v1 }
0x183f   : > { %5906 = vrsqrt.f32 %v3433_v24 }
0x1845   : > { %v5905_v62 = vpop.eup %5904 }
0x1846   : > { %v3436_v55 = vmul.f32 %v5905_v62, %v7611_v49  ;;  %v5848_v49 = vld [vmem:[%s7274_s4 + $0x58] sm:$0xff]  }
0x1848   : > { %v3444_v47 = vmul.f32 %v4955_v25, %v3436_v55 }
0x1849   : > { %v5907_v26 = vpop.eup %5906 }
0x184a   : > { %v3437_v27 = vmul.f32 %v5907_v26, %v7614_v50  ;;  %v3452_v29 = vadd.f32 %v4956_v28, %v3444_v47  ;;  %v5849_v50 = vld [vmem:[%s7274_s4 + $0xd8] sm:$0xff]  }
0x184c   : > { %v3445_v59 = vmul.f32 %v4955_v25, %v3437_v27 }
0x184e   : > { %v3453_v30 = vadd.f32 %v4956_v28, %v3445_v59 }
0x1850   : > { %v3454_v56 = vpack.c.bf16 %v3453_v30, %v3452_v29 }
0x1852   : > { %3702 = vmatmul.mubr.bf16.vlgmr.msra.gmra.mrb[52].mxu1 %v3454_v56  ;;  %3745 = vmatmul.mubr.bf16.vlgmr.msra.gmra.mrb[40].mxu0 %v3454_v56 }
0x1853   : > { %5189 = vmatpush3.bf16.msra.mxu1 %v5838_v48  ;;  %5211 = vmatpush3.bf16.msra.mxu0 %v5839_v36 }
0x1854   : > { %5190 = vmatprep.subr.bf16.mxu1 %v5840_v39  ;;  %5212 = vmatprep.subr.bf16.mxu0 %v5841_v40 }
0x1857   : > { %5191 = vmatpush3.bf16.msra.mxu1 %v5842_v41  ;;  %5213 = vmatpush3.bf16.msra.mxu0 %v5843_v42 }
0x1858   : > { %5192 = vmatprep.subr.bf16.mxu1 %v5844_v43  ;;  %5214 = vmatprep.subr.bf16.mxu0 %v5845_v44 }
0x185b   : > { %5193 = vmatpush3.bf16.msra.mxu1 %v5846_v45  ;;  %5215 = vmatpush3.bf16.msra.mxu0 %v5847_v46 }
0x185c   : > { %5194 = vmatprep.subr.bf16.mxu1 %v5848_v49  ;;  %5216 = vmatprep.subr.bf16.mxu0 %v5849_v50 }
0x185f   : > { %5195 = vmatpush3.bf16.msra.mxu1 %v5850_v51  ;;  %5217 = vmatpush3.bf16.msra.mxu0 %v5851_v52 }
0x1860   : > { %5196 = vmatprep.subr.bf16.mxu1 %v5852_v53  ;;  %5218 = vmatprep.subr.bf16.mxu0 %v5853_v54 }
0x1863   : > { %5197 = vmatpush3.bf16.msra.mxu1 %v5854_v57  ;;  %5219 = vmatpush3.bf16.msra.mxu0 %v5855_v61 }
0x1864   : > { %5198 = vmatprep.subr.bf16.mxu1 %v5856_v58  ;;  %5220 = vmatprep.subr.bf16.mxu0 %v5857_v60 }
0x1867   : > { %5199 = vmatpush3.bf16.msra.mxu1 %v5858_v0  ;;  %5221 = vmatpush3.bf16.msra.mxu0 %v5859_v63 }
0x1868   : > { %5200 = vmatprep.subr.bf16.mxu1 %v5860_v3  ;;  %5222 = vmatprep.subr.bf16.mxu0 %v5861_v4 }
0x186b   : > { %5201 = vmatpush3.bf16.msra.mxu1 %v5862_v5  ;;  %5223 = vmatpush3.bf16.msra.mxu0 %v5863_v6 }
0x186c   : > { %5202 = vmatprep.subr.bf16.mxu1 %v5864_v7  ;;  %5224 = vmatprep.subr.bf16.mxu0 %v5865_v8 }
0x186f   : > { %5203 = vmatpush3.bf16.msra.mxu1 %v5866_v9  ;;  %5225 = vmatpush3.bf16.msra.mxu0 %v5867_v11 }
0x1925   : > { %v3703_v17 = vpop.f32.mrb[52].mxu1  ;;  %v3746_v18 = vpop.f32.mrb[40].mxu0 }
0x1926   : > { %v7691_v2 = vadd.f32 %v3703_v17, %v3492_v22  ;;  %v7693_v19 = vadd.f32 %v3746_v18, %v3500_v14  ;;  %v3705_v20 = vpop.f32.mrb[53].mxu1  ;;  %v3748_v21 = vpop.f32.mrb[41].mxu0 }
0x1927   : > { %v7695_v23 = vadd.f32 %v3705_v20, %v3496_v15  ;;  %v7697_v1 = vadd.f32 %v3748_v21, %v3504_v16  ;;  %v3707_v37 = vpop.f32.mrb[54].mxu1  ;;  %v3750_v24 = vpop.f32.mrb[42].mxu0 }
0x1928   : > { %v4989_v38 = vmul.f32 -1.702, %v7691_v2  ;;  %v4991_v34 = vmul.f32 -1.702, %v7693_v19  ;;  %v3708_v35 = vadd.f32 %v3707_v37, %v3492_v22  ;;  %v3751_v62 = vadd.f32 %v3750_v24, %v3500_v14  ;;  %v3709_v55 = vpop.f32.mrb[55].mxu1  ;;  %v3752_v25 = vpop.f32.mrb[43].mxu0 }
0x1929   : > { %v4990_v26 = vmul.f32 -1.702, %v7695_v23  ;;  %v4992_v27 = vmul.f32 -1.702, %v7697_v1  ;;  %v3710_v47 = vadd.f32 %v3709_v55, %v3496_v15  ;;  %v3753_v28 = vadd.f32 %v3752_v25, %v3504_v16 }
0x192a   : > { %v3771_v59 = vmul.f32 1.442695, %v4989_v38  ;;  %v3775_v29 = vmul.f32 1.442695, %v4991_v34  ;;  %v4993_v30 = vmul.f32 -1.702, %v3708_v35 }
0x192b   : > { %v3773_v56 = vmul.f32 1.442695, %v4990_v26  ;;  %v3777_v32 = vmul.f32 1.442695, %v4992_v27  ;;  %v4995_v33 = vmul.f32 -1.702, %v3751_v62 }
0x192c   : > { %5908 = vpow2.f32 %v3771_v59  ;;  %v3779_v48 = vmul.f32 1.442695, %v4993_v30  ;;  %v4994_v36 = vmul.f32 -1.702, %v3710_v47  ;;  %v4996_v39 = vmul.f32 -1.702, %v3753_v28 }
0x192d   : > { %5910 = vpow2.f32 %v3775_v29  ;;  %v3783_v40 = vmul.f32 1.442695, %v4995_v33 }
0x192e   : > { %5912 = vpow2.f32 %v3773_v56  ;;  %v3781_v41 = vmul.f32 1.442695, %v4994_v36  ;;  %v3785_v42 = vmul.f32 1.442695, %v4996_v39  ;;  %v6604_v36 = vmov (!%p5030_p1), 0.0  }
0x192f   : > { %5914 = vpow2.f32 %v3777_v32  ;;  %5430 = vmatprep.subr.bf16.mxu0 (!%p5030_p1), %v6604_v36  ;;  %5450 = vmatprep.subr.bf16.mxu1 (!%p5030_p1), %v6604_v36 }
0x1930   : > { %5916 = vpow2.f32 %v3779_v48 }
0x1931   : > { %5918 = vpow2.f32 %v3783_v40 }
0x1932   : > { %5920 = vpow2.f32 %v3781_v41 }
0x1933   : > { %5922 = vpow2.f32 %v3785_v42 }
0x1936   : > { %v5909_v43 = vpop.eup %5908 }
0x1937   : > { %v5911_v44 = vpop.eup %5910  ;;  %v3787_v45 = vadd.f32 1.0, %v5909_v43 }
0x1938   : > { %v5913_v46 = vpop.eup %5912  ;;  %v3789_v49 = vadd.f32 1.0, %v5911_v44 }
0x1939   : > { %v5915_v50 = vpop.eup %5914  ;;  %5924 = vrcp.f32 %v3787_v45  ;;  %v3788_v51 = vadd.f32 1.0, %v5913_v46 }
0x193a   : > { %v5917_v52 = vpop.eup %5916  ;;  %5926 = vrcp.f32 %v3789_v49  ;;  %v3790_v53 = vadd.f32 1.0, %v5915_v50 }
0x193b   : > { %v5919_v54 = vpop.eup %5918  ;;  %5928 = vrcp.f32 %v3788_v51  ;;  %v3791_v57 = vadd.f32 1.0, %v5917_v52  ;;  %v5944_v51 = vld [vmem:[%s7978_s30 + $0x8] sm:$0xff] (!%p5030_p1)  }
0x193c   : > { %v5921_v61 = vpop.eup %5920  ;;  %5930 = vrcp.f32 %v3790_v53  ;;  %v3793_v58 = vadd.f32 1.0, %v5919_v54  ;;  %v5945_v52 = vld [vmem:[%s7978_s30 + $0x8] sm:$0xff] (!%p5030_p1)   ;;  %v5946_v53 = vld [vmem:[%s7978_s30 + $0x10] sm:$0xff] (!%p5030_p1)  }
0x193d   : > { %v5923_v60 = vpop.eup %5922  ;;  %5932 = vrcp.f32 %v3791_v57  ;;  %v3792_v0 = vadd.f32 1.0, %v5921_v61  ;;  %v5947_v54 = vld [vmem:[%s7978_s30 + $0x10] sm:$0xff] (!%p5030_p1)   ;;  %v5948_v57 = vld [vmem:[%s7978_s30 + $0x18] sm:$0xff] (!%p5030_p1)  }
0x193e   : > { %5934 = vrcp.f32 %v3793_v58  ;;  %v3794_v63 = vadd.f32 1.0, %v5923_v60  ;;  %v5949_v61 = vld [vmem:[%s7978_s30 + $0x18] sm:$0xff] (!%p5030_p1)   ;;  %v5950_v58 = vld [vmem:[%s7978_s30 + $0x20] sm:$0xff] (!%p5030_p1)  }
0x193f   : > { %5936 = vrcp.f32 %v3792_v0  ;;  %v5951_v60 = vld [vmem:[%s7978_s30 + $0x20] sm:$0xff] (!%p5030_p1)   ;;  %v5952_v0 = vld [vmem:[%s7978_s30 + $0x28] sm:$0xff] (!%p5030_p1)  }
0x1940   : > { %5938 = vrcp.f32 %v3794_v63  ;;  %v5953_v63 = vld [vmem:[%s7978_s30 + $0x28] sm:$0xff] (!%p5030_p1)  }
0x1943   : > { %v5925_v3 = vpop.eup %5924 }
0x1944   : > { %v5927_v4 = vpop.eup %5926  ;;  %v3811_v9 = vmul.f32 %v5925_v3, %v7691_v2  ;;  %v5954_v3 = vld [vmem:[%s7978_s30 + $0x30] sm:$0xff] (!%p5030_p1)  }
0x1945   : > { %v5929_v5 = vpop.eup %5928  ;;  %v3813_v13 = vmul.f32 %v5927_v4, %v7693_v19  ;;  %v4997_v19 = vld [vmem:[%s976_s16] ss:$0 sm:$0xff]  ;;  %v5955_v4 = vld [vmem:[%s7978_s30 + $0x30] sm:$0xff] (!%p5030_p1)  }
0x1946   : > { %v5931_v6 = vpop.eup %5930  ;;  %v3812_v15 = vmul.f32 %v5929_v5, %v7695_v23  ;;  %v5956_v5 = vld [vmem:[%s7978_s30 + $0x38] sm:$0xff] (!%p5030_p1)  }
0x1947   : > { %v5933_v7 = vpop.eup %5932  ;;  %v3814_v18 = vmul.f32 %v5931_v6, %v7697_v1  ;;  %v5957_v6 = vld [vmem:[%s7978_s30 + $0x38] sm:$0xff] (!%p5030_p1)  }
0x1948   : > { %v5935_v8 = vpop.eup %5934  ;;  %v3815_v11 = vmul.f32 %v5933_v7, %v3708_v35 }
0x1949   : > { %v5937_v12 = vpop.eup %5936  ;;  %v3817_v22 = vmul.f32 %v5935_v8, %v3751_v62 }
0x194a   : > { %v5939_v14 = vpop.eup %5938  ;;  %v3819_v16 = vpack.c.bf16 %v3815_v11, %v3811_v9  ;;  %v3816_v17 = vmul.f32 %v5937_v12, %v3710_v47 }
0x194b   : > { %v3821_v20 = vpack.c.bf16 %v3817_v22, %v3813_v13  ;;  %v3818_v21 = vmul.f32 %v5939_v14, %v3753_v28  ;;  %v5039_v14 = vld [vmem:[#allocation22] ss:$0 sm:$0xff] (!%p5030_p1) }
0x194c   : > { %v3820_v37 = vpack.c.bf16 %v3816_v17, %v3812_v15 }
0x194d   : > { %v3822_v24 = vpack.c.bf16 %v3818_v21, %v3814_v18 }
0x194e   : > { %4118 = vmatprep.mubr.bf16.mxu1 %v3820_v37 }
0x194f   : > { %4159 = vmatprep.mubr.bf16.mxu0 %v3822_v24  ;;  %4119 = vmatmul.mubr.bf16.vlgmr.msra.gmra.mrb[56].mxu1 %v3819_v16  ;;  %v5040_v16 = vld [vmem:[#allocation23] ss:$0 sm:$0xff] (!%p5030_p1) }
0x1950   : > { %4160 = vmatmul.mubr.bf16.vlgmr.msra.gmra.mrb[44].mxu0 %v3821_v20  ;;  %5466 = vmatprep.mubr.msk.bf16.mxu1 (!%p5030_p1), %vm6605_vm9, %v6604_v36  ;;  %v4176_v20 = vld [vmem:[#allocation22] sm:$0x1] (!%p5030_p1)  ;;  %v4177_v24 = vld [vmem:[#allocation23] sm:$0x1] (!%p5030_p1) }
0x1951   : > { %5446 = vmatprep.mubr.msk.bf16.mxu0 (!%p5030_p1), %vm6605_vm9, %v6604_v36 }
0x1a22   : > { %v5204_v2 = vpop.f32.mrb[56].mxu1 }
0x1a23   : > { %v5226_v38 = vpop.f32.mrb[44].mxu0  ;;  %v5205_v34 = vpop.f32.mrb[57].mxu1 }
0x1a24   : > { %v5206_v35 = vadd.f32 %v5205_v34, %v5204_v2  ;;  %v5227_v62 = vpop.f32.mrb[45].mxu0  ;;  %v5207_v23 = vpop.f32.mrb[58].mxu1 }
0x1a25   : > { %v5228_v55 = vadd.f32 %v5227_v62, %v5226_v38  ;;  %v5229_v25 = vpop.f32.mrb[46].mxu0  ;;  %v5208_v26 = vpop.f32.mrb[59].mxu1 }
0x1a26   : > { %v4121_v1 = vadd.f32 %v5206_v35, %v4997_v19  ;;  %v5209_v27 = vadd.f32 %v5208_v26, %v5207_v23  ;;  %v5230_v47 = vpop.f32.mrb[47].mxu0 }
0x1a27   : > { %v5231_v28 = vadd.f32 %v5230_v47, %v5229_v25 }
0x1a28   : > { %v4162_v59 = vadd.f32 %v5228_v55, %v4121_v1  ;;  %v4124_v29 = vadd.f32 %v5209_v27, %v4997_v19  ;;  %4175 = sbr.rel (%p5030_p1) target bundleno = 7408 (0x1cf0), region = 176 }
0x1a2a   : > { %v4168_v30 = vadd.f32 %v4162_v59, %v7595_v10  ;;  %v4165_v56 = vadd.f32 %v5231_v28, %v4124_v29  ;;  %v5942_v10 = vld [vmem:[%s7978_s30] sm:$0xff] (!%p5030_p1)  }
0x1a2b   : > { %5431 = vmatpush3.bf16.msra.mxu0 (!%p5030_p1), %v5942_v10 }
0x1a2c   : > { %4170 = vst [vmem:[#allocation2] sm:$0xff] %v4168_v30  ;;  %v4169_v32 = vadd.f32 %v4165_v56, %v7597_v31  ;;  %v4317_v33 = vsel (!%p5030_p1), %vm4316_vm7, %v4168_v30, 0.0  ;;  %v4179_v48 = vsel (!%p5030_p1), %vm4178_vm8, %v4168_v30, 0.0  ;;  %v5943_v31 = vld [vmem:[%s7978_s30] sm:$0xff] (!%p5030_p1)   ;;  %5432 = vmatprep.subr.bf16.mxu0 (!%p5030_p1), %v6604_v36 }
0x1a2d   : > { %4318 = vadd.xlane.f32.xlu0 (!%p5030_p1), %v4317_v33  ;;  %5451 = vmatpush3.bf16.msra.mxu1 (!%p5030_p1), %v5943_v31 }
0x1a2e   : > { %4171 = vst [vmem:[#allocation2 + $0x8] sm:$0x3] %v4169_v32  ;;  %5452 = vmatprep.subr.bf16.mxu1 (!%p5030_p1), %v6604_v36 }
0x1a2f   : > { %5433 = vmatpush3.bf16.msra.mxu0 %v5944_v51 }
0x1a30   : > { %5434 = vmatprep.subr.bf16.mxu0 %v6604_v36 }
0x1a31   : > { %4180 = vadd.xlane.f32.xlu0 %v4179_v48  ;;  %5453 = vmatpush3.bf16.msra.mxu1 %v5945_v52 }
0x1a32   : > { %5454 = vmatprep.subr.bf16.mxu1 %v6604_v36 }
0x1a33   : > { %5435 = vmatpush3.bf16.msra.mxu0 %v5946_v53 }
0x1a34   : > { %5436 = vmatprep.subr.bf16.mxu0 %v6604_v36 }
0x1a35   : > { %5455 = vmatpush3.bf16.msra.mxu1 %v5947_v54 }
0x1a36   : > { %5456 = vmatprep.subr.bf16.mxu1 %v6604_v36 }
0x1a37   : > { %5437 = vmatpush3.bf16.msra.mxu0 %v5948_v57 }
0x1a38   : > { %5438 = vmatprep.subr.bf16.mxu0 %v6604_v36 }
0x1a39   : > { %5457 = vmatpush3.bf16.msra.mxu1 %v5949_v61 }
0x1a3a   : > { %5458 = vmatprep.subr.bf16.mxu1 %v6604_v36 }
0x1a3b   : > { %5439 = vmatpush3.bf16.msra.mxu0 %v5950_v58 }
0x1a3c   : > { %5440 = vmatprep.subr.bf16.mxu0 %v6604_v36 }
0x1a3d   : > { %5459 = vmatpush3.bf16.msra.mxu1 %v5951_v60 }
0x1a3e   : > { %5460 = vmatprep.subr.bf16.mxu1 %v6604_v36 }
0x1a3f   : > { %5441 = vmatpush3.bf16.msra.mxu0 %v5952_v0 }
0x1a40   : > { %5442 = vmatprep.subr.bf16.mxu0 %v6604_v36 }
0x1a41   : > { %5461 = vmatpush3.bf16.msra.mxu1 %v5953_v63 }
0x1a42   : > { %5462 = vmatprep.subr.bf16.mxu1 %v6604_v36 }
0x1a43   : > { %5443 = vmatpush3.bf16.msra.mxu0 %v5954_v3 }
0x1a44   : > { %5444 = vmatprep.subr.bf16.mxu0 %v6604_v36 }
0x1a45   : > { %5463 = vmatpush3.bf16.msra.mxu1 %v5955_v4 }
0x1a46   : > { %5464 = vmatprep.subr.bf16.mxu1 %v6604_v36 }
0x1a47   : > { %5445 = vmatpush3.bf16.msra.mxu0 %v5956_v5 }
0x1a49   : > { %5465 = vmatpush3.bf16.msra.mxu1 %v5957_v6 }
0x1aba   : > { %v4319_v39 = vpop.xlane.xlu0 %4318 }
0x1abb   : > { %v4320_v40 = vmul.f32 0.0078125, %v4319_v39 }
0x1abd   : > { %v7720_v41 = vsub.f32 %v4168_v30, %v4320_v40 }
0x1abe   : > { %v4181_v42 = vpop.xlane.xlu0 %4180 }
0x1abf   : > { %v4182_v43 = vmul.f32 0.0078125, %v4181_v42  ;;  %v4322_v44 = vmul.f32 %v7720_v41, %v7720_v41 }
0x1ac1   : > { %v7724_v45 = vsub.f32 %v4168_v30, %v4182_v43  ;;  %v4323_v46 = vsel %vm4316_vm7, %v4322_v44, 0.0 }
0x1ac2   : > { %4324 = vadd.xlane.f32.xlu1 %v4323_v46 }
0x1ac3   : > { %v4184_v49 = vmul.f32 %v7724_v45, %v7724_v45 }
0x1ac5   : > { %v4185_v50 = vsel %vm4178_vm8, %v4184_v49, 0.0 }
0x1ac6   : > { %4186 = vadd.xlane.f32.xlu1 %v4185_v50 }
0x1b4f   : > { %v4325_v7 = vpop.xlane.xlu1 %4324 }
0x1b50   : > { %v4326_v8 = vmul.f32 0.0078125, %v4325_v7 }
0x1b52   : > { %v4327_v9 = vadd.f32 1e-05, %v4326_v8 }
0x1b53   : > { %v4187_v11 = vpop.xlane.xlu1 %4186 }
0x1b54   : > { %5958 = vrsqrt.f32 %v4327_v9  ;;  %v4188_v12 = vmul.f32 0.0078125, %v4187_v11 }
0x1b56   : > { %v4189_v13 = vadd.f32 1e-05, %v4188_v12 }
0x1b58   : > { %5960 = vrsqrt.f32 %v4189_v13 }
0x1b5e   : > { %v5959_v22 = vpop.eup %5958 }
0x1b5f   : > { %v4329_v15 = vmul.f32 %v5959_v22, %v7720_v41 }
0x1b61   : > { %v4336_v17 = vmul.f32 %v5039_v14, %v4329_v15 }
0x1b62   : > { %v5961_v18 = vpop.eup %5960 }
0x1b63   : > { %v4191_v21 = vmul.f32 %v5961_v18, %v7724_v45  ;;  %v4343_v37 = vadd.f32 %v5040_v16, %v4336_v17 }
0x1b65   : > { %v4192_v2 = vmul.f32 %v4191_v21, %v4176_v20  ;;  %v4344_v38 = vpack.c.bf16 %v4343_v37, %v4343_v37 }
0x1b67   : > { %v4193_v19 = vadd.f32 %v4192_v2, %v4177_v24  ;;  %v4362_v34 = vshrl.u32 %v4344_v38, 16 }
0x1b69   : > { %v4194_v35 = vpack.c.bf16 %v4193_v19, %v4193_v19  ;;  %v4364_v62 = vrot.slane %v4362_v34, 2 }
0x1b6b   : > { %5447 = vmatmul.mubr.bf16.vlgmr.msra.gmra.mrb[0].mxu0 %v4194_v35  ;;  %5467 = vmatmul.mubr.bf16.vlgmr.msra.gmra.mrb[0].mxu1 %v4364_v62 }
0x1c3e   : > { %v4293_v23 = vpop.f32.mrb[0].mxu0  ;;  %v4448_v55 = vpop.f32.mrb[0].mxu1 }
0x1c3f   : > { %v4299_v25 = vmul.f32 %v4293_v23, %v4293_v23  ;;  %v4454_v26 = vmul.f32 %v4448_v55, %v4448_v55  ;;  %v5448_v1 = vpop.f32.mrb[1].mxu0  ;;  %v5468_v27 = vpop.f32.mrb[1].mxu1 }
0x1c40   : > { %v4296_v47 = vpop.f32.mrb[2].mxu0  ;;  %v4451_v28 = vpop.f32.mrb[2].mxu1 }
0x1c41   : > { %v5449_v59 = vpop.f32.mrb[3].mxu0  ;;  %v5469_v29 = vpop.f32.mrb[3].mxu1  ;;  %v4455_v30 = vsel %vm4178_vm8, %v4454_v26, 0.0  ;;  %v4300_v56 = vsel %vm4178_vm8, %v4299_v25, 0.0 }
0x1c42   : > { %4456 = vadd.xlane.f32.xlu1 %v4455_v30  ;;  %4301 = vadd.xlane.f32.xlu0 %v4300_v56 }
0x1ccf   : > { %v4457_v32 = vpop.xlane.xlu1 %4456  ;;  %v4302_v33 = vpop.xlane.xlu0 %4301 }
0x1cd0   : > { %5962 = vrsqrt.f32 %v4457_v32  ;;  %vm4460_vm10 = vcmp.eq.f32.partialorder %v4457_v32, inf  ;;  %v4463_v36 = vand.u32 2147483648, %v4457_v32  ;;  %vm4462_vm11 = vcmp.eq.f32.partialorder %v4457_v32, 0.0 }
0x1cd1   : > { %5964 = vrsqrt.f32 %v4302_v33  ;;  %vm4305_vm12 = vcmp.eq.f32.partialorder %v4302_v33, inf  ;;  %v4308_v41 = vand.u32 2147483648, %v4302_v33  ;;  %vm4307_vm13 = vcmp.eq.f32.partialorder %v4302_v33, 0.0 }
0x1cda   : > { %v5963_v48 = vpop.eup %5962 }
0x1cdb   : > { %v5965_v10 = vpop.eup %5964  ;;  %v4459_v31 = vmul.f32 %v5963_v48, %v4457_v32 }
0x1cdc   : > { %v4304_v39 = vmul.f32 %v5965_v10, %v4302_v33 }
0x1cdd   : > { %v4461_v40 = vsel %vm4460_vm10, %v4457_v32, %v4459_v31 }
0x1cde   : > { %v4464_v42 = vsel %vm4462_vm11, %v4463_v36, %v4461_v40  ;;  %v4306_v43 = vsel %vm4305_vm12, %v4302_v33, %v4304_v39 }
0x1cdf   : > { %v4465_v44 = vmax.f32 %v4464_v42, 1e-12  ;;  %v4309_v45 = vsel %vm4307_vm13, %v4308_v41, %v4306_v43 }
0x1ce0   : > { %v4310_v46 = vmax.f32 %v4309_v45, 1e-12 }
0x1ce1   : > { %5966 = vrcp.f32 %v4465_v44 }
0x1ce2   : > { %5968 = vrcp.f32 %v4310_v46 }
0x1ceb   : > { %v5967_v49 = vpop.eup %5966 }
0x1cec   : > { %v5969_v50 = vpop.eup %5968  ;;  %v4467_v51 = vmul.f32 %v5967_v49, %v4448_v55 }
0x1ced   : > { %v4312_v52 = vmul.f32 %v5969_v50, %v4293_v23 }
0x1cee   : > { %4468 = vst [vmem:[#allocation24 + $0x1] sm:$0x1] %v4467_v51 }
0x1cef   : > { %4313 = vst [vmem:[#allocation24] sm:$0x1] %v4312_v52 }
0x1cf0 PF: > { %s7979_s10 = sld [smem:[#allocation36_spill]]  ;;  %s6606_s12 = smov [#allocation24]  }
0x1cf1   : > { %s4478_s17 = sshll.u32 %s6606_s12, 4  ;;  %s4479_s17 = int_to_ptr.vmem [resolvable:$true] %s4478_s17 }
0x1cf2   : > { %s6468_s25 = scalar_lea.vmem %s4479_s17, 32  ;;  %p6475_p2 = scmp.lt.s32.totalorder %s4479_s17, %s4479_s17 }
0x1cf3   : > { %p6469_p4 = scmp.ne.s32.totalorder %s4479_s17, %s6468_s25  ;;  %p6476_p3 = scmp.lt.s32.totalorder %s6468_s25, %s6468_s25 }
0x1cf5   : > { %p6477_p8 = por %p6476_p3, %p6475_p2 }
0x1cf6   : > { %p5603_p7 = scmp.eq.s32.totalorder %s7979_s10, 1 }
0x1cf8   : > { %p6470_p6 = pnand %p6469_p4, %p5603_p7 }
0x1cfa   : > { %p6471_p9 = pneg %p6470_p6 }
0x1cfc   : > { %p6478_p12 = pnand %p6477_p8, %p6471_p9 }
0x1cfe   : > { %6481 = shalt.err (!%p6478_p12)
}
0x1cff   : > { %s7980_s20 = sld [smem:[#allocation61_spill]] }
0x1d05   : > { %s6482_s28 = scalar_lea.hbm %s7980_s20, 32 }
0x1d06   : > { %p6483_p13 = scmp.ne.s32.totalorder %s7980_s20, %s6482_s28  ;;  %p6488_p0 = scmp.lt.u32.totalorder %s6482_s28, %s7980_s20 }
0x1d08   : > { %p6484_p5 = pnand %p6483_p13, %p5603_p7 }
0x1d0a   : > { %p6485_p10 = pneg %p6484_p5 }
0x1d0c   : > { %p6490_p11 = pnand %p6488_p0, %p6485_p10 }
0x1d0e   : > { %6493 = shalt.err (!%p6490_p11)
}
0x1d0f   : > { %5534 = dma.vmem_to_hbm [thread:$0]  (%p5603_p7), %s4479_s17, 32, %s7980_s20, [#allocation5]  }
0x1d10   : > { %6543 = dma.done.wait (%p5603_p7), [#allocation5], 32  }
0x1d11   : > { %6545 = vsyncadd (%p5603_p7), [#allocation5], 4294967264 }
0x1d12 PF: > { %s7981_s6 = sld [smem:[#allocation35_spill]]  ;;  %s7982_s1 = sld [smem:[#allocation32_spill]] }
0x1d13   : > { %s7983_s22 = sld [smem:[#allocation33_spill]]  ;;  %s7984_s23 = sld [smem:[#allocation41_spill]] }
0x1d14   : > { %s7985_s19 = sld [smem:[#allocation39_spill]]  ;;  %s7986_s24 = smov %s6564_s2 }
0x1d18   : > { %s34_s25 = sadd.s32 1, %s7981_s6  }
0x1d19   : > { %p31_p1 = scmp.ge.s32.totalorder %s34_s25, 4  }
0x1d1a   : > { %s7987_s2 = smov %s7985_s19 }
0x1d1b   :  { %33 = sbr.rel (!%p31_p1) target bundleno = 27 (0x1b), region = 283 }
0x1d22   :  { %4491 = vsyncpa [#allocation4], 1 }
0x1d23   :  { %4493 = vsyncpa [#allocation4 + $0x1], 1 }
0x1d24   :  { %4494 = vsyncpa [#allocation7], 1 }
0x1d25   :  { %4495 = vsyncpa [#allocation10], 1 }
0x1d26   :  { %4496 = vsyncpa [#allocation5], 1 }
0x1d27   :  { %4498 = vsyncpa [#allocation5 + $0x1], 1 }

</bundles_post_ra>
